<compile_context>
chip_gen: v7x
topology: tpu7x:2x2x1
jax: 0.10.0
libtpu: 0.0.40
codegen_flags: <defaults>
</compile_context>

<pallas_src>
import functools

import numpy as np

import jax
import jax.numpy as jnp
from jax.experimental import pallas as pl
from jax.experimental.pallas import tpu as pltpu


# ----------------------------------------------------------------------------
# Fused kernel: full LeNet forward for one batch tile of `bt` images.
# ----------------------------------------------------------------------------
def _lenet_kernel(x_ref, k1_ref, b1_ref, t1_ref, k2_ref, b2_ref,
                  w3_ref, b3_ref, fc1w_ref, fc1b_ref, fc2w_ref, fc2b_ref,
                  out_ref, p1_ref, *, bt):
    f32 = jnp.float32

    def mm(a, b):
        return jnp.dot(a, b, preferred_element_type=f32)

    # ---- conv1: 5 vertical taps stacked along K -> one (bt*28,140)@(140,168)
    x = x_ref[0]                                              # (bt, 28, 28)
    zrow = jnp.zeros((bt, 2, 28), f32)
    xh = jnp.concatenate([zrow, x, zrow], axis=1)             # (bt, 32, 28) H-pad
    lhs1 = jnp.concatenate([xh[:, i:i + 28, :] for i in range(5)], axis=2)
    lhs1 = lhs1.reshape(bt * 28, 5 * 28)                      # (bt*28, 140)
    y1 = jnp.maximum(mm(lhs1, k1_ref[...]) + b1_ref[...], 0.0)   # (bt*28, 168)

    # ---- pool1: W/C half as 0.25 matmul, H half as stride-2 even/odd row sum
    p1_ref[...] = mm(y1, t1_ref[...])                         # (bt*28, 84)
    a1 = p1_ref[pl.ds(0, bt * 14, 2), :] + p1_ref[pl.ds(1, bt * 14, 2), :]
    a1 = a1.reshape(bt, 14, 84)                               # (bt, 14, 84)

    # ---- conv2: deep-K single matmul (bt*10, 420) @ (420, 160) -------------
    lhs2 = jnp.concatenate([a1[:, i:i + 10, :] for i in range(5)], axis=2)
    lhs2 = lhs2.reshape(bt * 10, 5 * 84)                      # (bt*10, 420)
    y2 = jnp.maximum(mm(lhs2, k2_ref[...]) + b2_ref[...], 0.0)   # (bt*10, 160)

    # ---- pool2 + conv3 fused into one (bt, 1600) @ (1600, 120) matmul ------
    y2 = y2.reshape(bt, 10, 160)
    lhs3 = jnp.concatenate([y2[:, h, :] for h in range(10)], axis=1)  # (bt,1600)
    f = jnp.maximum(mm(lhs3, w3_ref[...]) + b3_ref[...], 0.0)         # (bt, 120)

    # ---- FC tail (lane-dense, padded to 128 columns) -----------------------
    h1 = jnp.maximum(mm(f, fc1w_ref[...]) + fc1b_ref[...], 0.0)       # (bt, 128)
    out_ref[0, :, :] = mm(h1, fc2w_ref[...]) + fc2b_ref[...]          # (bt, 128)


# ----------------------------------------------------------------------------
# One-time parameter preparation from PyTorch-layout weights.
# ----------------------------------------------------------------------------
def prepare_params(params):
    w1 = np.asarray(params["conv1_w"], np.float32)   # (6, 1, 5, 5)
    b1 = np.asarray(params["conv1_b"], np.float32)
    w2 = np.asarray(params["conv2_w"], np.float32)   # (16, 6, 5, 5)
    b2 = np.asarray(params["conv2_b"], np.float32)
    w3 = np.asarray(params["conv3_w"], np.float32)   # (120, 16, 5, 5)
    b3 = np.asarray(params["conv3_b"], np.float32)
    fc1w = np.asarray(params["fc1_w"], np.float32)   # (84, 120)
    fc1b = np.asarray(params["fc1_b"], np.float32)
    fc2w = np.asarray(params["fc2_w"], np.float32)   # (10, 84)
    fc2b = np.asarray(params["fc2_b"], np.float32)

    # conv1 band, 5 H-taps stacked along K, W-padding (pad=2) folded in.
    # LHS1[b*28+ho, i*28+s] = x_hpad[b, ho+i, s]  (s = unpadded input column)
    K1 = np.zeros((5 * 28, 28 * 6), np.float32)
    for i in range(5):
        for j in range(5):
            for wo in range(28):
                s = wo + j - 2
                if 0 <= s < 28:
                    K1[i * 28 + s, wo * 6:(wo + 1) * 6] = w1[:, 0, i, j]
    B1 = np.tile(b1, 28)[None, :]                                   # (1, 168)

    # pool1 W/channel matrix, carries the whole 0.25 avg-pool factor.
    T1 = np.zeros((28 * 6, 14 * 6), np.float32)
    for w in range(28):
        for c in range(6):
            T1[w * 6 + c, (w // 2) * 6 + c] = 0.25

    # conv2 band over a1 (14x14x6), 5 H-taps stacked along K.
    # LHS2[b*10+ho, i*84 + w*6 + c] = a1[b, ho+i, w*6+c]
    K2 = np.zeros((5 * 84, 10 * 16), np.float32)
    for i in range(5):
        for j in range(5):
            for wo in range(10):
                w = wo + j
                K2[i * 84 + w * 6:i * 84 + w * 6 + 6,
                   wo * 16:(wo + 1) * 16] = w2[:, :, i, j].T        # (6, 16)
    B2 = np.tile(b2, 10)[None, :]                                   # (1, 160)

    # conv3 with AvgPool2d(2,2) (pool2) folded in: acts directly on
    # relu(conv2) output y2 (10x10x16) flattened to 1600 lanes.
    W3 = np.zeros((10 * 10 * 16, 120), np.float32)
    for h in range(10):
        for w in range(10):
            W3[h * 160 + w * 16:h * 160 + (w + 1) * 16, :] = \
                0.25 * w3[:, :, h // 2, w // 2].T                   # (16, 120)
    B3 = b3[None, :]                                                # (1, 120)

    # FC tail, zero-padded to a lane-dense 128-wide output.
    FC1W = np.zeros((120, 128), np.float32); FC1W[:, :84] = fc1w.T
    FC1B = np.zeros((1, 128), np.float32);   FC1B[0, :84] = fc1b
    FC2W = np.zeros((128, 128), np.float32); FC2W[:84, :10] = fc2w.T
    FC2B = np.zeros((1, 128), np.float32);   FC2B[0, :10] = fc2b

    host = dict(K1=K1, B1=B1, T1=T1, K2=K2, B2=B2, W3=W3, B3=B3,
                FC1W=FC1W, FC1B=FC1B, FC2W=FC2W, FC2B=FC2B)
    return {k: jnp.asarray(v) for k, v in host.items()}


# ----------------------------------------------------------------------------
# Forward wrapper: one pallas_call over batch tiles.
# ----------------------------------------------------------------------------
@functools.partial(jax.jit, static_argnames=("batch_tile",))
def lenet_forward(prep, x_nchw, batch_tile=64):
    B = x_nchw.shape[0]
    batch_tile = max(8, (batch_tile // 8) * 8)
    # Tile size: multiple of 8, <= batch_tile, and small enough to give >= 2
    # grid steps when the batch allows (v7x: 2 TensorCores).
    bt = min(batch_tile, max(8, 8 * pl.cdiv(pl.cdiv(B, 2), 8)))
    n_tiles = pl.cdiv(B, bt)
    Bp = n_tiles * bt

    # Raw 28x28 images only (no 32x32 pad round-trip through HBM).
    x = x_nchw.astype(jnp.float32).reshape(B, 28, 28)
    if Bp != B:
        x = jnp.pad(x, ((0, Bp - B), (0, 0), (0, 0)))
    x = x.reshape(n_tiles, bt, 28, 28)

    consts = [prep["K1"], prep["B1"], prep["T1"], prep["K2"], prep["B2"],
              prep["W3"], prep["B3"], prep["FC1W"], prep["FC1B"],
              prep["FC2W"], prep["FC2B"]]

    def const_spec(a):
        nd = a.ndim
        return pl.BlockSpec(a.shape, lambda t, _nd=nd: (0,) * _nd)

    out = pl.pallas_call(
        functools.partial(_lenet_kernel, bt=bt),
        out_shape=jax.ShapeDtypeStruct((n_tiles, bt, 128), jnp.float32),
        grid=(n_tiles,),
        in_specs=[pl.BlockSpec((1, bt, 28, 28), lambda t: (t, 0, 0, 0))]
                 + [const_spec(a) for a in consts],
        out_specs=pl.BlockSpec((1, bt, 128), lambda t: (t, 0, 0)),
        scratch_shapes=[pltpu.VMEM((bt * 28, 84), jnp.float32)],
        compiler_params=pltpu.CompilerParams(
            dimension_semantics=("parallel",),
            vmem_limit_bytes=32 * 1024 * 1024),
    )(x, *consts)

    return out.reshape(Bp, 128)[:B, :10]


# ----------------------------------------------------------------------------
# Parameter init (PyTorch layouts) and a pure-JAX reference for validation.
# ----------------------------------------------------------------------------
def init_params(key):
    ks = jax.random.split(key, 10)

    def winit(k, shape, fan_in):
        return jax.random.normal(k, shape, jnp.float32) / jnp.sqrt(fan_in)

    return {
        "conv1_w": winit(ks[0], (6, 1, 5, 5), 1 * 5 * 5),
        "conv1_b": 0.01 * jax.random.normal(ks[1], (6,), jnp.float32),
        "conv2_w": winit(ks[2], (16, 6, 5, 5), 6 * 5 * 5),
        "conv2_b": 0.01 * jax.random.normal(ks[3], (16,), jnp.float32),
        "conv3_w": winit(ks[4], (120, 16, 5, 5), 16 * 5 * 5),
        "conv3_b": 0.01 * jax.random.normal(ks[5], (120,), jnp.float32),
        "fc1_w": winit(ks[6], (84, 120), 120),
        "fc1_b": 0.01 * jax.random.normal(ks[7], (84,), jnp.float32),
        "fc2_w": winit(ks[8], (10, 84), 84),
        "fc2_b": 0.01 * jax.random.normal(ks[9], (10,), jnp.float32),
    }


def _reference_forward(params, x_nchw):
    x = jnp.pad(x_nchw.astype(jnp.float32), ((0, 0), (0, 0), (2, 2), (2, 2)))

    def conv(x, w, b):
        y = jax.lax.conv_general_dilated(
            x, w, (1, 1), "VALID",
            dimension_numbers=("NCHW", "OIHW", "NCHW"),
            precision=jax.lax.Precision.HIGHEST)
        return y + b[None, :, None, None]

    def pool(x):
        return jax.lax.reduce_window(
            x, 0.0, jax.lax.add, (1, 1, 2, 2), (1, 1, 2, 2), "VALID") * 0.25

    x = pool(jax.nn.relu(conv(x, params["conv1_w"], params["conv1_b"])))
    x = pool(jax.nn.relu(conv(x, params["conv2_w"], params["conv2_b"])))
    x = jax.nn.relu(conv(x, params["conv3_w"], params["conv3_b"])).reshape(-1, 120)
    x = jax.nn.relu(x @ params["fc1_w"].T + params["fc1_b"])
    return x @ params["fc2_w"].T + params["fc2_b"]


if __name__ == "__main__":
    key = jax.random.PRNGKey(0)
    k_param, k_x = jax.random.split(key)
    params = init_params(k_param)
    prep = prepare_params(params)

    # LeNet's conv chain expects 28x28 single-channel input (padded to 32).
    x = jax.random.normal(k_x, (16, 1, 28, 28), jnp.float32)

    out = jax.block_until_ready(lenet_forward(prep, x))
    assert out.shape == (16, 10) and out.dtype == jnp.float32

    ref = jax.block_until_ready(_reference_forward(params, x))
    np.testing.assert_allclose(np.asarray(out), np.asarray(ref),
                               rtol=5e-2, atol=5e-2)
    print("KERNEL_OK")
</pallas_src>

<mosaic_0001>
module attributes {stable_mosaic.version = 11 : i64} {
  func.func @_lenet_kernel(%arg0: i32, %arg1: memref<1x8x28x28xf32, #tpu.memory_space<vmem>>, %arg2: memref<140x168xf32, #tpu.memory_space<vmem>>, %arg3: memref<1x168xf32, #tpu.memory_space<vmem>>, %arg4: memref<168x84xf32, #tpu.memory_space<vmem>>, %arg5: memref<420x160xf32, #tpu.memory_space<vmem>>, %arg6: memref<1x160xf32, #tpu.memory_space<vmem>>, %arg7: memref<1600x120xf32, #tpu.memory_space<vmem>>, %arg8: memref<1x120xf32, #tpu.memory_space<vmem>>, %arg9: memref<120x128xf32, #tpu.memory_space<vmem>>, %arg10: memref<1x128xf32, #tpu.memory_space<vmem>>, %arg11: memref<128x128xf32, #tpu.memory_space<vmem>>, %arg12: memref<1x128xf32, #tpu.memory_space<vmem>>, %arg13: memref<1x8x128xf32, #tpu.memory_space<vmem>>, %arg14: memref<224x84xf32, #tpu.memory_space<vmem>>) attributes {dimension_semantics = [#tpu.dimension_semantics<parallel>], iteration_bounds = array<i64: 2>, scalar_prefetch = 0 : i64, scratch_operands = 1 : i64, tpu.core_type = #tpu.core_type<tc>, window_params = [{transform_indices = @transform_0, window_bounds = array<i64: 1, 8, 28, 28>}, {pipeline_mode = #tpu.pipeline_mode<synchronous>, transform_indices = @transform_1, window_bounds = array<i64: 140, 168>}, {pipeline_mode = #tpu.pipeline_mode<synchronous>, transform_indices = @transform_2, window_bounds = array<i64: 1, 168>}, {pipeline_mode = #tpu.pipeline_mode<synchronous>, transform_indices = @transform_3, window_bounds = array<i64: 168, 84>}, {pipeline_mode = #tpu.pipeline_mode<synchronous>, transform_indices = @transform_4, window_bounds = array<i64: 420, 160>}, {pipeline_mode = #tpu.pipeline_mode<synchronous>, transform_indices = @transform_5, window_bounds = array<i64: 1, 160>}, {pipeline_mode = #tpu.pipeline_mode<synchronous>, transform_indices = @transform_6, window_bounds = array<i64: 1600, 120>}, {pipeline_mode = #tpu.pipeline_mode<synchronous>, transform_indices = @transform_7, window_bounds = array<i64: 1, 120>}, {pipeline_mode = #tpu.pipeline_mode<synchronous>, transform_indices = @transform_8, window_bounds = array<i64: 120, 128>}, {pipeline_mode = #tpu.pipeline_mode<synchronous>, transform_indices = @transform_9, window_bounds = array<i64: 1, 128>}, {pipeline_mode = #tpu.pipeline_mode<synchronous>, transform_indices = @transform_10, window_bounds = array<i64: 128, 128>}, {pipeline_mode = #tpu.pipeline_mode<synchronous>, transform_indices = @transform_11, window_bounds = array<i64: 1, 128>}, {transform_indices = @transform_12, window_bounds = array<i64: 1, 8, 128>}]} {
    %c0 = arith.constant 0 : index
    %c0_0 = arith.constant 0 : index
    %c0_1 = arith.constant 0 : index
    %c0_2 = arith.constant 0 : index
    %0 = vector.load %arg1[%c0, %c0_0, %c0_1, %c0_2] : memref<1x8x28x28xf32, #tpu.memory_space<vmem>>, vector<1x8x28x28xf32>
    %1 = vector.shape_cast %0 : vector<1x8x28x28xf32> to vector<8x28x28xf32>
    %cst = arith.constant 0.000000e+00 : f32
    %2 = vector.broadcast %cst : f32 to vector<8x2x28xf32>
    %3 = tpu.concatenate %2, %1, %2 in 1 : vector<8x2x28xf32>, vector<8x28x28xf32>, vector<8x2x28xf32> -> vector<8x32x28xf32>
    %4 = vector.extract_strided_slice %3 {offsets = [0, 0, 0], sizes = [8, 28, 28], strides = [1, 1, 1]} : vector<8x32x28xf32> to vector<8x28x28xf32>
    %5 = vector.extract_strided_slice %3 {offsets = [0, 1, 0], sizes = [8, 28, 28], strides = [1, 1, 1]} : vector<8x32x28xf32> to vector<8x28x28xf32>
    %6 = vector.extract_strided_slice %3 {offsets = [0, 2, 0], sizes = [8, 28, 28], strides = [1, 1, 1]} : vector<8x32x28xf32> to vector<8x28x28xf32>
    %7 = vector.extract_strided_slice %3 {offsets = [0, 3, 0], sizes = [8, 28, 28], strides = [1, 1, 1]} : vector<8x32x28xf32> to vector<8x28x28xf32>
    %8 = vector.extract_strided_slice %3 {offsets = [0, 4, 0], sizes = [8, 28, 28], strides = [1, 1, 1]} : vector<8x32x28xf32> to vector<8x28x28xf32>
    %9 = tpu.concatenate %4, %5, %6, %7, %8 in 2 : vector<8x28x28xf32>, vector<8x28x28xf32>, vector<8x28x28xf32>, vector<8x28x28xf32>, vector<8x28x28xf32> -> vector<8x28x140xf32>
    %10 = vector.shape_cast %9 : vector<8x28x140xf32> to vector<224x140xf32>
    %c0_3 = arith.constant 0 : index
    %c0_4 = arith.constant 0 : index
    %11 = vector.load %arg2[%c0_3, %c0_4] : memref<140x168xf32, #tpu.memory_space<vmem>>, vector<140x168xf32>
    %cst_5 = arith.constant dense<0.000000e+00> : vector<224x168xf32>
    %12 = tpu.matmul %10, %11, %cst_5 {dimension_numbers = #tpu.dot_dimension_numbers<[1], [0], [0], [1], [0, 0, 1, 1], [], []>} : vector<224x140xf32>, vector<140x168xf32>, vector<224x168xf32> -> vector<224x168xf32>
    %c0_6 = arith.constant 0 : index
    %c0_7 = arith.constant 0 : index
    %13 = vector.load %arg3[%c0_6, %c0_7] : memref<1x168xf32, #tpu.memory_space<vmem>>, vector<1x168xf32>
    %14 = vector.broadcast %13 : vector<1x168xf32> to vector<224x168xf32>
    %15 = arith.addf %12, %14 : vector<224x168xf32>
    %cst_8 = arith.constant 0.000000e+00 : f32
    %16 = vector.broadcast %cst_8 : f32 to vector<224x168xf32>
    %17 = arith.maximumf %15, %16 : vector<224x168xf32>
    %c0_9 = arith.constant 0 : index
    %c0_10 = arith.constant 0 : index
    %18 = vector.load %arg4[%c0_9, %c0_10] : memref<168x84xf32, #tpu.memory_space<vmem>>, vector<168x84xf32>
    %cst_11 = arith.constant dense<0.000000e+00> : vector<224x84xf32>
    %19 = tpu.matmul %17, %18, %cst_11 {dimension_numbers = #tpu.dot_dimension_numbers<[1], [0], [0], [1], [0, 0, 1, 1], [], []>} : vector<224x168xf32>, vector<168x84xf32>, vector<224x84xf32> -> vector<224x84xf32>
    %c0_12 = arith.constant 0 : index
    %c0_13 = arith.constant 0 : index
    %20 = vector.load %arg14[%c0_12, %c0_13] : memref<224x84xf32, #tpu.memory_space<vmem>>, vector<224x84xf32>
    tpu.vector_store %arg14[%c0_12, %c0_13], %19 {strides = array<i32>} : memref<224x84xf32, #tpu.memory_space<vmem>>, vector<224x84xf32>,
    %c0_14 = arith.constant 0 : index
    %c0_15 = arith.constant 0 : index
    %21 = tpu.strided_load %arg14[%c0_14, %c0_15] {strides = array<i32: 2, 1>} : memref<224x84xf32, #tpu.memory_space<vmem>>, vector<112x84xf32>
    %c1 = arith.constant 1 : index
    %c0_16 = arith.constant 0 : index
    %22 = tpu.strided_load %arg14[%c1, %c0_16] {strides = array<i32: 2, 1>} : memref<224x84xf32, #tpu.memory_space<vmem>>, vector<112x84xf32>
    %23 = arith.addf %21, %22 : vector<112x84xf32>
    %24 = vector.shape_cast %23 : vector<112x84xf32> to vector<8x14x84xf32>
    %25 = vector.extract_strided_slice %24 {offsets = [0, 0, 0], sizes = [8, 10, 84], strides = [1, 1, 1]} : vector<8x14x84xf32> to vector<8x10x84xf32>
    %26 = vector.extract_strided_slice %24 {offsets = [0, 1, 0], sizes = [8, 10, 84], strides = [1, 1, 1]} : vector<8x14x84xf32> to vector<8x10x84xf32>
    %27 = vector.extract_strided_slice %24 {offsets = [0, 2, 0], sizes = [8, 10, 84], strides = [1, 1, 1]} : vector<8x14x84xf32> to vector<8x10x84xf32>
    %28 = vector.extract_strided_slice %24 {offsets = [0, 3, 0], sizes = [8, 10, 84], strides = [1, 1, 1]} : vector<8x14x84xf32> to vector<8x10x84xf32>
    %29 = vector.extract_strided_slice %24 {offsets = [0, 4, 0], sizes = [8, 10, 84], strides = [1, 1, 1]} : vector<8x14x84xf32> to vector<8x10x84xf32>
    %30 = tpu.concatenate %25, %26, %27, %28, %29 in 2 : vector<8x10x84xf32>, vector<8x10x84xf32>, vector<8x10x84xf32>, vector<8x10x84xf32>, vector<8x10x84xf32> -> vector<8x10x420xf32>
    %31 = vector.shape_cast %30 : vector<8x10x420xf32> to vector<80x420xf32>
    %c0_17 = arith.constant 0 : index
    %c0_18 = arith.constant 0 : index
    %32 = vector.load %arg5[%c0_17, %c0_18] : memref<420x160xf32, #tpu.memory_space<vmem>>, vector<420x160xf32>
    %cst_19 = arith.constant dense<0.000000e+00> : vector<80x160xf32>
    %33 = tpu.matmul %31, %32, %cst_19 {dimension_numbers = #tpu.dot_dimension_numbers<[1], [0], [0], [1], [0, 0, 1, 1], [], []>} : vector<80x420xf32>, vector<420x160xf32>, vector<80x160xf32> -> vector<80x160xf32>
    %c0_20 = arith.constant 0 : index
    %c0_21 = arith.constant 0 : index
    %34 = vector.load %arg6[%c0_20, %c0_21] : memref<1x160xf32, #tpu.memory_space<vmem>>, vector<1x160xf32>
    %35 = vector.broadcast %34 : vector<1x160xf32> to vector<80x160xf32>
    %36 = arith.addf %33, %35 : vector<80x160xf32>
    %cst_22 = arith.constant 0.000000e+00 : f32
    %37 = vector.broadcast %cst_22 : f32 to vector<80x160xf32>
    %38 = arith.maximumf %36, %37 : vector<80x160xf32>
    %39 = vector.shape_cast %38 : vector<80x160xf32> to vector<8x10x160xf32>
    %40 = vector.extract_strided_slice %39 {offsets = [0, 0, 0], sizes = [8, 1, 160], strides = [1, 1, 1]} : vector<8x10x160xf32> to vector<8x1x160xf32>
    %41 = vector.shape_cast %40 : vector<8x1x160xf32> to vector<8x160xf32>
    %42 = vector.extract_strided_slice %39 {offsets = [0, 1, 0], sizes = [8, 1, 160], strides = [1, 1, 1]} : vector<8x10x160xf32> to vector<8x1x160xf32>
    %43 = vector.shape_cast %42 : vector<8x1x160xf32> to vector<8x160xf32>
    %44 = vector.extract_strided_slice %39 {offsets = [0, 2, 0], sizes = [8, 1, 160], strides = [1, 1, 1]} : vector<8x10x160xf32> to vector<8x1x160xf32>
    %45 = vector.shape_cast %44 : vector<8x1x160xf32> to vector<8x160xf32>
    %46 = vector.extract_strided_slice %39 {offsets = [0, 3, 0], sizes = [8, 1, 160], strides = [1, 1, 1]} : vector<8x10x160xf32> to vector<8x1x160xf32>
    %47 = vector.shape_cast %46 : vector<8x1x160xf32> to vector<8x160xf32>
    %48 = vector.extract_strided_slice %39 {offsets = [0, 4, 0], sizes = [8, 1, 160], strides = [1, 1, 1]} : vector<8x10x160xf32> to vector<8x1x160xf32>
    %49 = vector.shape_cast %48 : vector<8x1x160xf32> to vector<8x160xf32>
    %50 = vector.extract_strided_slice %39 {offsets = [0, 5, 0], sizes = [8, 1, 160], strides = [1, 1, 1]} : vector<8x10x160xf32> to vector<8x1x160xf32>
    %51 = vector.shape_cast %50 : vector<8x1x160xf32> to vector<8x160xf32>
    %52 = vector.extract_strided_slice %39 {offsets = [0, 6, 0], sizes = [8, 1, 160], strides = [1, 1, 1]} : vector<8x10x160xf32> to vector<8x1x160xf32>
    %53 = vector.shape_cast %52 : vector<8x1x160xf32> to vector<8x160xf32>
    %54 = vector.extract_strided_slice %39 {offsets = [0, 7, 0], sizes = [8, 1, 160], strides = [1, 1, 1]} : vector<8x10x160xf32> to vector<8x1x160xf32>
    %55 = vector.shape_cast %54 : vector<8x1x160xf32> to vector<8x160xf32>
    %56 = vector.extract_strided_slice %39 {offsets = [0, 8, 0], sizes = [8, 1, 160], strides = [1, 1, 1]} : vector<8x10x160xf32> to vector<8x1x160xf32>
    %57 = vector.shape_cast %56 : vector<8x1x160xf32> to vector<8x160xf32>
    %58 = vector.extract_strided_slice %39 {offsets = [0, 9, 0], sizes = [8, 1, 160], strides = [1, 1, 1]} : vector<8x10x160xf32> to vector<8x1x160xf32>
    %59 = vector.shape_cast %58 : vector<8x1x160xf32> to vector<8x160xf32>
    %60 = tpu.concatenate %41, %43, %45, %47, %49, %51, %53, %55, %57, %59 in 1 : vector<8x160xf32>, vector<8x160xf32>, vector<8x160xf32>, vector<8x160xf32>, vector<8x160xf32>, vector<8x160xf32>, vector<8x160xf32>, vector<8x160xf32>, vector<8x160xf32>, vector<8x160xf32> -> vector<8x1600xf32>
    %c0_23 = arith.constant 0 : index
    %c0_24 = arith.constant 0 : index
    %61 = vector.load %arg7[%c0_23, %c0_24] : memref<1600x120xf32, #tpu.memory_space<vmem>>, vector<1600x120xf32>
    %cst_25 = arith.constant dense<0.000000e+00> : vector<8x120xf32>
    %62 = tpu.matmul %60, %61, %cst_25 {dimension_numbers = #tpu.dot_dimension_numbers<[1], [0], [0], [1], [0, 0, 1, 1], [], []>} : vector<8x1600xf32>, vector<1600x120xf32>, vector<8x120xf32> -> vector<8x120xf32>
    %c0_26 = arith.constant 0 : index
    %c0_27 = arith.constant 0 : index
    %63 = vector.load %arg8[%c0_26, %c0_27] : memref<1x120xf32, #tpu.memory_space<vmem>>, vector<1x120xf32>
    %64 = vector.broadcast %63 : vector<1x120xf32> to vector<8x120xf32>
    %65 = arith.addf %62, %64 : vector<8x120xf32>
    %cst_28 = arith.constant 0.000000e+00 : f32
    %66 = vector.broadcast %cst_28 : f32 to vector<8x120xf32>
    %67 = arith.maximumf %65, %66 : vector<8x120xf32>
    %c0_29 = arith.constant 0 : index
    %c0_30 = arith.constant 0 : index
    %68 = vector.load %arg9[%c0_29, %c0_30] : memref<120x128xf32, #tpu.memory_space<vmem>>, vector<120x128xf32>
    %cst_31 = arith.constant dense<0.000000e+00> : vector<8x128xf32>
    %69 = tpu.matmul %67, %68, %cst_31 {dimension_numbers = #tpu.dot_dimension_numbers<[1], [0], [0], [1], [0, 0, 1, 1], [], []>} : vector<8x120xf32>, vector<120x128xf32>, vector<8x128xf32> -> vector<8x128xf32>
    %c0_32 = arith.constant 0 : index
    %c0_33 = arith.constant 0 : index
    %70 = vector.load %arg10[%c0_32, %c0_33] : memref<1x128xf32, #tpu.memory_space<vmem>>, vector<1x128xf32>
    %71 = vector.broadcast %70 : vector<1x128xf32> to vector<8x128xf32>
    %72 = arith.addf %69, %71 : vector<8x128xf32>
    %cst_34 = arith.constant 0.000000e+00 : f32
    %73 = vector.broadcast %cst_34 : f32 to vector<8x128xf32>
    %74 = arith.maximumf %72, %73 : vector<8x128xf32>
    %c0_35 = arith.constant 0 : index
    %c0_36 = arith.constant 0 : index
    %75 = vector.load %arg11[%c0_35, %c0_36] : memref<128x128xf32, #tpu.memory_space<vmem>>, vector<128x128xf32>
    %cst_37 = arith.constant dense<0.000000e+00> : vector<8x128xf32>
    %76 = tpu.matmul %74, %75, %cst_37 {dimension_numbers = #tpu.dot_dimension_numbers<[1], [0], [0], [1], [0, 0, 1, 1], [], []>} : vector<8x128xf32>, vector<128x128xf32>, vector<8x128xf32> -> vector<8x128xf32>
    %c0_38 = arith.constant 0 : index
    %c0_39 = arith.constant 0 : index
    %77 = vector.load %arg12[%c0_38, %c0_39] : memref<1x128xf32, #tpu.memory_space<vmem>>, vector<1x128xf32>
    %78 = vector.broadcast %77 : vector<1x128xf32> to vector<8x128xf32>
    %79 = arith.addf %76, %78 : vector<8x128xf32>
    %c0_40 = arith.constant 0 : index
    %c0_41 = arith.constant 0 : index
    %c0_42 = arith.constant 0 : index
    %80 = vector.load %arg13[%c0_40, %c0_41, %c0_42] : memref<1x8x128xf32, #tpu.memory_space<vmem>>, vector<1x8x128xf32>
    %81 = vector.shape_cast %80 : vector<1x8x128xf32> to vector<8x128xf32>
    %82 = vector.shape_cast %79 : vector<8x128xf32> to vector<1x8x128xf32>
    tpu.vector_store %arg13[%c0_40, %c0_41, %c0_42], %82 {strides = array<i32>} : memref<1x8x128xf32, #tpu.memory_space<vmem>>, vector<1x8x128xf32>,
    return
  }
  func.func @transform_0(%arg0: i32) -> (i32, i32, i32, i32) {
    %c0_i32 = arith.constant 0 : i32
    %c0_i32_0 = arith.constant 0 : i32
    %c0_i32_1 = arith.constant 0 : i32
    %c0_i32_2 = arith.constant 0 : i32
    return %arg0, %c0_i32, %c0_i32_0, %c0_i32_1 : i32, i32, i32, i32
  }
  func.func @transform_1(%arg0: i32) -> (i32, i32) {
    %c0_i32 = arith.constant 0 : i32
    %c0_i32_0 = arith.constant 0 : i32
    %c0_i32_1 = arith.constant 0 : i32
    return %c0_i32, %c0_i32_0 : i32, i32
  }
  func.func @transform_2(%arg0: i32) -> (i32, i32) {
    %c0_i32 = arith.constant 0 : i32
    %c0_i32_0 = arith.constant 0 : i32
    %c0_i32_1 = arith.constant 0 : i32
    return %c0_i32, %c0_i32_0 : i32, i32
  }
  func.func @transform_3(%arg0: i32) -> (i32, i32) {
    %c0_i32 = arith.constant 0 : i32
    %c0_i32_0 = arith.constant 0 : i32
    %c0_i32_1 = arith.constant 0 : i32
    return %c0_i32, %c0_i32_0 : i32, i32
  }
  func.func @transform_4(%arg0: i32) -> (i32, i32) {
    %c0_i32 = arith.constant 0 : i32
    %c0_i32_0 = arith.constant 0 : i32
    %c0_i32_1 = arith.constant 0 : i32
    return %c0_i32, %c0_i32_0 : i32, i32
  }
  func.func @transform_5(%arg0: i32) -> (i32, i32) {
    %c0_i32 = arith.constant 0 : i32
    %c0_i32_0 = arith.constant 0 : i32
    %c0_i32_1 = arith.constant 0 : i32
    return %c0_i32, %c0_i32_0 : i32, i32
  }
  func.func @transform_6(%arg0: i32) -> (i32, i32) {
    %c0_i32 = arith.constant 0 : i32
    %c0_i32_0 = arith.constant 0 : i32
    %c0_i32_1 = arith.constant 0 : i32
    return %c0_i32, %c0_i32_0 : i32, i32
  }
  func.func @transform_7(%arg0: i32) -> (i32, i32) {
    %c0_i32 = arith.constant 0 : i32
    %c0_i32_0 = arith.constant 0 : i32
    %c0_i32_1 = arith.constant 0 : i32
    return %c0_i32, %c0_i32_0 : i32, i32
  }
  func.func @transform_8(%arg0: i32) -> (i32, i32) {
    %c0_i32 = arith.constant 0 : i32
    %c0_i32_0 = arith.constant 0 : i32
    %c0_i32_1 = arith.constant 0 : i32
    return %c0_i32, %c0_i32_0 : i32, i32
  }
  func.func @transform_9(%arg0: i32) -> (i32, i32) {
    %c0_i32 = arith.constant 0 : i32
    %c0_i32_0 = arith.constant 0 : i32
    %c0_i32_1 = arith.constant 0 : i32
    return %c0_i32, %c0_i32_0 : i32, i32
  }
  func.func @transform_10(%arg0: i32) -> (i32, i32) {
    %c0_i32 = arith.constant 0 : i32
    %c0_i32_0 = arith.constant 0 : i32
    %c0_i32_1 = arith.constant 0 : i32
    return %c0_i32, %c0_i32_0 : i32, i32
  }
  func.func @transform_11(%arg0: i32) -> (i32, i32) {
    %c0_i32 = arith.constant 0 : i32
    %c0_i32_0 = arith.constant 0 : i32
    %c0_i32_1 = arith.constant 0 : i32
    return %c0_i32, %c0_i32_0 : i32, i32
  }
  func.func @transform_12(%arg0: i32) -> (i32, i32, i32) {
    %c0_i32 = arith.constant 0 : i32
    %c0_i32_0 = arith.constant 0 : i32
    %c0_i32_1 = arith.constant 0 : i32
    return %arg0, %c0_i32, %c0_i32_0 : i32, i32, i32
  }
}

</mosaic_0001>

<bundles_post_ra>
// kernel: lenet_forward.1
= control target key start
LH: loop header
LB: loop body
LE: loop exit
PB: predicated region body
PF: predicated region fallthrough
CT: control target
= control target key end

     0   :  { %17 = vsyncpa [#allocation4], 0  ;;  %s11795_s0 = inlined_call_operand.vmem [shape: f32[2,8,28,28], index: 0, kind: input, shape index: {}]   ;;  %s11796_s1 = inlined_call_operand.vmem [shape: f32[140,168], index: 1, kind: input, shape index: {}]   ;;  %s11797_s2 = inlined_call_operand.vmem [shape: f32[1,168], index: 2, kind: input, shape index: {}]   ;;  %s11798_s3 = inlined_call_operand.vmem [shape: f32[168,84], index: 3, kind: input, shape index: {}]   ;;  %s11799_s4 = inlined_call_operand.vmem [shape: f32[420,160], index: 4, kind: input, shape index: {}]   ;;  %s11800_s5 = inlined_call_operand.vmem [shape: f32[1,160], index: 5, kind: input, shape index: {}]   ;;  %s11801_s6 = inlined_call_operand.vmem [shape: f32[1600,120], index: 6, kind: input, shape index: {}]   ;;  %s11802_s7 = inlined_call_operand.vmem [shape: f32[1,120], index: 7, kind: input, shape index: {}]   ;;  %s11803_s8 = inlined_call_operand.vmem [shape: f32[120,128], index: 8, kind: input, shape index: {}]   ;;  %s11804_s9 = inlined_call_operand.vmem [shape: f32[1,128], index: 9, kind: input, shape index: {}]   ;;  %s11805_s10 = inlined_call_operand.vmem [shape: f32[128,128], index: 10, kind: input, shape index: {}]   ;;  %s11806_s11 = inlined_call_operand.vmem [shape: f32[1,128], index: 11, kind: input, shape index: {}]   ;;  %s11807_s12 = inlined_call_operand.hbm [shape: f32[2,8,128], index: 12, kind: output, shape index: {}]  }
   0x1   :  { %19 = vsyncpa [#allocation4 + $0x1], 0  ;;  %s8010_s21 = smov 0   ;;  %s8012_s22 = smov 0  }
   0x2   :  { %s8014_s23 = smov 0   ;;  %s8016_s24 = smov 0  }
   0x3 LB: > { %11822 = sst [smem:[#allocation6_spill]] %s7923_s23  ;;  %s8031_s25 = sadd.s32 4294967295, %s7927_s24   ;;  %s7927_s24 = sphi %s8016_s24, %s11875_s24   ;;  %s7923_s23 = sphi %s8014_s23, %s11880_s23   ;;  %s7919_s22 = sphi %s8012_s22, %s11879_s22   ;;  %s7915_s21 = sphi %s8010_s21, %s11878_s21  }
   0x4   : > { %s6763_s26 = sadd.s32 4294967294, %s7927_s24   ;;  %s8035_s27 = sadd.s32 1, %s7927_s24  }
   0x5   : > { %11823 = sst [smem:[#allocation7_spill]] %s8035_s27  ;;  %s289_s28 = sadd.s32 1, %s7923_s23 }
   0x6   : > { %s286_s29 = ssub.s32 %s7927_s24, %s8035_s27  ;;  %p299_p0 = scmp.ne.s32.totalorder %s7923_s23, %s7919_s22 }
   0x7   : > { %p287_p1 = scmp.eq.s32.totalorder %s286_s29, 0  ;;  %p300_p2 = scmp.eq.s32.totalorder %s8031_s25, 1 }
   0x8   : > { %p305_p3 = scmp.ne.s32.totalorder %s7919_s22, %s7915_s21  ;;  %p306_p4 = scmp.eq.s32.totalorder %s6763_s26, 1 }
   0x9   : > { %s8046_s30 = scalar_select %p287_p1, %s7923_s23, %s289_s28  }
   0xa   : > { %p8048_p5 = por %p300_p2, %p299_p0  ;;  %p8052_p6 = por %p306_p4, %p305_p3 }
   0xb   : > { %11824 = sst [smem:[#allocation8_spill]] %s8046_s30  ;;  %p6766_p7 = scmp.ge.s32.totalorder %s7927_s24, 1 }
   0xc   : > { %s11826_s14 = scalar_select %p8052_p6, 1, 0 }
   0xd   : > { %p365_p8 = scmp.lt.s32.totalorder %s7927_s24, 3 }
   0xe   : > { %11827 = sst [smem:[#allocation9_spill]] %s11826_s14 }
   0xf   : > { %p366_p9 = pnand %p6766_p7, %p365_p8 }
  0x11   : > { %369 = sbr.rel (%p366_p9) target bundleno = 2126 (0x84e), region = 68 }
  0x18   : > { %p407_p10 = scmp.lt.s32.totalorder %s8031_s25, 1  ;;  %v1430_v0 = vld [vmem:[%s11796_s1 + $0x8] sm:$0xff]  ;;  %v1432_v1 = vld [vmem:[%s11796_s1 + $0x18] sm:$0xff]  ;;  %v1429_v2 = vld [vmem:[%s11796_s1] sm:$0xff]  ;;  %vm476_vm0 = vcmask 1041408   ;;  %vm903_vm1 = vcmask 1044480  }
  0x19   : > { %v7245_v3 = vpack.c.bf16 %v1432_v1, %v1430_v0  ;;  %v1431_v4 = vld [vmem:[%s11796_s1 + $0x10] sm:$0xff]  ;;  %v1434_v5 = vld [vmem:[%s11796_s1 + $0x28] sm:$0xff]  ;;  %v1436_v6 = vld [vmem:[%s11796_s1 + $0x38] sm:$0xff]  ;;  %vm598_vm2 = vcmask 1046528   ;;  %vm1056_vm3 = vcmask 1043456   ;;  %vm573_vm4 = vcmask 1045504  }
  0x1a   : > { %s408_s26 = scalar_select %p407_p10, %s8031_s25, 1  ;;  %v7247_v7 = vpack.c.bf16 %v1431_v4, %v1429_v2  ;;  %v7249_v8 = vpack.c.bf16 %v1436_v6, %v1434_v5  ;;  %v1433_v9 = vld [vmem:[%s11796_s1 + $0x20] sm:$0xff]  ;;  %v1435_v10 = vld [vmem:[%s11796_s1 + $0x30] sm:$0xff]  ;;  %v1438_v11 = vld [vmem:[%s11796_s1 + $0x48] sm:$0xff]  ;;  %vm7933_vm5 = vmmov 1   ;;  %vm1561_vm7 = vcmask 97280  }
  0x1b   : > { %7246 = vmatprep.subr.bf16.mxu0 %v7245_v3  ;;  %v1440_v12 = vld [vmem:[%s11796_s1 + $0x58] sm:$0xff]  ;;  %v1437_v13 = vld [vmem:[%s11796_s1 + $0x40] sm:$0xff]  ;;  %v7251_v14 = vpack.c.bf16 %v1435_v10, %v1433_v9  ;;  %v1439_v15 = vld [vmem:[%s11796_s1 + $0x50] sm:$0xff]  ;;  %s7930_s30 = smov 28   ;;  %s7931_s15 = smov 112   ;;  %vm1209_vm8 = vcmask 228352  }
  0x1c   : > { %s6905_s23 = sshll.u32 %s408_s26, 8  ;;  %7248 = vmatpush1.bf16.msra.mxu0 %v7247_v7  ;;  %v1442_v16 = vld [vmem:[%s11796_s1 + $0x68] sm:$0xff]  ;;  %v1444_v17 = vld [vmem:[%s11796_s1 + $0x78] sm:$0xff]  ;;  %v7253_v21 = vpack.c.bf16 %v1440_v12, %v1438_v11  ;;  %v7255_v30 = vpack.c.bf16 %v1439_v15, %v1437_v13  ;;  %s7932_s16 = smov 56   ;;  %vm8322_vm6 = vmpackc.low %vm1056_vm3, %vm7933_vm5  ;;  %vm1242_vm9 = vcmask 457728   ;;  %vm1275_vm10 = vcmask 687104  }
  0x1d   : > { %s8096_s14 = scalar_lea.vmem %s11795_s0, %s6905_s23  ;;  %7250 = vmatprep.subr.bf16.mxu0 %v7249_v8  ;;  %v7257_v31 = vpack.c.bf16 %v1444_v17, %v1442_v16  ;;  %s11812_s23 = smov 84   ;;  %vm1308_vm11 = vcmask 916480   ;;  %vm1934_vm12 = vcmask 326656   ;;  %vm3437_vm13 = vcmask 1014784  }
  0x1e   : > { %v412_v18 = vld [vmem:[%s8096_s14] sm:$0xff]  ;;  %v413_v19 = vld [vmem:[%s8096_s14 + $0x8] sm:$0xff]  ;;  %v414_v20 = vld [vmem:[%s8096_s14 + $0x10] sm:$0xff]  ;;  %s7938_s26 = smov 124   ;;  %vm3454_vm14 = vcmask 654336   ;;  %s11830_s29 = smov 84  }
  0x1f   : > { %v477_v22 = vrot.slane %v412_v18, 6  ;;  %v478_v23 = vrot.slane %v413_v19, 6  ;;  %v480_v24 = vrot.slane %v414_v20, 6  ;;  %v415_v25 = vld [vmem:[%s8096_s14 + $0x18] sm:$0xf]  ;;  %v420_v26 = vld [vmem:[%s8096_s14 + $0x40] sm:$0xff] }
  0x20   : > { %v482_v27 = vrot.slane %v415_v25, 6  ;;  %v8113_v28 = vld [vmem:[%s8096_s14 + $0x48] sm:$0xff]  ;;  %v491_v29 = vrot.slane %v420_v26, 6  ;;  %7252 = vmatpush1.bf16.msra.mxu0 %v7251_v14  ;;  %v416_v3 = vld [vmem:[%s8096_s14 + $0x20] sm:$0xff]  ;;  %v418_v9 = vld [vmem:[%s8096_s14 + $0x30] sm:$0xff]  ;;  %vm4451_vm15 = vcmask 293888  }
  0x21   : > { %v8116_v32 = vsel %vm476_vm0, %v477_v22, %v478_v23  ;;  %v8119_v33 = vsel %vm476_vm0, %v478_v23, %v480_v24  ;;  %v8122_v34 = vsel %vm476_vm0, 0.0, %v477_v22  ;;  %v492_v35 = vrot.slane %v8113_v28, 6  ;;  %7254 = vmatprep.subr.bf16.mxu0 %v7253_v21  ;;  %v417_v4 = vld [vmem:[%s8096_s14 + $0x28] sm:$0xff]  ;;  %s7940_s18 = smov 32  }
  0x22   : > { %v904_v36 = vrot.slane %v8122_v34, 3  ;;  %v905_v37 = vrot.slane %v8116_v32, 3  ;;  %v907_v38 = vrot.slane %v8119_v33, 3  ;;  %v599_v39 = vrot.slane %v8122_v34, 1 }
  0x23   : > { %v600_v40 = vrot.slane %v8116_v32, 1  ;;  %v602_v41 = vrot.slane %v8119_v33, 1  ;;  %v1057_v42 = vrot.slane %v8122_v34, 4  ;;  %v1058_v43 = vrot.slane %v8116_v32, 4 }
  0x24   : > { %v906_v44 = vsel %vm903_vm1, %v904_v36, %v905_v37  ;;  %v908_v45 = vsel %vm903_vm1, %v905_v37, %v907_v38  ;;  %v751_v46 = vrot.slane %v8122_v34, 2  ;;  %v752_v47 = vrot.slane %v8116_v32, 2  ;;  %7256 = vmatpush1.bf16.msra.mxu0 %v7255_v30 }
  0x25   : > { %v7770_v48 = vpack.i.bf16 %v908_v45, %v906_v44  ;;  %v601_v49 = vsel %vm598_vm2, %v599_v39, %v600_v40  ;;  %v603_v50 = vsel %vm598_vm2, %v600_v40, %v602_v41  ;;  %v754_v53 = vrot.slane %v8119_v33, 2  ;;  %7258 = vmatprep.subr.bf16.mxu0 %v7257_v31  ;;  %v419_v39 = vld [vmem:[%s8096_s14 + $0x38] sm:$0xf] }
  0x26   : > { %v7760_v51 = vpack.i.bf16 %v603_v50, %v601_v49  ;;  %v753_v52 = vsel %vm573_vm4, %v751_v46, %v752_v47  ;;  %v483_v54 = vsel %vm476_vm0, %v480_v24, %v482_v27  ;;  %v1059_v55 = vsel %vm1056_vm3, %v1057_v42, %v1058_v43  ;;  %v1441_v46 = vld [vmem:[%s11796_s1 + $0x60] sm:$0xff]  ;;  %v1443_v49 = vld [vmem:[%s11796_s1 + $0x70] sm:$0xff]  ;;  %v1446_v50 = vld [vmem:[%s11796_s1 + $0x88] sm:$0xff] }
  0x27   : > { %7771 = vrot.lane.b32.xlu1 %v7770_v48, %s11812_s23  ;;  %v8145_v56 = vsel %vm573_vm4, %v483_v54, 0.0  ;;  %v8150_v57 = vsel %vm476_vm0, %v491_v29, %v492_v35  ;;  %v8153_v58 = vsel %vm476_vm0, 0.0, %v491_v29  ;;  %v755_v59 = vsel %vm573_vm4, %v752_v47, %v754_v53  ;;  %v1445_v54 = vld [vmem:[%s11796_s1 + $0x80] sm:$0xff] }
  0x28   : > { %7761 = vrot.lane.b32.xlu0 %v7760_v51, %s7930_s30  ;;  %v604_v60 = vrot.slane %v8145_v56, 1  ;;  %v613_v61 = vrot.slane %v8153_v58, 1  ;;  %v614_v62 = vrot.slane %v8150_v57, 1  ;;  %v7765_v63 = vpack.i.bf16 %v755_v59, %v753_v52  ;;  %v1448_v51 = vld [vmem:[%s11796_s1 + $0x98] sm:$0xff] }
  0x29   : > { %v1060_v0 = vrot.slane %v8119_v33, 4  ;;  %v756_v1 = vrot.slane %v8145_v56, 2  ;;  %v765_v2 = vrot.slane %v8153_v58, 2  ;;  %v766_v5 = vrot.slane %v8150_v57, 2 }
  0x2a   : > { %v605_v6 = vsel %vm598_vm2, %v602_v41, %v604_v60  ;;  %v615_v7 = vsel %vm598_vm2, %v613_v61, %v614_v62  ;;  %v909_v8 = vrot.slane %v8145_v56, 3  ;;  %v918_v10 = vrot.slane %v8153_v58, 3 }
  0x2b   : > { %1113 = vrot.lane.b32.xlu1 %v1059_v55, %s7931_s15  ;;  %v919_v11 = vrot.slane %v8150_v57, 3  ;;  %v484_v12 = vrot.slane %v416_v3, 6  ;;  %v485_v13 = vrot.slane %v417_v4, 6  ;;  %v1061_v14 = vsel %vm1056_vm3, %v1058_v43, %v1060_v0  ;;  %v1447_v55 = vld [vmem:[%s11796_s1 + $0x90] sm:$0xff] }
  0x2c   : > { %7766 = vrot.lane.b32.xlu0 %v7765_v63, %s7932_s16  ;;  %v757_v15 = vsel %vm573_vm4, %v754_v53, %v756_v1  ;;  %v767_v16 = vsel %vm573_vm4, %v765_v2, %v766_v5  ;;  %v487_v19 = vrot.slane %v418_v9, 6  ;;  %v7775_v20 = vpack.i.bf16 %v615_v7, %v605_v6  ;;  %v1449_v7 = vld [vmem:[%s11796_s1 + $0xa0] sm:$0xff] }
  0x2d   : > { %v8182_v17 = vsel %vm476_vm0, %v484_v12, %v485_v13  ;;  %v8185_v18 = vsel %vm476_vm0, 0.0, %v484_v12  ;;  %v7780_v21 = vpack.i.bf16 %v767_v16, %v757_v15  ;;  %v910_v22 = vsel %vm903_vm1, %v907_v38, %v909_v8  ;;  %v1454_v12 = vld [vmem:[%s11796_s1 + $0xc8] sm:$0xff]  ;;  %v422_v15 = vld [vmem:[%s8096_s14 + $0x50] sm:$0xff] }
  0x2e   : > { %v920_v23 = vsel %vm903_vm1, %v918_v10, %v919_v11  ;;  %v606_v24 = vrot.slane %v8185_v18, 1  ;;  %v607_v25 = vrot.slane %v8182_v17, 1  ;;  %v8196_v26 = vsel %vm476_vm0, %v485_v13, %v487_v19  ;;  %v1456_v13 = vld [vmem:[%s11796_s1 + $0xd8] sm:$0xff] }
  0x2f   : > { %661 = vrot.lane.b32.xlu1 %v604_v60, %s7930_s30  ;;  %v7785_v27 = vpack.i.bf16 %v920_v23, %v910_v22  ;;  %v609_v30 = vrot.slane %v8196_v26, 1  ;;  %v1062_v31 = vrot.slane %v8145_v56, 4  ;;  %v758_v37 = vrot.slane %v8185_v18, 2  ;;  %v1455_v22 = vld [vmem:[%s11796_s1 + $0xd0] sm:$0xff] }
  0x30   : > { %1115 = vrot.lane.b32.xlu0 %v1061_v14, %s7931_s15  ;;  %v608_v29 = vsel %vm598_vm2, %v606_v24, %v607_v25  ;;  %v759_v38 = vrot.slane %v8182_v17, 2  ;;  %v761_v42 = vrot.slane %v8196_v26, 2  ;;  %v489_v43 = vrot.slane %v419_v39, 6  ;;  %v1457_v39 = vld [vmem:[%s11796_s1 + $0xe0] sm:$0xff] }
  0x31   : > { %v610_v36 = vsel %vm598_vm2, %v607_v25, %v609_v30  ;;  %v1063_v40 = vsel %vm1056_vm3, %v1060_v0, %v1062_v31  ;;  %v912_v44 = vrot.slane %v8182_v17, 3  ;;  %v914_v45 = vrot.slane %v8196_v26, 3  ;;  %v1450_v0 = vld [vmem:[%s11796_s1 + $0xa8] sm:$0xff] }
  0x32   : > { %v760_v41 = vsel %vm573_vm4, %v758_v37, %v759_v38  ;;  %v762_v47 = vsel %vm573_vm4, %v759_v38, %v761_v42  ;;  %v911_v48 = vrot.slane %v8185_v18, 3  ;;  %v490_v52 = vsel %vm476_vm0, %v487_v19, %v489_v43  ;;  %v423_v19 = vld [vmem:[%s8096_s14 + $0x58] sm:$0xf]  ;;  %v1458_v25 = vld [vmem:[%s11796_s1 + $0xe8] sm:$0xff] }
  0x33   : > { %7776 = vrot.lane.b32.xlu1 %v7775_v20, %s7930_s30  ;;  %v1064_v53 = vrot.slane %v8185_v18, 4  ;;  %v915_v59 = vsel %vm903_vm1, %v912_v44, %v914_v45  ;;  %v1065_v60 = vrot.slane %v8182_v17, 4  ;;  %v7259_v61 = vpack.c.bf16 %v1443_v49, %v1441_v46  ;;  %v1462_v43 = vld [vmem:[%s11796_s1 + $0x108] sm:$0xff] }
  0x34   : > { %7781 = vrot.lane.b32.xlu0 %v7780_v21, %s7932_s16  ;;  %v7261_v63 = vpack.c.bf16 %v1448_v51, %v1446_v50  ;;  %v913_v2 = vsel %vm903_vm1, %v911_v48, %v912_v44  ;;  %v8254_v3 = vsel %vm573_vm4, %v490_v52, 0.0  ;;  %v7263_v4 = vpack.c.bf16 %v1447_v55, %v1445_v54  ;;  %v1453_v21 = vld [vmem:[%s11796_s1 + $0xc0] sm:$0xff]  ;;  %v1464_v44 = vld [vmem:[%s11796_s1 + $0x118] sm:$0xf]  ;;  %v1463_v51 = vld [vmem:[%s11796_s1 + $0x110] sm:$0xf] }
  0x35   : > { %7260 = vmatpush1.bf16.msra.mxu0 %v7259_v61  ;;  %v1066_v9 = vsel %vm1056_vm3, %v1064_v53, %v1065_v60  ;;  %v611_v10 = vrot.slane %v8254_v3, 1  ;;  %v1067_v14 = vrot.slane %v8196_v26, 4  ;;  %v7269_v20 = vpack.c.bf16 %v1456_v13, %v1454_v12  ;;  %v1461_v50 = vld [vmem:[%s11796_s1 + $0x100] sm:$0xff] }
  0x36   : > { %7262 = vmatprep.subr.bf16.mxu0 %v7261_v63  ;;  %v916_v24 = vrot.slane %v8254_v3, 3  ;;  %v494_v37 = vrot.slane %v422_v15, 6  ;;  %v496_v38 = vrot.slane %v423_v19, 6  ;;  %v7280_v55 = vpack.c.bf16 %v1463_v51, %v1461_v50  ;;  %v426_v15 = vld [vmem:[%s8096_s14 + $0x70] sm:$0xff] }
  0x37   : > { %7786 = vrot.lane.b32.xlu1 %v7785_v27, %s11812_s23  ;;  %v612_v23 = vsel %vm598_vm2, %v609_v30, %v611_v10  ;;  %v1460_v27 = vld [vmem:[%s11796_s1 + $0xf8] sm:$0xff]  ;;  %vm5020_vm5 = vcmask 1045509  }
  0x38   : > { %663 = vrot.lane.b32.xlu0 %v608_v29, %s7930_s30  ;;  %v1068_v29 = vsel %vm1056_vm3, %v1065_v60, %v1067_v14  ;;  %v7273_v30 = vpack.c.bf16 %v1460_v27, %v1458_v25  ;;  %v497_v48 = vsel %vm476_vm0, %v494_v37, %v496_v38  ;;  %v8330_v53 = vsel %vm476_vm0, %v492_v35, %v494_v37 }
  0x39   : > { %7264 = vmatpush1.bf16.msra.mxu0 %v7263_v4  ;;  %v8333_v54 = vsel %vm573_vm4, %v497_v48, 0.0  ;;  %v1072_v60 = vrot.slane %v8150_v57, 4  ;;  %v768_v28 = vrot.slane %v8330_v53, 2  ;;  %v616_v61 = vrot.slane %v8330_v53, 1 }
  0x3a   : > { %v770_v35 = vrot.slane %v8333_v54, 2  ;;  %v618_v63 = vrot.slane %v8333_v54, 1  ;;  %v921_v12 = vrot.slane %v8330_v53, 3  ;;  %v923_v13 = vrot.slane %v8333_v54, 3 }
  0x3b   : > { %813 = vrot.lane.b32.xlu1 %v756_v1, %s7932_s16  ;;  %v1452_v1 = vld [vmem:[%s11796_s1 + $0xb8] sm:$0xff]  ;;  %v769_v4 = vsel %vm573_vm4, %v766_v5, %v768_v28  ;;  %v1076_v37 = vrot.slane %v8333_v54, 4 }
  0x3c   : > { %665 = vrot.lane.b32.xlu0 %v610_v36, %s7930_s30  ;;  %v7265_v6 = vpack.c.bf16 %v1452_v1, %v1450_v0  ;;  %v763_v36 = vrot.slane %v8254_v3, 2  ;;  %v424_v0 = vld [vmem:[%s8096_s14 + $0x60] sm:$0xff]  ;;  %v425_v1 = vld [vmem:[%s8096_s14 + $0x68] sm:$0xff]  ;;  %v922_v19 = vsel %vm903_vm1, %v919_v11, %v921_v12 }
  0x3e   : > { %7266 = vmatprep.subr.bf16.mxu0 %v7265_v6  ;;  %v764_v46 = vsel %vm573_vm4, %v761_v42, %v763_v36  ;;  %v771_v6 = vsel %vm573_vm4, %v768_v28, %v770_v35 }
  0x3f   : > { %1117 = vrot.lane.b32.xlu1 %v1063_v40, %s7931_s15  ;;  %v1459_v40 = vld [vmem:[%s11796_s1 + $0xf0] sm:$0xff] }
  0x40   : > { %815 = vrot.lane.b32.xlu0 %v760_v41, %s7932_s16  ;;  %v917_v41 = vsel %vm903_vm1, %v914_v45, %v916_v24  ;;  %v7275_v49 = vpack.c.bf16 %v1459_v40, %v1457_v39  ;;  %v7277_v45 = vpack.c.bf16 %v1464_v44, %v1462_v43  ;;  %v427_v39 = vld [vmem:[%s8096_s14 + $0x78] sm:$0xf] }
  0x41   : > { %v503_v44 = vrot.slane %v427_v39, 6 }
  0x43   : > { %966 = vrot.lane.b32.xlu1 %v909_v8, %s11812_s23  ;;  %v1451_v8 = vld [vmem:[%s11796_s1 + $0xb0] sm:$0xff] }
  0x44   : > { %817 = vrot.lane.b32.xlu0 %v762_v47, %s7932_s16  ;;  %v7267_v16 = vpack.c.bf16 %v1451_v8, %v1449_v7  ;;  %v1069_v47 = vrot.slane %v8254_v3, 4  ;;  %v498_v7 = vrot.slane %v424_v0, 6  ;;  %v499_v8 = vrot.slane %v425_v1, 6 }
  0x46   : > { %7268 = vmatpush1.bf16.msra.mxu0 %v7267_v16  ;;  %v1070_v52 = vsel %vm1056_vm3, %v1067_v14, %v1069_v47  ;;  %v7795_v14 = vpack.i.bf16 %v771_v6, %v769_v4  ;;  %v1074_v16 = vrot.slane %v8330_v53, 4 }
  0x47   : > { %970 = vrot.lane.b32.xlu1 %v915_v59, %s11812_s23  ;;  %7270 = vmatprep.subr.bf16.mxu0 %v7269_v20  ;;  %v1071_v59 = vrot.slane %v8153_v58, 4  ;;  %v8371_v20 = vsel %vm476_vm0, %v498_v7, %v499_v8 }
  0x48   : > { %968 = vrot.lane.b32.xlu0 %v913_v2, %s11812_s23  ;;  %v621_v11 = vrot.slane %v8371_v20, 1  ;;  %v1077_v40 = vsel %vm1056_vm3, %v1074_v16, %v1076_v37  ;;  %v1079_v42 = vrot.slane %v8371_v20, 4 }
  0x49   : > { %v1073_v2 = vsel %vm1056_vm3, %v1071_v59, %v1072_v60 }
  0x4b   : > { %1121 = vrot.lane.b32.xlu1 %v1066_v9, %s7931_s15  ;;  %v617_v9 = vsel %vm598_vm2, %v614_v62, %v616_v61  ;;  %v924_v62 = vsel %vm903_vm1, %v921_v12, %v923_v13 }
  0x4c   : > { %1119 = vrot.lane.b32.xlu0 %v1062_v31, %s7931_s15  ;;  %v7271_v31 = vpack.c.bf16 %v1455_v22, %v1453_v21  ;;  %v8374_v21 = vsel %vm476_vm0, 0.0, %v498_v7  ;;  %v501_v22 = vrot.slane %v426_v15, 6 }
  0x4d   : > { %v620_v25 = vrot.slane %v8374_v21, 1  ;;  %v1078_v51 = vrot.slane %v8374_v21, 4 }
  0x4e   : > { %7272 = vmatpush1.bf16.msra.mxu0 %v7271_v31  ;;  %v8382_v27 = vsel %vm476_vm0, %v499_v8, %v501_v22  ;;  %v772_v31 = vrot.slane %v8374_v21, 2 }
  0x4f   : > { %667 = vrot.lane.b32.xlu1 %v612_v23, %s7930_s30  ;;  %7274 = vmatprep.subr.bf16.mxu0 %v7273_v30  ;;  %v1075_v23 = vsel %vm1056_vm3, %v1072_v60, %v1074_v16  ;;  %v773_v30 = vrot.slane %v8371_v20, 2  ;;  %v775_v43 = vrot.slane %v8382_v27, 2  ;;  %v1080_v59 = vsel %vm1056_vm3, %v1078_v51, %v1079_v42 }
  0x50   : > { %1123 = vrot.lane.b32.xlu0 %v1068_v29, %s7931_s15  ;;  %v622_v29 = vsel %vm598_vm2, %v620_v25, %v621_v11  ;;  %v1081_v28 = vrot.slane %v8382_v27, 4 }
  0x51   : > { %v776_v48 = vsel %vm573_vm4, %v773_v30, %v775_v43 }
  0x52   : > { %7276 = vmatpush1.bf16.msra.mxu0 %v7275_v49  ;;  %v925_v49 = vrot.slane %v8374_v21, 3  ;;  %v1082_v1 = vsel %vm1056_vm3, %v1079_v42, %v1081_v28 }
  0x53   : > { %972 = vrot.lane.b32.xlu1 %v917_v41, %s11812_s23  ;;  %7279 = vmatprep.subr.msk.bf16.mxu0 %vm8322_vm6, %v7277_v45  ;;  %v774_v41 = vsel %vm573_vm4, %v772_v31, %v773_v30  ;;  %v504_v45 = vsel %vm476_vm0, %v501_v22, %v503_v44 }
  0x54   : > { %819 = vrot.lane.b32.xlu0 %v764_v46, %s7932_s16  ;;  %v926_v46 = vrot.slane %v8371_v20, 3 }
  0x56   : > { %7282 = vmatpush1.bf16.msk.msra.mxu0 %vm8322_vm6, %v7280_v55  ;;  %v8414_v55 = vsel %vm573_vm4, %v504_v45, 0.0  ;;  %v432_v45 = vld [vmem:[%s8096_s14 + $0xa0] sm:$0xff]  ;;  %vm5024_vm6 = vcmask 1047559  }
  0x57   : > { %669 = vrot.lane.b32.xlu1 %v611_v10, %s7930_s30  ;;  %v619_v10 = vsel %vm598_vm2, %v616_v61, %v618_v63  ;;  %v625_v60 = vrot.slane %v8414_v55, 1  ;;  %v429_v61 = vld [vmem:[%s8096_s14 + $0x88] sm:$0xff]  ;;  %v777_v4 = vrot.slane %v8414_v55, 2 }
  0x58   : > { %1125 = vrot.lane.b32.xlu0 %v1070_v52, %s7931_s15  ;;  %v7790_v5 = vpack.i.bf16 %v619_v10, %v617_v9  ;;  %v927_v52 = vsel %vm903_vm1, %v925_v49, %v926_v46  ;;  %v506_v7 = vrot.slane %v429_v61, 6  ;;  %v1083_v10 = vrot.slane %v8414_v55, 4 }
  0x59   : > { %v778_v12 = vsel %vm573_vm4, %v775_v43, %v777_v4  ;;  %v512_v61 = vrot.slane %v432_v45, 6 }
  0x5a   : > { %v1084_v22 = vsel %vm1056_vm3, %v1081_v28, %v1083_v10 }
  0x5b   : > { %974 = vrot.lane.b32.xlu1 %v916_v24, %s11812_s23  ;;  %v7800_v24 = vpack.i.bf16 %v924_v62, %v922_v19 }
  0x5c   : > { %821 = vrot.lane.b32.xlu0 %v763_v36, %s7932_s16  ;;  %v623_v36 = vrot.slane %v8382_v27, 1 }
  0x5e   : > { %v624_v38 = vsel %vm598_vm2, %v621_v11, %v623_v36  ;;  %v626_v0 = vsel %vm598_vm2, %v623_v36, %v625_v60 }
  0x5f   : > { %1129 = vrot.lane.b32.xlu1 %v1073_v2, %s7931_s15  ;;  %v930_v2 = vrot.slane %v8414_v55, 3 }
  0x60   : > { %1127 = vrot.lane.b32.xlu0 %v1069_v47, %s7931_s15  ;;  %v928_v47 = vrot.slane %v8382_v27, 3 }
  0x62   : > { %v929_v50 = vsel %vm903_vm1, %v926_v46, %v928_v47  ;;  %v931_v9 = vsel %vm903_vm1, %v928_v47, %v930_v2 }
  0x63   : > { %7796 = vrot.lane.b32.xlu1 %v7795_v14, %s7932_s16 }
  0x64   : > { %7791 = vrot.lane.b32.xlu0 %v7790_v5, %s7930_s30  ;;  %v431_v5 = vld [vmem:[%s8096_s14 + $0x98] sm:$0xf] }
  0x65   : > { %v510_v25 = vrot.slane %v431_v5, 6 }
  0x67   : > { %1131 = vrot.lane.b32.xlu1 %v1075_v23, %s7931_s15  ;;  %v436_v23 = vld [vmem:[%s8096_s14 + $0xc0] sm:$0xff] }
  0x68   : > { %7801 = vrot.lane.b32.xlu0 %v7800_v24, %s11812_s23  ;;  %v8453_v24 = vld [vmem:[%s8096_s14 + $0xc8] sm:$0xff] }
  0x6b   : > { %679 = vrot.lane.b32.xlu1 %v622_v29, %s7930_s30 }
  0x6c   : > { %677 = vrot.lane.b32.xlu0 %v618_v63, %s7930_s30  ;;  %v430_v63 = vld [vmem:[%s8096_s14 + $0x90] sm:$0xff] }
  0x6d   : > { %v508_v8 = vrot.slane %v430_v63, 6 }
  0x6f   : > { %829 = vrot.lane.b32.xlu1 %v770_v35, %s7932_s16  ;;  %v428_v35 = vld [vmem:[%s8096_s14 + $0x80] sm:$0xff]  ;;  %v8439_v14 = vsel %vm476_vm0, %v506_v7, %v508_v8  ;;  %v511_v43 = vsel %vm476_vm0, %v508_v8, %v510_v25 }
  0x70   : > { %681 = vrot.lane.b32.xlu0 %v624_v38, %s7930_s30  ;;  %v505_v6 = vrot.slane %v428_v35, 6  ;;  %v630_v62 = vrot.slane %v8439_v14, 1  ;;  %v935_v36 = vrot.slane %v8439_v14, 3  ;;  %v782_v39 = vrot.slane %v8439_v14, 2 }
  0x71   : > { %v8485_v42 = vsel %vm573_vm4, %v511_v43, 0.0  ;;  %v1088_v35 = vrot.slane %v8439_v14, 4 }
  0x72   : > { %v8442_v15 = vsel %vm476_vm0, 0.0, %v505_v6  ;;  %v784_v63 = vrot.slane %v8485_v42, 2 }
  0x73   : > { %1133 = vrot.lane.b32.xlu1 %v1077_v40, %s7931_s15  ;;  %v627_v16 = vrot.slane %v8442_v15, 1  ;;  %v932_v11 = vrot.slane %v8442_v15, 3  ;;  %v519_v40 = vrot.slane %v436_v23, 6 }
  0x74   : > { %831 = vrot.lane.b32.xlu0 %v774_v41, %s7932_s16  ;;  %v520_v41 = vrot.slane %v8453_v24, 6 }
  0x75   : > { %v8482_v51 = vsel %vm476_vm0, 0.0, %v519_v40 }
  0x77   : > { %982 = vrot.lane.b32.xlu1 %v923_v13, %s11812_s23  ;;  %v8436_v13 = vsel %vm476_vm0, %v505_v6, %v506_v7  ;;  %v632_v6 = vrot.slane %v8485_v42, 1  ;;  %v641_v7 = vrot.slane %v8482_v51, 1 }
  0x78   : > { %833 = vrot.lane.b32.xlu0 %v776_v48, %s7932_s16  ;;  %v628_v19 = vrot.slane %v8436_v13, 1  ;;  %v933_v29 = vrot.slane %v8436_v13, 3  ;;  %v780_v30 = vrot.slane %v8436_v13, 2  ;;  %v1086_v28 = vrot.slane %v8436_v13, 4 }
  0x79   : > { %v633_v25 = vsel %vm598_vm2, %v630_v62, %v632_v6 }
  0x7a   : > { %v629_v38 = vsel %vm598_vm2, %v627_v16, %v628_v19  ;;  %v631_v31 = vsel %vm598_vm2, %v628_v19, %v630_v62  ;;  %v934_v46 = vsel %vm903_vm1, %v932_v11, %v933_v29  ;;  %v936_v47 = vsel %vm903_vm1, %v933_v29, %v935_v36 }
  0x7b   : > { %986 = vrot.lane.b32.xlu1 %v929_v50, %s11812_s23  ;;  %v7805_v44 = vpack.i.bf16 %v631_v31, %v629_v38  ;;  %v783_v49 = vsel %vm573_vm4, %v780_v30, %v782_v39  ;;  %v8479_v50 = vsel %vm476_vm0, %v519_v40, %v520_v41  ;;  %v8517_v19 = vsel %vm476_vm0, 0.0, %v512_v61 }
  0x7c   : > { %984 = vrot.lane.b32.xlu0 %v927_v52, %s11812_s23  ;;  %v433_v52 = vld [vmem:[%s8096_s14 + $0xa8] sm:$0xff]  ;;  %v642_v8 = vrot.slane %v8479_v50, 1  ;;  %v634_v31 = vrot.slane %v8517_v19, 1 }
  0x7e   : > { %v643_v11 = vsel %vm598_vm2, %v641_v7, %v642_v8 }
  0x7f   : > { %1137 = vrot.lane.b32.xlu1 %v1080_v59, %s7931_s15  ;;  %v7815_v59 = vpack.i.bf16 %v936_v47, %v934_v46  ;;  %v7820_v62 = vpack.i.bf16 %v643_v11, %v633_v25  ;;  %v937_v46 = vrot.slane %v8485_v42, 3  ;;  %v946_v47 = vrot.slane %v8482_v51, 3 }
  0x80   : > { %1135 = vrot.lane.b32.xlu0 %v1076_v37, %s7931_s15  ;;  %v779_v37 = vrot.slane %v8442_v15, 2  ;;  %v786_v25 = vrot.slane %v8517_v19, 2 }
  0x81   : > { %v938_v7 = vsel %vm903_vm1, %v935_v36, %v937_v46 }
  0x82   : > { %v781_v48 = vsel %vm573_vm4, %v779_v37, %v780_v30 }
  0x83   : > { %683 = vrot.lane.b32.xlu1 %v626_v0, %s7930_s30  ;;  %v793_v0 = vrot.slane %v8482_v51, 2 }
  0x84   : > { %1139 = vrot.lane.b32.xlu0 %v1082_v1, %s7931_s15  ;;  %v794_v1 = vrot.slane %v8479_v50, 2 }
  0x86   : > { %v795_v5 = vsel %vm573_vm4, %v793_v0, %v794_v1 }
  0x87   : > { %988 = vrot.lane.b32.xlu1 %v931_v9, %s11812_s23  ;;  %v8500_v9 = vld [vmem:[%s8096_s14 + $0xb0] sm:$0xff] }
  0x88   : > { %835 = vrot.lane.b32.xlu0 %v778_v12, %s7932_s16  ;;  %v785_v12 = vsel %vm573_vm4, %v782_v39, %v784_v63  ;;  %v515_v29 = vrot.slane %v8500_v9, 6 }
  0x89   : > { %v7825_v38 = vpack.i.bf16 %v795_v5, %v785_v12 }
  0x8b   : > { %685 = vrot.lane.b32.xlu1 %v625_v60, %s7930_s30  ;;  %v7810_v60 = vpack.i.bf16 %v783_v49, %v781_v48  ;;  %v947_v48 = vrot.slane %v8479_v50, 3 }
  0x8c   : > { %1141 = vrot.lane.b32.xlu0 %v1084_v22, %s7931_s15 }
  0x8f   : > { %990 = vrot.lane.b32.xlu1 %v930_v2, %s11812_s23  ;;  %v513_v2 = vrot.slane %v433_v52, 6 }
  0x90   : > { %837 = vrot.lane.b32.xlu0 %v777_v4, %s7932_s16  ;;  %v1085_v4 = vrot.slane %v8442_v15, 4 }
  0x91   : > { %v8514_v16 = vsel %vm476_vm0, %v512_v61, %v513_v2 }
  0x92   : > { %v1087_v23 = vsel %vm1056_vm3, %v1085_v4, %v1086_v28  ;;  %v635_v30 = vrot.slane %v8514_v16, 1 }
  0x93   : > { %7806 = vrot.lane.b32.xlu1 %v7805_v44, %s7930_s30  ;;  %v8532_v44 = vsel %vm476_vm0, %v513_v2, %v515_v29 }
  0x94   : > { %1143 = vrot.lane.b32.xlu0 %v1083_v10, %s7931_s15  ;;  %v1089_v10 = vsel %vm1056_vm3, %v1086_v28, %v1088_v35  ;;  %v637_v0 = vrot.slane %v8532_v44, 1 }
  0x96   : > { %v638_v36 = vsel %vm598_vm2, %v635_v30, %v637_v0 }
  0x97   : > { %7816 = vrot.lane.b32.xlu1 %v7815_v59, %s11812_s23  ;;  %v636_v59 = vsel %vm598_vm2, %v634_v31, %v635_v30 }
  0x98   : > { %7811 = vrot.lane.b32.xlu0 %v7810_v60, %s7932_s16 }
  0x99   : > { %v7772_v22 = vpop.permute.xlu1 %7771 }
  0x9a   : > { %v7762_v37 = vpop.permute.xlu0 %7761  ;;  %v7773_v60 = vunpack.i.l.bf16 %v7772_v22 }
  0x9b   : > { %1147 = vrot.lane.b32.xlu1 %v1089_v10, %s7931_s15  ;;  %v7764_v39 = vunpack.i.h.bf16 %v7762_v37  ;;  %v7763_v40 = vunpack.i.l.bf16 %v7762_v37  ;;  %v7774_v10 = vunpack.i.h.bf16 %v7772_v22  ;;  %v787_v22 = vrot.slane %v8514_v16, 2 }
  0x9c   : > { %1145 = vrot.lane.b32.xlu0 %v1087_v23, %s7931_s15 }
  0x9d   : > { %v1114_v43 = vpop.permute.xlu1 %1113  ;;  %v1211_v28 = vsel %vm1209_vm8, %v8116_v32, %v7764_v39  ;;  %v1210_v61 = vsel %vm1209_vm8, %v8122_v34, %v7763_v40  ;;  %v948_v32 = vsel %vm903_vm1, %v946_v47, %v947_v48  ;;  %v788_v30 = vsel %vm573_vm4, %v786_v25, %v787_v22 }
  0x9e   : > { %v7767_v49 = vpop.permute.xlu0 %7766  ;;  %6804 = vmatprep.mubr.msk.f32.mxu0 %vm1561_vm7, %v1114_v43  ;;  %v7830_v11 = vpack.i.bf16 %v948_v32, %v938_v7  ;;  %v789_v39 = vrot.slane %v8532_v44, 2 }
  0x9f   : > { %v7769_v45 = vunpack.i.h.bf16 %v7767_v49  ;;  %v7768_v52 = vunpack.i.l.bf16 %v7767_v49  ;;  %7826 = vrot.lane.b32.xlu1 %v7825_v38, %s7932_s16  ;;  %v435_v49 = vld [vmem:[%s8096_s14 + $0xb8] sm:$0xf] }
  0xa0   : > { %7821 = vrot.lane.b32.xlu0 %v7820_v62, %s7930_s30 }
  0xa1   : > { %v8546_v2 = vpop.permute.xlu1 %661  ;;  %v1243_v4 = vsel %vm1242_vm9, %v1210_v61, %v7768_v52  ;;  %v1244_v34 = vsel %vm1242_vm9, %v1211_v28, %v7769_v45  ;;  %v790_v52 = vsel %vm573_vm4, %v787_v22, %v789_v39 }
  0xa2   : > { %v1116_v12 = vpop.permute.xlu0 %1115  ;;  %v1276_v5 = vsel %vm1275_vm10, %v1243_v4, %v7773_v60  ;;  %v1277_v37 = vsel %vm1275_vm10, %v1244_v34, %v7774_v10  ;;  %v940_v60 = vrot.slane %v8514_v16, 3  ;;  %v517_v34 = vrot.slane %v435_v49, 6 }
  0xa3   : > { %695 = vrot.lane.b32.xlu1 %v636_v59, %s7930_s30  ;;  %v1309_v23 = vsel %vm1308_vm11, %v1276_v5, %v1114_v43  ;;  %v1090_v43 = vrot.slane %v8485_v42, 4  ;;  %v939_v59 = vrot.slane %v8517_v19, 3  ;;  %v942_v5 = vrot.slane %v8532_v44, 3 }
  0xa4   : > { %693 = vrot.lane.b32.xlu0 %v632_v6, %s7930_s30  ;;  %1689 = vmatmul.mubr.f32.vlgmr.msra.gmra.mrb[0].mxu0 %v1309_v23  ;;  %v1310_v6 = vsel %vm1308_vm11, %v1277_v37, %v1116_v12  ;;  %v518_v25 = vsel %vm476_vm0, %v515_v29, %v517_v34 }
  0xa5   : > { %6805 = vmatprep.mubr.msk.f32.mxu0 %vm1561_vm7, %v1116_v12  ;;  %v8569_v38 = vpop.permute.xlu1 %7776  ;;  %v1091_v7 = vsel %vm1056_vm3, %v1088_v35, %v1090_v43  ;;  %v943_v22 = vsel %vm903_vm1, %v940_v60, %v942_v5  ;;  %v8617_v9 = vsel %vm573_vm4, %v518_v25, 0.0 }
  0xa6   : > { %v8571_v31 = vpop.permute.xlu0 %7781  ;;  %v7778_v40 = vunpack.i.l.bf16 %v8569_v38  ;;  %v791_v49 = vrot.slane %v8617_v9, 2 }
  0xa7   : > { %697 = vrot.lane.b32.xlu1 %v638_v36, %s7930_s30  ;;  %v7783_v45 = vunpack.i.l.bf16 %v8571_v31  ;;  %v1093_v36 = vrot.slane %v8514_v16, 4 }
  0xa8   : > { %7831 = vrot.lane.b32.xlu0 %v7830_v11, %s11812_s23  ;;  %1695 = vmatmul.mubr.f32.gmra.mrb[2].mxu0 %v1310_v6  ;;  %v1212_v28 = vsel %vm1209_vm8, %v8119_v33, %v7778_v40  ;;  %v1095_v11 = vrot.slane %v8532_v44, 4  ;;  %v1092_v6 = vrot.slane %v8517_v19, 4  ;;  %v439_v40 = vld [vmem:[%s8096_s14 + $0xd8] sm:$0xf] }
  0xa9   : > { %v8579_v62 = vpop.permute.xlu1 %7786  ;;  %v1245_v10 = vsel %vm1242_vm9, %v1212_v28, %v7783_v45 }
  0xaa   : > { %v664_v47 = vpop.permute.xlu0 %663  ;;  %v7788_v61 = vunpack.i.l.bf16 %v8579_v62 }
  0xab   : > { %847 = vrot.lane.b32.xlu1 %v788_v30, %s7932_s16  ;;  %v438_v30 = vld [vmem:[%s8096_s14 + $0xd0] sm:$0xff] }
  0xac   : > { %845 = vrot.lane.b32.xlu0 %v784_v63, %s7932_s16  ;;  %v941_v63 = vsel %vm903_vm1, %v939_v59, %v940_v60  ;;  %v1278_v33 = vsel %vm1275_vm10, %v1245_v10, %v7788_v61  ;;  %v639_v59 = vrot.slane %v8617_v9, 1  ;;  %v522_v28 = vrot.slane %v438_v30, 6 }
  0xad   : > { %v814_v4 = vpop.permute.xlu1 %813  ;;  %v524_v61 = vrot.slane %v439_v40, 6  ;;  %v1097_v10 = vrot.slane %v8617_v9, 4 }
  0xae   : > { %v666_v32 = vpop.permute.xlu0 %665 }
  0xaf   : > { %849 = vrot.lane.b32.xlu1 %v790_v52, %s7932_s16  ;;  %v1094_v52 = vsel %vm1056_vm3, %v1092_v6, %v1093_v36 }
  0xb0   : > { %1149 = vrot.lane.b32.xlu0 %v1091_v7, %s7931_s15  ;;  %v1214_v7 = vsel %vm1209_vm8, %v8185_v18, %v664_v47  ;;  %v640_v18 = vsel %vm598_vm2, %v637_v0, %v639_v59  ;;  %v944_v47 = vrot.slane %v8617_v9, 3 }
  0xb1   : > { %v1118_v12 = vpop.permute.xlu1 %1117 }
  0xb2   : > { %v816_v23 = vpop.permute.xlu0 %815  ;;  %6806 = vmatprep.mubr.msk.f32.mxu0 %vm1561_vm7, %v1118_v12  ;;  %v1311_v35 = vsel %vm1308_vm11, %v1278_v33, %v1118_v12  ;;  %v945_v40 = vsel %vm903_vm1, %v942_v5, %v944_v47 }
  0xb3   : > { %1000 = vrot.lane.b32.xlu1 %v941_v63, %s11812_s23  ;;  %1701 = vmatmul.mubr.f32.gmra.mrb[4].mxu0 %v1311_v35  ;;  %v1247_v34 = vsel %vm1242_vm9, %v1214_v7, %v816_v23  ;;  %v792_v63 = vsel %vm573_vm4, %v789_v39, %v791_v49  ;;  %v525_v39 = vsel %vm476_vm0, %v522_v28, %v524_v61  ;;  %v1099_v61 = vrot.slane %v8482_v51, 4 }
  0xb4   : > { %998 = vrot.lane.b32.xlu0 %v937_v46, %s11812_s23  ;;  %v1096_v46 = vsel %vm1056_vm3, %v1093_v36, %v1095_v11 }
  0xb5   : > { %v967_v37 = vpop.permute.xlu1 %966 }
  0xb6   : > { %v818_v29 = vpop.permute.xlu0 %817 }
  0xb7   : > { %1151 = vrot.lane.b32.xlu1 %v1090_v43, %s7931_s15  ;;  %v1213_v43 = vsel %vm1209_vm8, %v8145_v56, %v8546_v2 }
  0xb8   : > { %1002 = vrot.lane.b32.xlu0 %v943_v22, %s11812_s23  ;;  %v1246_v12 = vsel %vm1242_vm9, %v1213_v43, %v814_v4  ;;  %v1215_v4 = vsel %vm1209_vm8, %v8182_v17, %v666_v32  ;;  %v1098_v22 = vsel %vm1056_vm3, %v1095_v11, %v1097_v10 }
  0xb9   : > { %v971_v45 = vpop.permute.xlu1 %970  ;;  %v1279_v56 = vsel %vm1275_vm10, %v1246_v12, %v967_v37  ;;  %v8655_v37 = vsel %vm476_vm0, %v520_v41, %v522_v28  ;;  %v1248_v6 = vsel %vm1242_vm9, %v1215_v4, %v818_v29 }
  0xba   : > { %v969_v60 = vpop.permute.xlu0 %968  ;;  %v1281_v17 = vsel %vm1275_vm10, %v1248_v6, %v971_v45  ;;  %v644_v24 = vrot.slane %v8655_v37, 1  ;;  %v949_v12 = vrot.slane %v8655_v37, 3 }
  0xbb   : > { %1155 = vrot.lane.b32.xlu1 %v1096_v46, %s7931_s15  ;;  %v1280_v33 = vsel %vm1275_vm10, %v1247_v34, %v969_v60  ;;  %v8661_v46 = vsel %vm573_vm4, %v525_v39, 0.0 }
  0xbc   : > { %1153 = vrot.lane.b32.xlu0 %v1094_v52, %s7931_s15  ;;  %v646_v29 = vrot.slane %v8661_v46, 1  ;;  %v645_v34 = vsel %vm598_vm2, %v642_v8, %v644_v24  ;;  %v798_v8 = vrot.slane %v8661_v46, 2 }
  0xbd   : > { %v1122_v35 = vpop.permute.xlu1 %1121 }
  0xbe   : > { %v1120_v2 = vpop.permute.xlu0 %1119  ;;  %v1313_v23 = vsel %vm1308_vm11, %v1280_v33, %v1122_v35  ;;  %v796_v33 = vrot.slane %v8655_v37, 2 }
  0xbf   : > { %v1312_v25 = vsel %vm1308_vm11, %v1279_v56, %v1120_v2  ;;  %v6771_v36 = vcombine.low %v1120_v2, %v1122_v35  ;;  %851 = vrot.lane.b32.xlu1 %v792_v63, %s7932_s16  ;;  %v1381_v5 = vcombine.high %v1313_v23, %v1122_v35  ;;  %v1100_v63 = vrot.slane %v8479_v50, 4  ;;  %v441_v2 = vld [vmem:[%s8096_s14 + $0xe8] sm:$0xff] }
  0xc0   : > { %699 = vrot.lane.b32.xlu0 %v640_v18, %s7930_s30  ;;  %v6770_v0 = vcombine.low %v1312_v25, %v1313_v23  ;;  %v8693_v23 = vld [vmem:[%s8096_s14 + $0xf0] sm:$0xff] }
  0xc1   : > { %6807 = vmatprep.mubr.msk.f32.mxu0 %vm1561_vm7, %v6771_v36  ;;  %v668_v30 = vpop.permute.xlu1 %667  ;;  %v1101_v36 = vsel %vm1056_vm3, %v1099_v61, %v1100_v63 }
  0xc2   : > { %v1124_v32 = vpop.permute.xlu0 %1123  ;;  %1707 = vmatmul.mubr.f32.gmra.mrb[6].mxu0 %v6770_v0  ;;  %v1216_v60 = vsel %vm1209_vm8, %v8196_v26, %v668_v30  ;;  %v647_v26 = vsel %vm598_vm2, %v644_v24, %v646_v29  ;;  %v527_v24 = vrot.slane %v441_v2, 6  ;;  %v11816_v2 = vmov 0.0|0.0  }
  0xc3   : > { %v1314_v11 = vsel %vm1308_vm11, %v1281_v17, %v1124_v32  ;;  %1157 = vrot.lane.b32.xlu1 %v1098_v22, %s7931_s15  ;;  %v7835_v25 = vpack.i.bf16 %v647_v26, %v645_v34  ;;  %v950_v22 = vsel %vm903_vm1, %v947_v48, %v949_v12  ;;  %v799_v17 = vsel %vm573_vm4, %v796_v33, %v798_v8  ;;  %v1913_v26 = vld [vmem:[%s11798_s3] sm:$0xff] }
  0xc4   : > { %v1382_v41 = vcombine.low %v1314_v11, %v1124_v32  ;;  %1004 = vrot.lane.b32.xlu0 %v945_v40, %s11812_s23  ;;  %v6772_v43 = vcombine.low %v1381_v5, %v1314_v11  ;;  %v1383_v40 = vcombine.high %v1314_v11, %v1124_v32  ;;  %7283 = vmatprep.subr.bf16.mxu1 %v11816_v2 }
  0xc5   : > { %v973_v52 = vpop.permute.xlu1 %972 }
  0xc6   : > { %v820_v45 = vpop.permute.xlu0 %819  ;;  %v6773_v28 = vcombine.high %v1122_v35, %v1382_v41  ;;  %v440_v35 = vld [vmem:[%s8096_s14 + $0xe0] sm:$0xff] }
  0xc7   : > { %v1249_v7 = vsel %vm1242_vm9, %v1216_v60, %v820_v45  ;;  %853 = vrot.lane.b32.xlu1 %v791_v49, %s7932_s16  ;;  %v951_v49 = vrot.slane %v8661_v46, 3  ;;  %v526_v4 = vrot.slane %v440_v35, 6 }
  0xc8   : > { %701 = vrot.lane.b32.xlu0 %v639_v59, %s7930_s30  ;;  %6808 = vmatprep.mubr.msk.f32.mxu0 %vm1561_vm7, %v6773_v28  ;;  %v1282_v56 = vsel %vm1275_vm10, %v1249_v7, %v973_v52  ;;  %v1102_v28 = vrot.slane %v8655_v37, 4 }
  0xc9   : > { %1713 = vmatmul.mubr.f32.gmra.mrb[8].mxu0 %v6772_v43  ;;  %v670_v18 = vpop.permute.xlu1 %669  ;;  %v952_v6 = vsel %vm903_vm1, %v949_v12, %v951_v49  ;;  %v8722_v61 = vsel %vm476_vm0, %v526_v4, %v527_v24  ;;  %v8732_v34 = vsel %vm476_vm0, 0.0, %v526_v4  ;;  %v1914_v12 = vld [vmem:[%s11798_s3 + $0x8] sm:$0xff] }
  0xca   : > { %v8689_v59 = vpop.permute.xlu0 %1125  ;;  %v1217_v48 = vsel %vm1209_vm8, %v8254_v3, %v670_v18  ;;  %v7284_v35 = vpack.c.bf16 %v1914_v12, %v1913_v26  ;;  %v649_v18 = vrot.slane %v8722_v61, 1 }
  0xcb   : > { %v1315_v39 = vsel %vm1308_vm11, %v1282_v56, %v8689_v59  ;;  %1159 = vrot.lane.b32.xlu1 %v1097_v10, %s7931_s15  ;;  %v797_v10 = vsel %vm573_vm4, %v794_v1, %v796_v33  ;;  %v7845_v1 = vpack.i.bf16 %v952_v6, %v950_v22  ;;  %v7784_v6 = vunpack.i.h.bf16 %v8571_v31 }
  0xcc   : > { %v1384_v0 = vcombine.low %v1315_v39, %v8689_v59  ;;  %1006 = vrot.lane.b32.xlu0 %v944_v47, %s11812_s23  ;;  %v529_v47 = vrot.slane %v8693_v23, 6  ;;  %v6774_v60 = vcombine.low %v1383_v40, %v1315_v39  ;;  %v7840_v11 = vpack.i.bf16 %v799_v17, %v797_v10  ;;  %7285 = vmatpush1.bf16.msra.mxu1 %v7284_v35  ;;  %v1915_v40 = vld [vmem:[%s11798_s3 + $0x10] sm:$0xff] }
  0xcd   : > { %v975_v30 = vpop.permute.xlu1 %974  ;;  %v1385_v4 = vcombine.high %v1315_v39, %v8689_v59  ;;  %7286 = vmatprep.subr.bf16.mxu1 %v11816_v2  ;;  %v7789_v39 = vunpack.i.h.bf16 %v8579_v62  ;;  %v801_v62 = vrot.slane %v8722_v61, 2  ;;  %v1107_v23 = vrot.slane %v8722_v61, 4 }
  0xce   : > { %v822_v41 = vpop.permute.xlu0 %821  ;;  %v6775_v52 = vcombine.high %v1124_v32, %v1384_v0  ;;  %v8727_v3 = vsel %vm476_vm0, %v527_v24, %v529_v47  ;;  %v7779_v32 = vunpack.i.h.bf16 %v8569_v38  ;;  %v648_v0 = vrot.slane %v8732_v34, 1 }
  0xcf   : > { %v1250_v5 = vsel %vm1242_vm9, %v1217_v48, %v822_v41  ;;  %7836 = vrot.lane.b32.xlu1 %v7835_v25, %s7930_s30  ;;  %v651_v56 = vrot.slane %v8727_v3, 1  ;;  %v800_v48 = vrot.slane %v8732_v34, 2 }
  0xd0   : > { %1161 = vrot.lane.b32.xlu0 %v1101_v36, %s7931_s15  ;;  %6809 = vmatprep.mubr.msk.f32.mxu0 %vm1561_vm7, %v6775_v52  ;;  %v1283_v7 = vsel %vm1275_vm10, %v1250_v5, %v975_v30  ;;  %v1103_v36 = vsel %vm1056_vm3, %v1100_v63, %v1102_v28  ;;  %v1218_v22 = vsel %vm1209_vm8, %v8153_v58, %v7779_v32  ;;  %v1916_v63 = vld [vmem:[%s11798_s3 + $0x18] sm:$0xff] }
  0xd1   : > { %1719 = vmatmul.mubr.f32.gmra.mrb[10].mxu0 %v6774_v60  ;;  %v1130_v45 = vpop.permute.xlu1 %1129  ;;  %v7287_v31 = vpack.c.bf16 %v1916_v63, %v1915_v40  ;;  %v652_v24 = vsel %vm598_vm2, %v649_v18, %v651_v56  ;;  %v650_v52 = vsel %vm598_vm2, %v648_v0, %v649_v18  ;;  %v1251_v60 = vsel %vm1242_vm9, %v1218_v22, %v7784_v6  ;;  %v1920_v0 = vld [vmem:[%s11798_s3 + $0x38] sm:$0xff] }
  0xd2   : > { %v1128_v43 = vpop.permute.xlu0 %1127  ;;  %v1284_v32 = vsel %vm1275_vm10, %v1251_v60, %v7789_v39  ;;  %v802_v26 = vsel %vm573_vm4, %v800_v48, %v801_v62  ;;  %v953_v22 = vrot.slane %v8732_v34, 3  ;;  %v443_v6 = vld [vmem:[%s8096_s14 + $0xf8] sm:$0xf]  ;;  %v954_v39 = vrot.slane %v8722_v61, 3 }
  0xd3   : > { %v1316_v33 = vsel %vm1308_vm11, %v1283_v7, %v1128_v43  ;;  %7846 = vrot.lane.b32.xlu1 %v7845_v1, %s11812_s23  ;;  %7288 = vmatpush1.bf16.msra.mxu1 %v7287_v31  ;;  %v1917_v1 = vld [vmem:[%s11798_s3 + $0x20] sm:$0xff] }
  0xd4   : > { %v1386_v38 = vcombine.low %v1316_v33, %v1128_v43  ;;  %7841 = vrot.lane.b32.xlu0 %v7840_v11, %s7932_s16  ;;  %v6776_v58 = vcombine.low %v1385_v4, %v1316_v33  ;;  %7289 = vmatprep.subr.bf16.mxu1 %v11816_v2  ;;  %v1317_v43 = vsel %vm1308_vm11, %v1284_v32, %v1130_v45  ;;  %v803_v33 = vrot.slane %v8727_v3, 2 }
  0xd5   : > { %v8746_v25 = vpop.permute.xlu1 %7796 }
  0xd6   : > { %v6777_v10 = vcombine.high %v8689_v59, %v1386_v38  ;;  %v7792_v30 = vpop.permute.xlu0 %7791  ;;  %v7798_v59 = vunpack.i.l.bf16 %v8746_v25  ;;  %v804_v63 = vsel %vm573_vm4, %v801_v62, %v803_v33 }
  0xd7   : > { %v7793_v17 = vunpack.i.l.bf16 %v7792_v30  ;;  %709 = vrot.lane.b32.xlu1 %v646_v29, %s7930_s30  ;;  %v7794_v35 = vunpack.i.h.bf16 %v7792_v30  ;;  %v7799_v30 = vunpack.i.h.bf16 %v8746_v25 }
  0xd8   : > { %1163 = vrot.lane.b32.xlu0 %v1103_v36, %s7931_s15  ;;  %6810 = vmatprep.mubr.msk.f32.mxu0 %vm1561_vm7, %v6777_v10  ;;  %v1104_v36 = vrot.slane %v8661_v46, 4 }
  0xd9   : > { %v1219_v41 = vsel %vm1209_vm8, %v8150_v57, %v7793_v17  ;;  %1725 = vmatmul.mubr.f32.gmra.mrb[12].mxu0 %v6776_v58  ;;  %v1132_v29 = vpop.permute.xlu1 %1131  ;;  %v1918_v57 = vld [vmem:[%s11798_s3 + $0x28] sm:$0xff]  ;;  %v1220_v17 = vsel %vm1209_vm8, %v8330_v53, %v7794_v35 }
  0xda   : > { %v7802_v5 = vpop.permute.xlu0 %7801  ;;  %6811 = vmatprep.mubr.msk.f32.mxu0 %vm1561_vm7, %v1130_v45  ;;  %v7290_v7 = vpack.c.bf16 %v1918_v57, %v1917_v1  ;;  %v1252_v12 = vsel %vm1242_vm9, %v1219_v41, %v7798_v59  ;;  %v1919_v45 = vld [vmem:[%s11798_s3 + $0x30] sm:$0xff]  ;;  %v1105_v25 = vsel %vm1056_vm3, %v1102_v28, %v1104_v36  ;;  %v531_v59 = vrot.slane %v443_v6, 6  ;;  %v1922_v53 = vld [vmem:[%s11798_s3 + $0x48] sm:$0xff] }
  0xdb   : > { %v7803_v11 = vunpack.i.l.bf16 %v7802_v5  ;;  %713 = vrot.lane.b32.xlu1 %v652_v24, %s7930_s30  ;;  %v7293_v10 = vpack.c.bf16 %v1920_v0, %v1919_v45  ;;  %v7804_v58 = vunpack.i.h.bf16 %v7802_v5  ;;  %v1921_v24 = vld [vmem:[%s11798_s3 + $0x40] sm:$0xff]  ;;  %v955_v28 = vsel %vm903_vm1, %v953_v22, %v954_v39  ;;  %v1923_v57 = vld [vmem:[%s11798_s3 + $0x50] sm:$0xff] }
  0xdc   : > { %711 = vrot.lane.b32.xlu0 %v650_v52, %s7930_s30  ;;  %7291 = vmatpush1.bf16.msra.mxu1 %v7290_v7  ;;  %v7296_v48 = vpack.c.bf16 %v1922_v53, %v1921_v24  ;;  %v1253_v62 = vsel %vm1242_vm9, %v1220_v17, %v7799_v30  ;;  %v956_v52 = vrot.slane %v8727_v3, 3  ;;  %v532_v1 = vsel %vm476_vm0, %v529_v47, %v531_v59 }
  0xdd   : > { %1731 = vmatmul.mubr.f32.gmra.mrb[14].mxu0 %v1317_v43  ;;  %v8795_v38 = vpop.permute.xlu1 %679  ;;  %v1285_v18 = vsel %vm1275_vm10, %v1252_v12, %v7803_v11  ;;  %7292 = vmatprep.subr.bf16.mxu1 %v11816_v2  ;;  %v1924_v11 = vld [vmem:[%s11798_s3 + $0x58] sm:$0xff]  ;;  %v1109_v47 = vrot.slane %v8727_v3, 4  ;;  %v8864_v12 = vsel %vm573_vm4, %v532_v1, 0.0  ;;  %vm5012_vm0 = vcmask 1041409  }
  0xde   : > { %v8799_v4 = vpop.permute.xlu0 %677  ;;  %6812 = vmatprep.mubr.msk.f32.mxu0 %vm1561_vm7, %v1132_v29  ;;  %v1318_v40 = vsel %vm1308_vm11, %v1285_v18, %v1132_v29  ;;  %v1286_v29 = vsel %vm1275_vm10, %v1253_v62, %v7804_v58  ;;  %v7299_v32 = vpack.c.bf16 %v1924_v11, %v1923_v57  ;;  %v957_v43 = vsel %vm903_vm1, %v954_v39, %v956_v52  ;;  %v1926_v18 = vld [vmem:[%s11798_s3 + $0x68] sm:$0xff] }
  0xdf   : > { %863 = vrot.lane.b32.xlu1 %v802_v26, %s7932_s16  ;;  %v1106_v26 = vrot.slane %v8732_v34, 4  ;;  %v1110_v0 = vsel %vm1056_vm3, %v1107_v23, %v1109_v47  ;;  %v805_v22 = vrot.slane %v8864_v12, 2  ;;  %v653_v30 = vrot.slane %v8864_v12, 1 }
  0xe0   : > { %861 = vrot.lane.b32.xlu0 %v798_v8, %s7932_s16  ;;  %7294 = vmatpush1.bf16.msra.mxu1 %v7293_v10  ;;  %v1222_v39 = vsel %vm1209_vm8, %v8374_v21, %v8795_v38  ;;  %v1221_v58 = vsel %vm1209_vm8, %v8333_v54, %v8799_v4  ;;  %v1111_v24 = vrot.slane %v8864_v12, 4  ;;  %v958_v54 = vrot.slane %v8864_v12, 3 }
  0xe1   : > { %1737 = vmatmul.mubr.f32.gmra.mrb[16].mxu0 %v1318_v40  ;;  %v830_v31 = vpop.permute.xlu1 %829  ;;  %7295 = vmatprep.subr.bf16.mxu1 %v11816_v2  ;;  %v1108_v10 = vsel %vm1056_vm3, %v1106_v26, %v1107_v23  ;;  %v806_v59 = vsel %vm573_vm4, %v803_v33, %v805_v22  ;;  %v1929_v33 = vld [vmem:[%s11798_s3 + $0x80] sm:$0xff]  ;;  %vm5022_vm4 = vcmask 1046534  }
  0xe2   : > { %v8826_v8 = vpop.permute.xlu0 %681  ;;  %v1254_v53 = vsel %vm1242_vm9, %v1221_v58, %v830_v31  ;;  %v1930_v31 = vld [vmem:[%s11798_s3 + $0x88] sm:$0xff]  ;;  %v1112_v1 = vsel %vm1056_vm3, %v1109_v47, %v1111_v24 }
  0xe3   : > { %865 = vrot.lane.b32.xlu1 %v804_v63, %s7932_s16  ;;  %v1928_v63 = vld [vmem:[%s11798_s3 + $0x78] sm:$0xff] }
  0xe4   : > { %1165 = vrot.lane.b32.xlu0 %v1105_v25, %s7931_s15  ;;  %7297 = vmatpush1.bf16.msra.mxu1 %v7296_v48  ;;  %v654_v48 = vsel %vm598_vm2, %v651_v56, %v653_v30 }
  0xe5   : > { %v1134_v41 = vpop.permute.xlu1 %1133  ;;  %7298 = vmatprep.subr.bf16.mxu1 %v11816_v2 }
  0xe6   : > { %v832_v5 = vpop.permute.xlu0 %831  ;;  %6813 = vmatprep.mubr.msk.f32.mxu0 %vm1561_vm7, %v1134_v41  ;;  %v1319_v60 = vsel %vm1308_vm11, %v1286_v29, %v1134_v41  ;;  %v7308_v29 = vpack.c.bf16 %v1930_v31, %v1929_v33 }
  0xe7   : > { %1016 = vrot.lane.b32.xlu1 %v955_v28, %s11812_s23  ;;  %1743 = vmatmul.mubr.f32.gmra.mrb[18].mxu0 %v1319_v60  ;;  %v1255_v25 = vsel %vm1242_vm9, %v1222_v39, %v832_v5  ;;  %v1223_v5 = vsel %vm1209_vm8, %v8371_v20, %v8826_v8  ;;  %v1931_v20 = vld [vmem:[%s11798_s3 + $0x90] sm:$0xff]  ;;  %v1932_v8 = vld [vmem:[%s11798_s3 + $0x98] sm:$0xff] }
  0xe8   : > { %1014 = vrot.lane.b32.xlu0 %v951_v49, %s11812_s23  ;;  %7300 = vmatpush1.bf16.msra.mxu1 %v7299_v32  ;;  %v1925_v49 = vld [vmem:[%s11798_s3 + $0x60] sm:$0xff]  ;;  %v959_v32 = vsel %vm903_vm1, %v956_v52, %v958_v54  ;;  %v7311_v52 = vpack.c.bf16 %v1932_v8, %v1931_v20  ;;  %vm5014_vm1 = vcmask 1042434  }
  0xe9   : > { %v983_v7 = vpop.permute.xlu1 %982  ;;  %7301 = vmatprep.subr.bf16.mxu1 %v11816_v2  ;;  %v7302_v45 = vpack.c.bf16 %v1926_v18, %v1925_v49 }
  0xea   : > { %v834_v35 = vpop.permute.xlu0 %833  ;;  %v1287_v4 = vsel %vm1275_vm10, %v1254_v53, %v983_v7 }
  0xeb   : > { %1167 = vrot.lane.b32.xlu1 %v1104_v36, %s7931_s15  ;;  %v1927_v36 = vld [vmem:[%s11798_s3 + $0x70] sm:$0xff]  ;;  %v1256_v57 = vsel %vm1242_vm9, %v1223_v5, %v834_v35 }
  0xec   : > { %1018 = vrot.lane.b32.xlu0 %v957_v43, %s11812_s23  ;;  %7303 = vmatpush1.bf16.msra.mxu1 %v7302_v45  ;;  %v7305_v17 = vpack.c.bf16 %v1928_v63, %v1927_v36  ;;  %v11814_v36 = vmov 0.0  }
  0xed   : > { %v987_v6 = vpop.permute.xlu1 %986  ;;  %7304 = vmatprep.subr.bf16.mxu1 %v11816_v2 }
  0xee   : > { %v985_v40 = vpop.permute.xlu0 %984  ;;  %v1289_v23 = vsel %vm1275_vm10, %v1256_v57, %v987_v6 }
  0xef   : > { %1171 = vrot.lane.b32.xlu1 %v1110_v0, %s7931_s15  ;;  %v1288_v21 = vsel %vm1275_vm10, %v1255_v25, %v985_v40 }
  0xf0   : > { %1169 = vrot.lane.b32.xlu0 %v1108_v10, %s7931_s15  ;;  %7306 = vmatpush1.bf16.msra.mxu1 %v7305_v17  ;;  %v1933_v10 = vld [vmem:[%s11798_s3 + $0xa0] sm:$0xff] }
  0xf1   : > { %v1138_v38 = vpop.permute.xlu1 %1137  ;;  %7307 = vmatprep.subr.bf16.mxu1 %v11816_v2 }
  0xf2   : > { %v1136_v28 = vpop.permute.xlu0 %1135  ;;  %v1321_v62 = vsel %vm1308_vm11, %v1288_v21, %v1138_v38 }
  0xf3   : > { %v1320_v56 = vsel %vm1308_vm11, %v1287_v4, %v1136_v28  ;;  %v6779_v41 = vcombine.low %v1136_v28, %v1138_v38  ;;  %867 = vrot.lane.b32.xlu1 %v806_v59, %s7932_s16  ;;  %v1395_v35 = vcombine.high %v1321_v62, %v1138_v38 }
  0xf4   : > { %715 = vrot.lane.b32.xlu0 %v654_v48, %s7930_s30  ;;  %v6778_v60 = vcombine.low %v1320_v56, %v1321_v62  ;;  %7309 = vmatpush1.bf16.msra.mxu1 %v7308_v29 }
  0xf5   : > { %6814 = vmatprep.mubr.msk.f32.mxu0 %vm1561_vm7, %v6779_v41  ;;  %v684_v11 = vpop.permute.xlu1 %683  ;;  %7310 = vmatprep.subr.bf16.mxu1 %v11816_v2 }
  0xf6   : > { %v1140_v7 = vpop.permute.xlu0 %1139  ;;  %1749 = vmatmul.mubr.f32.gmra.mrb[20].mxu0 %v6778_v60  ;;  %v1224_v49 = vsel %vm1209_vm8, %v8382_v27, %v684_v11 }
  0xf7   : > { %v1322_v47 = vsel %vm1308_vm11, %v1289_v23, %v1140_v7  ;;  %1173 = vrot.lane.b32.xlu1 %v1112_v1, %s7931_s15 }
  0xf8   : > { %v1396_v43 = vcombine.low %v1322_v47, %v1140_v7  ;;  %1020 = vrot.lane.b32.xlu0 %v959_v32, %s11812_s23  ;;  %7312 = vmatpush1.bf16.msra.mxu1 %v7311_v52  ;;  %v6780_v6 = vcombine.low %v1395_v35, %v1322_v47  ;;  %v1397_v17 = vcombine.high %v1322_v47, %v1140_v7 }
  0xf9   : > { %v989_v26 = vpop.permute.xlu1 %988  ;;  %2059 = vmatprep.subr.mxu1 %v11814_v36 }
  0xfa   : > { %v836_v18 = vpop.permute.xlu0 %835  ;;  %v6781_v45 = vcombine.high %v1138_v38, %v1396_v43 }
  0xfb   : > { %v1257_v0 = vsel %vm1242_vm9, %v1224_v49, %v836_v18  ;;  %869 = vrot.lane.b32.xlu1 %v805_v22, %s7932_s16  ;;  %s7937_s16 = smov 40  }
  0xfc   : > { %717 = vrot.lane.b32.xlu0 %v653_v30, %s7930_s30  ;;  %6815 = vmatprep.mubr.msk.f32.mxu0 %vm1561_vm7, %v6781_v45  ;;  %v1290_v27 = vsel %vm1275_vm10, %v1257_v0, %v989_v26  ;;  %s7939_s30 = smov 80  }
  0xfd   : > { %1755 = vmatmul.mubr.f32.gmra.mrb[22].mxu0 %v6780_v6  ;;  %v686_v40 = vpop.permute.xlu1 %685  ;;  %2060 = vmatpush1.msra.mxu1 %v1933_v10 }
  0xfe   : > { %v1142_v63 = vpop.permute.xlu0 %1141  ;;  %v1225_v58 = vsel %vm1209_vm8, %v8414_v55, %v686_v40 }
  0xff   : > { %v1323_v22 = vsel %vm1308_vm11, %v1290_v27, %v1142_v63  ;;  %1175 = vrot.lane.b32.xlu1 %v1111_v24, %s7931_s15  ;;  %s7941_s15 = smov 64  }
 0x100   : > { %v1398_v30 = vcombine.low %v1323_v22, %v1142_v63  ;;  %1022 = vrot.lane.b32.xlu0 %v958_v54, %s11812_s23  ;;  %v6782_v21 = vcombine.low %v1397_v17, %v1323_v22  ;;  %v1399_v31 = vcombine.high %v1323_v22, %v1142_v63 }
 0x101   : > { %v991_v39 = vpop.permute.xlu1 %990 }
 0x102   : > { %v838_v25 = vpop.permute.xlu0 %837  ;;  %v6783_v59 = vcombine.high %v1140_v7, %v1398_v30 }
 0x103   : > { %v1258_v53 = vsel %vm1242_vm9, %v1225_v58, %v838_v25 }
 0x104   : > { %6816 = vmatprep.mubr.msk.f32.mxu0 %vm1561_vm7, %v6783_v59  ;;  %v1291_v48 = vsel %vm1275_vm10, %v1258_v53, %v991_v39 }
 0x105   : > { %1761 = vmatmul.mubr.f32.gmra.mrb[24].mxu0 %v6782_v21  ;;  %v7807_v38 = vpop.permute.xlu1 %7806 }
 0x106   : > { %v1144_v24 = vpop.permute.xlu0 %1143  ;;  %v7808_v54 = vunpack.i.l.bf16 %v7807_v38  ;;  %v7809_v62 = vunpack.i.h.bf16 %v7807_v38 }
 0x107   : > { %v1324_v4 = vsel %vm1308_vm11, %v1291_v48, %v1144_v24 }
 0x108   : > { %v1400_v28 = vcombine.low %v1324_v4, %v1144_v24  ;;  %v6784_v60 = vcombine.low %v1399_v31, %v1324_v4  ;;  %v1226_v1 = vsel %vm1209_vm8, %v8442_v15, %v7808_v54  ;;  %v1227_v57 = vsel %vm1209_vm8, %v8436_v13, %v7809_v62 }
 0x109   : > { %v7817_v33 = vpop.permute.xlu1 %7816 }
 0x10a   : > { %v6785_v55 = vcombine.high %v1142_v63, %v1400_v28  ;;  %v7818_v56 = vunpack.i.l.bf16 %v7817_v33  ;;  %v7812_v41 = vpop.permute.xlu0 %7811  ;;  %v7819_v11 = vunpack.i.h.bf16 %v7817_v33 }
 0x10b   : > { %v7814_v29 = vunpack.i.h.bf16 %v7812_v41  ;;  %v7813_v5 = vunpack.i.l.bf16 %v7812_v41 }
 0x10c   : > { %6817 = vmatprep.mubr.msk.f32.mxu0 %vm1561_vm7, %v6785_v55 }
 0x10d   : > { %1767 = vmatmul.mubr.f32.gmra.mrb[26].mxu0 %v6784_v60  ;;  %v1148_v32 = vpop.permute.xlu1 %1147  ;;  %v1259_v23 = vsel %vm1242_vm9, %v1226_v1, %v7813_v5  ;;  %v1260_v8 = vsel %vm1242_vm9, %v1227_v57, %v7814_v29 }
 0x10e   : > { %v1146_v7 = vpop.permute.xlu0 %1145  ;;  %v1292_v20 = vsel %vm1275_vm10, %v1259_v23, %v7818_v56  ;;  %v1293_v52 = vsel %vm1275_vm10, %v1260_v8, %v7819_v11 }
 0x10f   : > { %6818 = vmatprep.mubr.msk.f32.mxu0 %vm1561_vm7, %v1146_v7  ;;  %v1325_v47 = vsel %vm1308_vm11, %v1292_v20, %v1146_v7  ;;  %v1326_v43 = vsel %vm1308_vm11, %v1293_v52, %v1148_v32 }
 0x111   : > { %1773 = vmatmul.mubr.f32.gmra.mrb[28].mxu0 %v1325_v47  ;;  %v8967_v15 = vpop.permute.xlu1 %7826 }
 0x112   : > { %v8970_v13 = vpop.permute.xlu0 %7821  ;;  %6819 = vmatprep.mubr.msk.f32.mxu0 %vm1561_vm7, %v1148_v32  ;;  %v7828_v0 = vunpack.i.l.bf16 %v8967_v15 }
 0x113   : > { %v7823_v18 = vunpack.i.l.bf16 %v8970_v13 }
 0x115   : > { %1779 = vmatmul.mubr.f32.gmra.mrb[30].mxu0 %v1326_v43  ;;  %v696_v26 = vpop.permute.xlu1 %695  ;;  %v1228_v10 = vsel %vm1209_vm8, %v8439_v14, %v7823_v18 }
 0x116   : > { %v694_v35 = vpop.permute.xlu0 %693  ;;  %v1261_v22 = vsel %vm1242_vm9, %v1228_v10, %v7828_v0  ;;  %v1230_v21 = vsel %vm1209_vm8, %v8517_v19, %v696_v26 }
 0x117   : > { %v1229_v38 = vsel %vm1209_vm8, %v8485_v42, %v694_v35 }
 0x119   : > { %v698_v49 = vpop.permute.xlu1 %697 }
 0x11a   : > { %v8975_v45 = vpop.permute.xlu0 %7831  ;;  %v1231_v14 = vsel %vm1209_vm8, %v8514_v16, %v698_v49 }
 0x11b   : > { %v7833_v40 = vunpack.i.l.bf16 %v8975_v45 }
 0x11d   : > { %v848_v6 = vpop.permute.xlu1 %847  ;;  %v1294_v39 = vsel %vm1275_vm10, %v1261_v22, %v7833_v40  ;;  %v7824_v40 = vunpack.i.h.bf16 %v8970_v13 }
 0x11e   : > { %v846_v27 = vpop.permute.xlu0 %845  ;;  %v1263_v24 = vsel %vm1242_vm9, %v1230_v21, %v848_v6 }
 0x11f   : > { %v1262_v4 = vsel %vm1242_vm9, %v1229_v38, %v846_v27 }
 0x121   : > { %v850_v63 = vpop.permute.xlu1 %849 }
 0x122   : > { %v1150_v30 = vpop.permute.xlu0 %1149  ;;  %v1264_v48 = vsel %vm1242_vm9, %v1231_v14, %v850_v63 }
 0x123   : > { %6820 = vmatprep.mubr.msk.f32.mxu0 %vm1561_vm7, %v1150_v30  ;;  %v1327_v17 = vsel %vm1308_vm11, %v1294_v39, %v1150_v30 }
 0x124   : > { %1785 = vmatmul.mubr.f32.gmra.mrb[32].mxu0 %v1327_v17 }
 0x125   : > { %v1001_v58 = vpop.permute.xlu1 %1000 }
 0x126   : > { %v999_v25 = vpop.permute.xlu0 %998  ;;  %v1296_v62 = vsel %vm1275_vm10, %v1263_v24, %v1001_v58  ;;  %v1234_v58 = vsel %vm1209_vm8, %v8482_v51, %v7824_v40 }
 0x127   : > { %v1295_v33 = vsel %vm1275_vm10, %v1262_v4, %v999_v25  ;;  %v7834_v25 = vunpack.i.h.bf16 %v8975_v45 }
 0x129   : > { %v1152_v59 = vpop.permute.xlu1 %1151 }
 0x12a   : > { %v1003_v53 = vpop.permute.xlu0 %1002  ;;  %v1328_v19 = vsel %vm1308_vm11, %v1295_v33, %v1152_v59 }
 0x12b   : > { %v1297_v54 = vsel %vm1275_vm10, %v1264_v48, %v1003_v53 }
 0x12d   : > { %v1156_v28 = vpop.permute.xlu1 %1155 }
 0x12e   : > { %v1330_v16 = vsel %vm1308_vm11, %v1297_v54, %v1156_v28  ;;  %v1154_v31 = vpop.permute.xlu0 %1153 }
 0x12f   : > { %v1410_v55 = vcombine.low %v1330_v16, %v1156_v28  ;;  %v6787_v42 = vcombine.low %v1152_v59, %v1154_v31  ;;  %v1329_v56 = vsel %vm1308_vm11, %v1296_v62, %v1154_v31  ;;  %v1411_v26 = vcombine.high %v1330_v16, %v1156_v28 }
 0x130   : > { %v6786_v41 = vcombine.low %v1328_v19, %v1329_v56  ;;  %v1409_v29 = vcombine.high %v1329_v56, %v1154_v31 }
 0x131   : > { %6821 = vmatprep.mubr.msk.f32.mxu0 %vm1561_vm7, %v6787_v42  ;;  %v852_v5 = vpop.permute.xlu1 %851  ;;  %v6789_v60 = vcombine.high %v1154_v31, %v1410_v55 }
 0x132   : > { %v700_v1 = vpop.permute.xlu0 %699  ;;  %1791 = vmatmul.mubr.f32.gmra.mrb[34].mxu0 %v6786_v41  ;;  %v6788_v11 = vcombine.low %v1409_v29, %v1330_v16 }
 0x133   : > { %v1232_v57 = vsel %vm1209_vm8, %v8532_v44, %v700_v1  ;;  %6822 = vmatprep.mubr.msk.f32.mxu0 %vm1561_vm7, %v6789_v60 }
 0x134   : > { %v1265_v23 = vsel %vm1242_vm9, %v1232_v57, %v852_v5 }
 0x135   : > { %v1158_v32 = vpop.permute.xlu1 %1157 }
 0x136   : > { %v1005_v7 = vpop.permute.xlu0 %1004  ;;  %1797 = vmatmul.mubr.f32.gmra.mrb[36].mxu0 %v6788_v11 }
 0x137   : > { %v1298_v20 = vsel %vm1275_vm10, %v1265_v23, %v1005_v7 }
 0x138   : > { %v1331_v8 = vsel %vm1308_vm11, %v1298_v20, %v1158_v32 }
 0x139   : > { %v1412_v47 = vcombine.low %v1331_v8, %v1158_v32  ;;  %v854_v52 = vpop.permute.xlu1 %853  ;;  %v6790_v49 = vcombine.low %v1411_v26, %v1331_v8  ;;  %v1413_v39 = vcombine.high %v1331_v8, %v1158_v32 }
 0x13a   : > { %v702_v43 = vpop.permute.xlu0 %701 }
 0x13b   : > { %v1233_v35 = vsel %vm1209_vm8, %v8617_v9, %v702_v43  ;;  %v6791_v44 = vcombine.high %v1156_v28, %v1412_v47  ;;  %v7829_v9 = vunpack.i.h.bf16 %v8967_v15 }
 0x13c   : > { %v1266_v0 = vsel %vm1242_vm9, %v1233_v35, %v854_v52 }
 0x13d   : > { %6823 = vmatprep.mubr.msk.f32.mxu0 %vm1561_vm7, %v6791_v44  ;;  %v1160_v18 = vpop.permute.xlu1 %1159  ;;  %v1267_v48 = vsel %vm1242_vm9, %v1234_v58, %v7829_v9 }
 0x13e   : > { %v1007_v6 = vpop.permute.xlu0 %1006  ;;  %1803 = vmatmul.mubr.f32.gmra.mrb[38].mxu0 %v6790_v49  ;;  %v1300_v51 = vsel %vm1275_vm10, %v1267_v48, %v7834_v25 }
 0x13f   : > { %v1299_v10 = vsel %vm1275_vm10, %v1266_v0, %v1007_v6 }
 0x140   : > { %v1332_v27 = vsel %vm1308_vm11, %v1299_v10, %v1160_v18 }
 0x141   : > { %v1414_v63 = vcombine.low %v1332_v27, %v1160_v18  ;;  %v7837_v22 = vpop.permute.xlu1 %7836  ;;  %v6792_v53 = vcombine.low %v1413_v39, %v1332_v27  ;;  %v1467_v39 = vlaneseq }
 0x142   : > { %v1162_v30 = vpop.permute.xlu0 %1161  ;;  %v7838_v59 = vunpack.i.l.bf16 %v7837_v22  ;;  %v7839_v16 = vunpack.i.h.bf16 %v7837_v22 }
 0x143   : > { %v6793_v17 = vcombine.high %v1158_v32, %v1414_v63  ;;  %v1333_v45 = vsel %vm1308_vm11, %v1300_v51, %v1162_v30 }
 0x144   : > { %v1235_v15 = vsel %vm1209_vm8, %v8479_v50, %v7838_v59  ;;  %v1236_v55 = vsel %vm1209_vm8, %v8655_v37, %v7839_v16 }
 0x145   : > { %6824 = vmatprep.mubr.msk.f32.mxu0 %vm1561_vm7, %v6793_v17  ;;  %v7847_v14 = vpop.permute.xlu1 %7846 }
 0x146   : > { %v7848_v13 = vunpack.i.l.bf16 %v7847_v14  ;;  %v7842_v21 = vpop.permute.xlu0 %7841  ;;  %1809 = vmatmul.mubr.f32.gmra.mrb[40].mxu0 %v6792_v53  ;;  %v7849_v42 = vunpack.i.h.bf16 %v7847_v14  ;;  %v9057_v53 = vshrl.u32 %v1467_v39, 7 }
 0x147   : > { %v7843_v38 = vunpack.i.l.bf16 %v7842_v21  ;;  %6825 = vmatprep.mubr.msk.f32.mxu0 %vm1561_vm7, %v1162_v30  ;;  %v7844_v50 = vunpack.i.h.bf16 %v7842_v21 }
 0x148   : > { %v9062_v51 = vsub.s32 0, %v9057_v53 }
 0x149   : > { %v710_v24 = vpop.permute.xlu1 %709  ;;  %v1268_v4 = vsel %vm1242_vm9, %v1235_v15, %v7843_v38  ;;  %v1269_v41 = vsel %vm1242_vm9, %v1236_v55, %v7844_v50 }
 0x14a   : > { %v1164_v54 = vpop.permute.xlu0 %1163  ;;  %1815 = vmatmul.mubr.f32.gmra.mrb[42].mxu0 %v1333_v45  ;;  %v1301_v28 = vsel %vm1275_vm10, %v1268_v4, %v7848_v13  ;;  %v1302_v60 = vsel %vm1275_vm10, %v1269_v41, %v7849_v42  ;;  %v1237_v7 = vsel %vm1209_vm8, %v8661_v46, %v710_v24  ;;  %v1465_v45 = vld [vmem:[%s11797_s2] sm:$0x3]  ;;  %v9069_v4 = vsub.s32 1, %v9057_v53 }
 0x14b   : > { %6826 = vmatprep.mubr.msk.f32.mxu0 %vm1561_vm7, %v1164_v54  ;;  %v1334_v33 = vsel %vm1308_vm11, %v1301_v28, %v1164_v54 }
 0x14d   : > { %v714_v62 = vpop.permute.xlu1 %713 }
 0x14e   : > { %v712_v31 = vpop.permute.xlu0 %711  ;;  %1821 = vmatmul.mubr.f32.gmra.mrb[44].mxu0 %v1334_v33  ;;  %v1239_v37 = vsel %vm1209_vm8, %v8722_v61, %v714_v62  ;;  %v9075_v33 = vrot.slane %v1465_v45, %v9062_v51 }
 0x14f   : > { %v1238_v20 = vsel %vm1209_vm8, %v8732_v34, %v712_v31  ;;  %v9078_v31 = vrot.slane %v1465_v45, %v9069_v4 }
 0x151   : > { %v864_v19 = vpop.permute.xlu1 %863 }
 0x152   : > { %v862_v56 = vpop.permute.xlu0 %861  ;;  %v1271_v47 = vsel %vm1242_vm9, %v1238_v20, %v864_v19 }
 0x153   : > { %v1270_v52 = vsel %vm1242_vm9, %v1237_v7, %v862_v56 }
 0x155   : > { %v866_v29 = vpop.permute.xlu1 %865 }
 0x156   : > { %v1166_v5 = vpop.permute.xlu0 %1165  ;;  %v1272_v8 = vsel %vm1242_vm9, %v1239_v37, %v866_v29 }
 0x157   : > { %6827 = vmatprep.mubr.msk.f32.mxu0 %vm1561_vm7, %v1166_v5  ;;  %v1335_v1 = vsel %vm1308_vm11, %v1302_v60, %v1166_v5 }
 0x158   : > { %1827 = vmatmul.mubr.f32.gmra.mrb[46].mxu0 %v1335_v1 }
 0x159   : > { %v1017_v57 = vpop.permute.xlu1 %1016 }
 0x15a   : > { %v1015_v11 = vpop.permute.xlu0 %1014  ;;  %v1304_v35 = vsel %vm1275_vm10, %v1271_v47, %v1017_v57 }
 0x15b   : > { %v1303_v44 = vsel %vm1275_vm10, %v1270_v52, %v1015_v11 }
 0x15d   : > { %v1168_v32 = vpop.permute.xlu1 %1167 }
 0x15e   : > { %v1019_v23 = vpop.permute.xlu0 %1018  ;;  %v1336_v46 = vsel %vm1308_vm11, %v1303_v44, %v1168_v32 }
 0x15f   : > { %v1305_v43 = vsel %vm1275_vm10, %v1272_v8, %v1019_v23 }
 0x161   : > { %v1172_v26 = vpop.permute.xlu1 %1171 }
 0x162   : > { %v1338_v61 = vsel %vm1308_vm11, %v1305_v43, %v1172_v26  ;;  %v1170_v49 = vpop.permute.xlu0 %1169 }
 0x163   : > { %v1424_v18 = vcombine.low %v1338_v61, %v1172_v26  ;;  %v6795_v34 = vcombine.low %v1168_v32, %v1170_v49  ;;  %v1337_v0 = vsel %vm1308_vm11, %v1304_v35, %v1170_v49  ;;  %v1425_v21 = vcombine.high %v1338_v61, %v1172_v26 }
 0x164   : > { %v6794_v6 = vcombine.low %v1336_v46, %v1337_v0  ;;  %v1423_v10 = vcombine.high %v1337_v0, %v1170_v49 }
 0x165   : > { %v6797_v40 = vcombine.high %v1170_v49, %v1424_v18  ;;  %6828 = vmatprep.mubr.msk.f32.mxu0 %vm1561_vm7, %v6795_v34  ;;  %v868_v27 = vpop.permute.xlu1 %867 }
 0x166   : > { %v716_v63 = vpop.permute.xlu0 %715  ;;  %1833 = vmatmul.mubr.f32.gmra.mrb[48].mxu0 %v6794_v6  ;;  %v6796_v30 = vcombine.low %v1423_v10, %v1338_v61 }
 0x167   : > { %v1240_v22 = vsel %vm1209_vm8, %v8727_v3, %v716_v63  ;;  %6829 = vmatprep.mubr.msk.f32.mxu0 %vm1561_vm7, %v6797_v40 }
 0x168   : > { %v1273_v17 = vsel %vm1242_vm9, %v1240_v22, %v868_v27 }
 0x169   : > { %v1174_v9 = vpop.permute.xlu1 %1173 }
 0x16a   : > { %v1021_v58 = vpop.permute.xlu0 %1020  ;;  %1839 = vmatmul.mubr.f32.gmra.mrb[50].mxu0 %v6796_v30 }
 0x16b   : > { %v1306_v25 = vsel %vm1275_vm10, %v1273_v17, %v1021_v58 }
 0x16c   : > { %v1339_v59 = vsel %vm1308_vm11, %v1306_v25, %v1174_v9 }
 0x16d   : > { %v1426_v14 = vcombine.low %v1339_v59, %v1174_v9  ;;  %v870_v13 = vpop.permute.xlu1 %869  ;;  %v6798_v15 = vcombine.low %v1425_v21, %v1339_v59  ;;  %v1427_v50 = vcombine.high %v1339_v59, %v1174_v9 }
 0x16e   : > { %v718_v38 = vpop.permute.xlu0 %717 }
 0x16f   : > { %v1241_v3 = vsel %vm1209_vm8, %v8864_v12, %v718_v38  ;;  %v6799_v48 = vcombine.high %v1172_v26, %v1426_v14  ;;  %vm5203_vm8 = vcmask 523264  }
 0x170   : > { %v1274_v54 = vsel %vm1242_vm9, %v1241_v3, %v870_v13  ;;  %vm5289_vm9 = vcmask 785408  }
 0x171   : > { %6830 = vmatprep.mubr.msk.f32.mxu0 %vm1561_vm7, %v6799_v48  ;;  %v1176_v24 = vpop.permute.xlu1 %1175 }
 0x172   : > { %v1023_v28 = vpop.permute.xlu0 %1022  ;;  %1845 = vmatmul.mubr.f32.gmra.mrb[52].mxu0 %v6798_v15 }
 0x173   : > { %v1307_v12 = vsel %vm1275_vm10, %v1274_v54, %v1023_v28 }
 0x174   : > { %v1340_v62 = vsel %vm1308_vm11, %v1307_v12, %v1176_v24  ;;  %vm6521_vm11 = vcmask 982016  }
 0x175   : > { %v1428_v16 = vcombine.low %v1340_v62, %v1176_v24  ;;  %v6800_v42 = vcombine.low %v1427_v50, %v1340_v62 }
 0x177   : > { %v6801_v19 = vcombine.high %v1174_v9, %v1428_v16  ;;  %v1690_v55 = vpop.f32.mrb[0].mxu0 }
 0x178   : > { %v1691_v56 = vadd.f32 %v1690_v55, %v9075_v33  ;;  %v1692_v41 = vpop.f32.mrb[1].mxu0 }
 0x179   : > { %v1693_v29 = vadd.f32 %v1692_v41, %v9078_v31  ;;  %6831 = vmatprep.mubr.msk.f32.mxu0 %vm1561_vm7, %v6801_v19  ;;  %vm5117_vm7 = vcmask 261120  }
 0x17a   : > { %1851 = vmatmul.mubr.f32.gmra.mrb[54].mxu0 %v6800_v42  ;;  %v1857_v1 = vmax.f32 %v1691_v56, 0.0 }
 0x17b   : > { %v1858_v5 = vmax.f32 %v1693_v29, 0.0  ;;  %v1696_v60 = vpop.f32.mrb[2].mxu0 }
 0x17c   : > { %v1697_v57 = vadd.f32 %v1696_v60, %v9075_v33  ;;  %v1698_v11 = vpop.f32.mrb[3].mxu0 }
 0x17d   : > { %v1699_v32 = vadd.f32 %v1698_v11, %v9078_v31  ;;  %6832 = vmatprep.mubr.msk.f32.mxu1 %vm1934_vm12, %v1858_v5 }
 0x17e   : > { %2084 = vmatmul.mubr.f32.vlgmr.msra.gmra.mrb[0].mxu1 %v1857_v1  ;;  %v1859_v37 = vmax.f32 %v1697_v57, 0.0 }
 0x17f   : > { %v1860_v23 = vmax.f32 %v1699_v32, 0.0 }
 0x181   : > { %6833 = vmatprep.mubr.msk.f32.mxu1 %vm1934_vm12, %v1860_v23 }
 0x182   : > { %2089 = vmatmul.mubr.f32.gmra.mrb[2].mxu1 %v1859_v37 }
 0x186   : > { %v1702_v7 = vpop.f32.mrb[4].mxu0 }
 0x187   : > { %v1703_v20 = vadd.f32 %v1702_v7, %v9075_v33  ;;  %v1704_v8 = vpop.f32.mrb[5].mxu0 }
 0x188   : > { %v1705_v47 = vadd.f32 %v1704_v8, %v9078_v31 }
 0x189   : > { %v1861_v43 = vmax.f32 %v1703_v20, 0.0 }
 0x18a   : > { %v1862_v52 = vmax.f32 %v1705_v47, 0.0 }
 0x18c   : > { %6834 = vmatprep.mubr.msk.f32.mxu1 %vm1934_vm12, %v1862_v52 }
 0x18d   : > { %2094 = vmatmul.mubr.f32.gmra.mrb[4].mxu1 %v1861_v43 }
 0x195   : > { %v1708_v26 = vpop.f32.mrb[6].mxu0 }
 0x196   : > { %v1709_v35 = vadd.f32 %v1708_v26, %v9075_v33  ;;  %v1710_v44 = vpop.f32.mrb[7].mxu0 }
 0x197   : > { %v1711_v61 = vadd.f32 %v1710_v44, %v9078_v31 }
 0x198   : > { %v1863_v46 = vmax.f32 %v1709_v35, 0.0 }
 0x199   : > { %v1864_v49 = vmax.f32 %v1711_v61, 0.0 }
 0x19b   : > { %6835 = vmatprep.mubr.msk.f32.mxu1 %vm1934_vm12, %v1864_v49 }
 0x19c   : > { %v1714_v18 = vpop.f32.mrb[8].mxu0  ;;  %2099 = vmatmul.mubr.f32.gmra.mrb[6].mxu1 %v1863_v46 }
 0x19d   : > { %v1715_v34 = vadd.f32 %v1714_v18, %v9075_v33  ;;  %v1716_v0 = vpop.f32.mrb[9].mxu0 }
 0x19e   : > { %v1717_v6 = vadd.f32 %v1716_v0, %v9078_v31 }
 0x19f   : > { %v1865_v40 = vmax.f32 %v1715_v34, 0.0 }
 0x1a0   : > { %v1866_v10 = vmax.f32 %v1717_v6, 0.0 }
 0x1a2   : > { %6836 = vmatprep.mubr.msk.f32.mxu1 %vm1934_vm12, %v1866_v10 }
 0x1a3   : > { %2104 = vmatmul.mubr.f32.gmra.mrb[8].mxu1 %v1865_v40 }
 0x1a4   : > { %v1720_v27 = vpop.f32.mrb[10].mxu0 }
 0x1a5   : > { %v1721_v63 = vadd.f32 %v1720_v27, %v9075_v33  ;;  %v1722_v22 = vpop.f32.mrb[11].mxu0 }
 0x1a6   : > { %v1723_v30 = vadd.f32 %v1722_v22, %v9078_v31 }
 0x1a7   : > { %v1867_v9 = vmax.f32 %v1721_v63, 0.0 }
 0x1a8   : > { %v1868_v39 = vmax.f32 %v1723_v30, 0.0 }
 0x1aa   : > { %6837 = vmatprep.mubr.msk.f32.mxu1 %vm1934_vm12, %v1868_v39 }
 0x1ab   : > { %2109 = vmatmul.mubr.f32.gmra.mrb[10].mxu1 %v1867_v9 }
 0x1ac   : > { %v1726_v17 = vpop.f32.mrb[12].mxu0 }
 0x1ad   : > { %v1727_v58 = vadd.f32 %v1726_v17, %v9075_v33  ;;  %v1728_v25 = vpop.f32.mrb[13].mxu0 }
 0x1ae   : > { %v1729_v59 = vadd.f32 %v1728_v25, %v9078_v31 }
 0x1af   : > { %v1869_v21 = vmax.f32 %v1727_v58, 0.0 }
 0x1b0   : > { %v1870_v14 = vmax.f32 %v1729_v59, 0.0  ;;  %v1732_v13 = vpop.f32.mrb[14].mxu0 }
 0x1b1   : > { %v1733_v38 = vadd.f32 %v1732_v13, %v9075_v33  ;;  %v1734_v3 = vpop.f32.mrb[15].mxu0 }
 0x1b2   : > { %v1735_v48 = vadd.f32 %v1734_v3, %v9078_v31  ;;  %6838 = vmatprep.mubr.msk.f32.mxu1 %vm1934_vm12, %v1870_v14 }
 0x1b3   : > { %2114 = vmatmul.mubr.f32.gmra.mrb[12].mxu1 %v1869_v21  ;;  %v1871_v45 = vmax.f32 %v1733_v38, 0.0 }
 0x1b4   : > { %v1872_v15 = vmax.f32 %v1735_v48, 0.0  ;;  %v1738_v24 = vpop.f32.mrb[16].mxu0 }
 0x1b5   : > { %v1739_v54 = vadd.f32 %v1738_v24, %v9075_v33  ;;  %v1740_v28 = vpop.f32.mrb[17].mxu0 }
 0x1b6   : > { %v1741_v12 = vadd.f32 %v1740_v28, %v9078_v31  ;;  %6839 = vmatprep.mubr.msk.f32.mxu1 %vm1934_vm12, %v1872_v15 }
 0x1b7   : > { %2119 = vmatmul.mubr.f32.gmra.mrb[14].mxu1 %v1871_v45  ;;  %v1873_v16 = vmax.f32 %v1739_v54, 0.0 }
 0x1b8   : > { %v1874_v62 = vmax.f32 %v1741_v12, 0.0 }
 0x1ba   : > { %6840 = vmatprep.mubr.msk.f32.mxu1 %vm1934_vm12, %v1874_v62  ;;  %v1744_v50 = vpop.f32.mrb[18].mxu0 }
 0x1bb   : > { %v1745_v19 = vadd.f32 %v1744_v50, %v9075_v33  ;;  %2124 = vmatmul.mubr.f32.gmra.mrb[16].mxu1 %v1873_v16  ;;  %v1746_v55 = vpop.f32.mrb[19].mxu0 }
 0x1bc   : > { %v1747_v42 = vadd.f32 %v1746_v55, %v9078_v31 }
 0x1bd   : > { %v1875_v41 = vmax.f32 %v1745_v19, 0.0 }
 0x1be   : > { %v1876_v56 = vmax.f32 %v1747_v42, 0.0 }
 0x1c0   : > { %6841 = vmatprep.mubr.msk.f32.mxu1 %vm1934_vm12, %v1876_v56 }
 0x1c1   : > { %2129 = vmatmul.mubr.f32.gmra.mrb[18].mxu1 %v1875_v41 }
 0x1c9   : > { %v1750_v29 = vpop.f32.mrb[20].mxu0 }
 0x1ca   : > { %v1751_v5 = vadd.f32 %v1750_v29, %v9075_v33  ;;  %v1752_v60 = vpop.f32.mrb[21].mxu0 }
 0x1cb   : > { %v1753_v1 = vadd.f32 %v1752_v60, %v9078_v31 }
 0x1cc   : > { %v1877_v11 = vmax.f32 %v1751_v5, 0.0 }
 0x1cd   : > { %v1878_v57 = vmax.f32 %v1753_v1, 0.0 }
 0x1cf   : > { %6842 = vmatprep.mubr.msk.f32.mxu1 %vm1934_vm12, %v1878_v57 }
 0x1d0   : > { %v1756_v32 = vpop.f32.mrb[22].mxu0  ;;  %2134 = vmatmul.mubr.f32.gmra.mrb[20].mxu1 %v1877_v11 }
 0x1d1   : > { %v1757_v23 = vadd.f32 %v1756_v32, %v9075_v33  ;;  %v1758_v37 = vpop.f32.mrb[23].mxu0 }
 0x1d2   : > { %v1759_v7 = vadd.f32 %v1758_v37, %v9078_v31 }
 0x1d3   : > { %v1879_v8 = vmax.f32 %v1757_v23, 0.0 }
 0x1d4   : > { %v1880_v20 = vmax.f32 %v1759_v7, 0.0 }
 0x1d6   : > { %6843 = vmatprep.mubr.msk.f32.mxu1 %vm1934_vm12, %v1880_v20 }
 0x1d7   : > { %2139 = vmatmul.mubr.f32.gmra.mrb[22].mxu1 %v1879_v8 }
 0x1d8   : > { %v1762_v47 = vpop.f32.mrb[24].mxu0 }
 0x1d9   : > { %v1763_v52 = vadd.f32 %v1762_v47, %v9075_v33  ;;  %v1764_v43 = vpop.f32.mrb[25].mxu0 }
 0x1da   : > { %v1765_v26 = vadd.f32 %v1764_v43, %v9078_v31 }
 0x1db   : > { %v1881_v44 = vmax.f32 %v1763_v52, 0.0 }
 0x1dc   : > { %v1882_v35 = vmax.f32 %v1765_v26, 0.0 }
 0x1de   : > { %6844 = vmatprep.mubr.msk.f32.mxu1 %vm1934_vm12, %v1882_v35 }
 0x1df   : > { %2144 = vmatmul.mubr.f32.gmra.mrb[24].mxu1 %v1881_v44 }
 0x1e0   : > { %v1768_v61 = vpop.f32.mrb[26].mxu0 }
 0x1e1   : > { %v1769_v49 = vadd.f32 %v1768_v61, %v9075_v33  ;;  %v1770_v46 = vpop.f32.mrb[27].mxu0 }
 0x1e2   : > { %v1771_v18 = vadd.f32 %v1770_v46, %v9078_v31 }
 0x1e3   : > { %v1883_v6 = vmax.f32 %v1769_v49, 0.0 }
 0x1e4   : > { %v1884_v34 = vmax.f32 %v1771_v18, 0.0  ;;  %v1774_v0 = vpop.f32.mrb[28].mxu0 }
 0x1e5   : > { %v1775_v10 = vadd.f32 %v1774_v0, %v9075_v33  ;;  %v1776_v40 = vpop.f32.mrb[29].mxu0 }
 0x1e6   : > { %v1777_v27 = vadd.f32 %v1776_v40, %v9078_v31  ;;  %6845 = vmatprep.mubr.msk.f32.mxu1 %vm1934_vm12, %v1884_v34 }
 0x1e7   : > { %2149 = vmatmul.mubr.f32.gmra.mrb[26].mxu1 %v1883_v6  ;;  %v1885_v30 = vmax.f32 %v1775_v10, 0.0 }
 0x1e8   : > { %v1886_v63 = vmax.f32 %v1777_v27, 0.0  ;;  %v1780_v22 = vpop.f32.mrb[30].mxu0 }
 0x1e9   : > { %v1781_v39 = vadd.f32 %v1780_v22, %v9075_v33  ;;  %v1782_v9 = vpop.f32.mrb[31].mxu0 }
 0x1ea   : > { %v1783_v17 = vadd.f32 %v1782_v9, %v9078_v31  ;;  %6846 = vmatprep.mubr.msk.f32.mxu1 %vm1934_vm12, %v1886_v63 }
 0x1eb   : > { %2154 = vmatmul.mubr.f32.gmra.mrb[28].mxu1 %v1885_v30  ;;  %v1887_v25 = vmax.f32 %v1781_v39, 0.0 }
 0x1ec   : > { %v1888_v58 = vmax.f32 %v1783_v17, 0.0 }
 0x1ee   : > { %6847 = vmatprep.mubr.msk.f32.mxu1 %vm1934_vm12, %v1888_v58 }
 0x1ef   : > { %2159 = vmatmul.mubr.f32.gmra.mrb[30].mxu1 %v1887_v25 }
 0x1f7   : > { %v1786_v59 = vpop.f32.mrb[32].mxu0 }
 0x1f8   : > { %v1787_v14 = vadd.f32 %v1786_v59, %v9075_v33  ;;  %v1788_v13 = vpop.f32.mrb[33].mxu0 }
 0x1f9   : > { %v1789_v21 = vadd.f32 %v1788_v13, %v9078_v31 }
 0x1fa   : > { %v1889_v3 = vmax.f32 %v1787_v14, 0.0 }
 0x1fb   : > { %v1890_v38 = vmax.f32 %v1789_v21, 0.0  ;;  %v3944_v21 = vld [vmem:[%s11799_s4 + $0x8] sm:$0xff] }
 0x1fd   : > { %6848 = vmatprep.mubr.msk.f32.mxu1 %vm1934_vm12, %v1890_v38  ;;  %v3946_v38 = vld [vmem:[%s11799_s4 + $0x18] sm:$0xff] }
 0x1fe   : > { %2164 = vmatmul.mubr.f32.gmra.mrb[32].mxu1 %v1889_v3  ;;  %v3943_v3 = vld [vmem:[%s11799_s4] sm:$0xff] }
 0x205   : > { %v1792_v48 = vpop.f32.mrb[34].mxu0 }
 0x206   : > { %v1793_v15 = vadd.f32 %v1792_v48, %v9075_v33  ;;  %v1794_v24 = vpop.f32.mrb[35].mxu0  ;;  %v7313_v48 = vpack.c.bf16 %v3946_v38, %v3944_v21  ;;  %v3972_v21 = vld [vmem:[%s11799_s4 + $0xe8] sm:$0xff]  ;;  %v3974_v38 = vld [vmem:[%s11799_s4 + $0xf8] sm:$0xff] }
 0x207   : > { %v1795_v45 = vadd.f32 %v1794_v24, %v9078_v31  ;;  %v3948_v24 = vld [vmem:[%s11799_s4 + $0x28] sm:$0xff] }
 0x208   : > { %v1891_v12 = vmax.f32 %v1793_v15, 0.0  ;;  %v3945_v15 = vld [vmem:[%s11799_s4 + $0x10] sm:$0xff]  ;;  %7314 = vmatprep.subr.bf16.mxu0 %v7313_v48  ;;  %v7341_v48 = vpack.c.bf16 %v3974_v38, %v3972_v21  ;;  %v3998_v21 = vld [vmem:[%s11799_s4 + $0x1b8] sm:$0xff] }
 0x209   : > { %v1892_v54 = vmax.f32 %v1795_v45, 0.0  ;;  %v1798_v28 = vpop.f32.mrb[36].mxu0  ;;  %v3950_v45 = vld [vmem:[%s11799_s4 + $0x38] sm:$0xff] }
 0x20a   : > { %v1799_v62 = vadd.f32 %v1798_v28, %v9075_v33  ;;  %v1800_v16 = vpop.f32.mrb[37].mxu0  ;;  %v7315_v28 = vpack.c.bf16 %v3945_v15, %v3943_v3  ;;  %v3971_v15 = vld [vmem:[%s11799_s4 + $0xe0] sm:$0xff] }
 0x20b   : > { %v1801_v50 = vadd.f32 %v1800_v16, %v9078_v31  ;;  %6849 = vmatprep.mubr.msk.f32.mxu1 %vm1934_vm12, %v1892_v54  ;;  %v3949_v16 = vld [vmem:[%s11799_s4 + $0x30] sm:$0xff] }
 0x20c   : > { %2169 = vmatmul.mubr.f32.gmra.mrb[34].mxu1 %v1891_v12  ;;  %v1893_v55 = vmax.f32 %v1799_v62, 0.0  ;;  %v7317_v12 = vpack.c.bf16 %v3950_v45, %v3948_v24  ;;  %v3947_v62 = vld [vmem:[%s11799_s4 + $0x20] sm:$0xff]  ;;  %7316 = vmatpush1.bf16.msra.mxu0 %v7315_v28  ;;  %v3973_v24 = vld [vmem:[%s11799_s4 + $0xf0] sm:$0xff] }
 0x20d   : > { %v1894_v19 = vmax.f32 %v1801_v50, 0.0  ;;  %v7343_v28 = vpack.c.bf16 %v3973_v24, %v3971_v15  ;;  %v3995_v15 = vld [vmem:[%s11799_s4 + $0x1a0] sm:$0xff]  ;;  %v3997_v24 = vld [vmem:[%s11799_s4 + $0x1b0] sm:$0xff] }
 0x20e   : > { %7318 = vmatprep.subr.bf16.mxu0 %v7317_v12  ;;  %v7936_v12 = vmov 1983009808  }
 0x20f   : > { %6850 = vmatprep.mubr.msk.f32.mxu1 %vm1934_vm12, %v1894_v19 }
 0x210   : > { %2174 = vmatmul.mubr.f32.gmra.mrb[36].mxu1 %v1893_v55 }
 0x211   : > { %v1804_v42 = vpop.f32.mrb[38].mxu0 }
 0x212   : > { %v1805_v56 = vadd.f32 %v1804_v42, %v9075_v33  ;;  %v1806_v41 = vpop.f32.mrb[39].mxu0  ;;  %v7319_v42 = vpack.c.bf16 %v3949_v16, %v3947_v62  ;;  %v2337_v62 = vunpack.c.l.s4 %v7936_v12  ;;  %v3976_v16 = vld [vmem:[%s11799_s4 + $0x108] sm:$0xff] }
 0x213   : > { %v1807_v29 = vadd.f32 %v1806_v41, %v9078_v31 }
 0x214   : > { %v1895_v60 = vmax.f32 %v1805_v56, 0.0  ;;  %7320 = vmatpush1.bf16.msra.mxu0 %v7319_v42 }
 0x215   : > { %v1896_v5 = vmax.f32 %v1807_v29, 0.0  ;;  %v3952_v29 = vld [vmem:[%s11799_s4 + $0x48] sm:$0xff] }
 0x217   : > { %6851 = vmatprep.mubr.msk.f32.mxu1 %vm1934_vm12, %v1896_v5  ;;  %v3954_v5 = vld [vmem:[%s11799_s4 + $0x58] sm:$0xff] }
 0x218   : > { %2179 = vmatmul.mubr.f32.gmra.mrb[38].mxu1 %v1895_v60  ;;  %v3951_v60 = vld [vmem:[%s11799_s4 + $0x40] sm:$0xff] }
 0x219   : > { %v1810_v1 = vpop.f32.mrb[40].mxu0 }
 0x21a   : > { %v1811_v57 = vadd.f32 %v1810_v1, %v9075_v33  ;;  %v1812_v11 = vpop.f32.mrb[41].mxu0  ;;  %v7321_v1 = vpack.c.bf16 %v3954_v5, %v3952_v29  ;;  %v3982_v29 = vld [vmem:[%s11799_s4 + $0x138] sm:$0xff] }
 0x21b   : > { %v1813_v32 = vadd.f32 %v1812_v11, %v9078_v31 }
 0x21c   : > { %v1897_v7 = vmax.f32 %v1811_v57, 0.0  ;;  %v3953_v57 = vld [vmem:[%s11799_s4 + $0x50] sm:$0xff]  ;;  %7322 = vmatprep.subr.bf16.mxu0 %v7321_v1 }
 0x21d   : > { %v1898_v23 = vmax.f32 %v1813_v32, 0.0  ;;  %v1816_v37 = vpop.f32.mrb[42].mxu0  ;;  %v7323_v32 = vpack.c.bf16 %v3953_v57, %v3951_v60  ;;  %v2338_v60 = vunpack.c.0.s8 %v2337_v62 }
 0x21e   : > { %v1817_v20 = vadd.f32 %v1816_v37, %v9075_v33  ;;  %v1818_v8 = vpop.f32.mrb[43].mxu0 }
 0x21f   : > { %v1819_v47 = vadd.f32 %v1818_v8, %v9078_v31  ;;  %6852 = vmatprep.mubr.msk.f32.mxu1 %vm1934_vm12, %v1898_v23  ;;  %7324 = vmatpush1.bf16.msra.mxu0 %v7323_v32  ;;  %v3958_v8 = vld [vmem:[%s11799_s4 + $0x78] sm:$0xff]  ;;  %v3981_v32 = vld [vmem:[%s11799_s4 + $0x130] sm:$0xff] }
 0x220   : > { %2184 = vmatmul.mubr.f32.gmra.mrb[40].mxu1 %v1897_v7  ;;  %v1899_v26 = vmax.f32 %v1817_v20, 0.0  ;;  %v3956_v20 = vld [vmem:[%s11799_s4 + $0x68] sm:$0xff] }
 0x221   : > { %v1900_v52 = vmax.f32 %v1819_v47, 0.0  ;;  %v1822_v43 = vpop.f32.mrb[44].mxu0 }
 0x222   : > { %v1823_v35 = vadd.f32 %v1822_v43, %v9075_v33  ;;  %v1824_v44 = vpop.f32.mrb[45].mxu0  ;;  %v7325_v43 = vpack.c.bf16 %v3958_v8, %v3956_v20  ;;  %v3986_v20 = vld [vmem:[%s11799_s4 + $0x158] sm:$0xff]  ;;  %v3983_v8 = vld [vmem:[%s11799_s4 + $0x140] sm:$0xff] }
 0x223   : > { %v1825_v61 = vadd.f32 %v1824_v44, %v9078_v31  ;;  %6853 = vmatprep.mubr.msk.f32.mxu1 %vm1934_vm12, %v1900_v52 }
 0x224   : > { %2189 = vmatmul.mubr.f32.gmra.mrb[42].mxu1 %v1899_v26  ;;  %v1901_v46 = vmax.f32 %v1823_v35, 0.0  ;;  %7326 = vmatprep.subr.bf16.mxu0 %v7325_v43  ;;  %v3985_v43 = vld [vmem:[%s11799_s4 + $0x150] sm:$0xff] }
 0x225   : > { %v1902_v49 = vmax.f32 %v1825_v61, 0.0  ;;  %v3960_v61 = vld [vmem:[%s11799_s4 + $0x88] sm:$0xff] }
 0x227   : > { %6854 = vmatprep.mubr.msk.f32.mxu1 %vm1934_vm12, %v1902_v49  ;;  %v3962_v49 = vld [vmem:[%s11799_s4 + $0x98] sm:$0xff] }
 0x228   : > { %2194 = vmatmul.mubr.f32.gmra.mrb[44].mxu1 %v1901_v46  ;;  %v3959_v46 = vld [vmem:[%s11799_s4 + $0x80] sm:$0xff] }
 0x22b   : > { %v1828_v18 = vpop.f32.mrb[46].mxu0 }
 0x22c   : > { %v1829_v34 = vadd.f32 %v1828_v18, %v9075_v33  ;;  %v1830_v0 = vpop.f32.mrb[47].mxu0  ;;  %v7329_v18 = vpack.c.bf16 %v3962_v49, %v3960_v61  ;;  %v3990_v61 = vld [vmem:[%s11799_s4 + $0x178] sm:$0xff] }
 0x22d   : > { %v1831_v6 = vadd.f32 %v1830_v0, %v9078_v31 }
 0x22e   : > { %v1903_v40 = vmax.f32 %v1829_v34, 0.0  ;;  %v3961_v34 = vld [vmem:[%s11799_s4 + $0x90] sm:$0xff] }
 0x22f   : > { %v1904_v10 = vmax.f32 %v1831_v6, 0.0  ;;  %v7331_v6 = vpack.c.bf16 %v3961_v34, %v3959_v46  ;;  %v3989_v34 = vld [vmem:[%s11799_s4 + $0x170] sm:$0xff] }
 0x231   : > { %6855 = vmatprep.mubr.msk.f32.mxu1 %vm1934_vm12, %v1904_v10 }
 0x232   : > { %2199 = vmatmul.mubr.f32.gmra.mrb[46].mxu1 %v1903_v40  ;;  %v3964_v40 = vld [vmem:[%s11799_s4 + $0xa8] sm:$0xff] }
 0x239   : > { %v1834_v27 = vpop.f32.mrb[48].mxu0 }
 0x23a   : > { %v1835_v63 = vadd.f32 %v1834_v27, %v9075_v33  ;;  %v1836_v22 = vpop.f32.mrb[49].mxu0  ;;  %v3966_v27 = vld [vmem:[%s11799_s4 + $0xb8] sm:$0xff] }
 0x23b   : > { %v1837_v30 = vadd.f32 %v1836_v22, %v9078_v31  ;;  %v7333_v22 = vpack.c.bf16 %v3966_v27, %v3964_v40  ;;  %v3994_v40 = vld [vmem:[%s11799_s4 + $0x198] sm:$0xff]  ;;  %v3991_v27 = vld [vmem:[%s11799_s4 + $0x180] sm:$0xff] }
 0x23c   : > { %v1905_v17 = vmax.f32 %v1835_v63, 0.0  ;;  %v3963_v63 = vld [vmem:[%s11799_s4 + $0xa0] sm:$0xff] }
 0x23d   : > { %v1906_v39 = vmax.f32 %v1837_v30, 0.0  ;;  %v1840_v9 = vpop.f32.mrb[50].mxu0  ;;  %v3965_v30 = vld [vmem:[%s11799_s4 + $0xb0] sm:$0xff] }
 0x23e   : > { %v1841_v58 = vadd.f32 %v1840_v9, %v9075_v33  ;;  %v1842_v25 = vpop.f32.mrb[51].mxu0  ;;  %v3968_v9 = vld [vmem:[%s11799_s4 + $0xc8] sm:$0xff] }
 0x23f   : > { %v1843_v59 = vadd.f32 %v1842_v25, %v9078_v31  ;;  %6856 = vmatprep.mubr.msk.f32.mxu1 %vm1934_vm12, %v1906_v39  ;;  %v7335_v39 = vpack.c.bf16 %v3965_v30, %v3963_v63  ;;  %v3993_v30 = vld [vmem:[%s11799_s4 + $0x190] sm:$0xff] }
 0x240   : > { %2204 = vmatmul.mubr.f32.gmra.mrb[48].mxu1 %v1905_v17  ;;  %v1907_v13 = vmax.f32 %v1841_v58, 0.0  ;;  %v3970_v17 = vld [vmem:[%s11799_s4 + $0xd8] sm:$0xff]  ;;  %v3967_v58 = vld [vmem:[%s11799_s4 + $0xc0] sm:$0xff] }
 0x241   : > { %v1908_v14 = vmax.f32 %v1843_v59, 0.0  ;;  %v7337_v25 = vpack.c.bf16 %v3970_v17, %v3968_v9  ;;  %v3969_v59 = vld [vmem:[%s11799_s4 + $0xd0] sm:$0xff]  ;;  %v7363_v9 = vpack.c.bf16 %v3993_v30, %v3991_v27 }
 0x243   : > { %6857 = vmatprep.mubr.msk.f32.mxu1 %vm1934_vm12, %v1908_v14  ;;  %v7339_v14 = vpack.c.bf16 %v3969_v59, %v3967_v58 }
 0x244   : > { %2209 = vmatmul.mubr.f32.gmra.mrb[50].mxu1 %v1907_v13 }
 0x245   : > { %v1846_v54 = vpop.f32.mrb[52].mxu0 }
 0x246   : > { %v1847_v50 = vadd.f32 %v1846_v54, %v9075_v33  ;;  %v1848_v19 = vpop.f32.mrb[53].mxu0 }
 0x247   : > { %v1849_v55 = vadd.f32 %v1848_v19, %v9078_v31  ;;  %v3975_v19 = vld [vmem:[%s11799_s4 + $0x100] sm:$0xff] }
 0x248   : > { %v1909_v41 = vmax.f32 %v1847_v50, 0.0  ;;  %v3978_v50 = vld [vmem:[%s11799_s4 + $0x118] sm:$0xff] }
 0x249   : > { %v1910_v56 = vmax.f32 %v1849_v55, 0.0  ;;  %v7345_v42 = vpack.c.bf16 %v3978_v50, %v3976_v16 }
 0x24b   : > { %6858 = vmatprep.mubr.msk.f32.mxu1 %vm1934_vm12, %v1910_v56  ;;  %v3977_v56 = vld [vmem:[%s11799_s4 + $0x110] sm:$0xff] }
 0x24c   : > { %2214 = vmatmul.mubr.f32.gmra.mrb[52].mxu1 %v1909_v41  ;;  %v3980_v41 = vld [vmem:[%s11799_s4 + $0x128] sm:$0xff]  ;;  %v7347_v5 = vpack.c.bf16 %v3977_v56, %v3975_v19 }
 0x24d   : > { %v1852_v11 = vpop.f32.mrb[54].mxu0  ;;  %v7349_v1 = vpack.c.bf16 %v3982_v29, %v3980_v41  ;;  %v4000_v19 = vld [vmem:[%s11799_s4 + $0x1c8] sm:$0xff]  ;;  %v3999_v29 = vld [vmem:[%s11799_s4 + $0x1c0] sm:$0xff] }
 0x24e   : > { %v1853_v23 = vadd.f32 %v1852_v11, %v9075_v33  ;;  %v1854_v37 = vpop.f32.mrb[55].mxu0  ;;  %v3955_v33 = vld [vmem:[%s11799_s4 + $0x60] sm:$0xff] }
 0x24f   : > { %v1855_v7 = vadd.f32 %v1854_v37, %v9078_v31  ;;  %v3957_v31 = vld [vmem:[%s11799_s4 + $0x70] sm:$0xff]  ;;  %v3979_v11 = vld [vmem:[%s11799_s4 + $0x120] sm:$0xff]  ;;  %v9289_v37 = vsub.s32 %v2338_v60, %v9057_v53 }
 0x250   : > { %v1911_v26 = vmax.f32 %v1853_v23, 0.0  ;;  %v7327_v44 = vpack.c.bf16 %v3957_v31, %v3955_v33  ;;  %v7351_v23 = vpack.c.bf16 %v3981_v32, %v3979_v11  ;;  %v7355_v33 = vpack.c.bf16 %v3985_v43, %v3983_v8  ;;  %v4006_v43 = vld [vmem:[%s11799_s4 + $0x1f8] sm:$0xff] }
 0x251   : > { %v1912_v47 = vmax.f32 %v1855_v7, 0.0  ;;  %v2085_v52 = vpop.f32.mrb[0].mxu1  ;;  %v3984_v7 = vld [vmem:[%s11799_s4 + $0x148] sm:$0xff] }
 0x252   : > { %2224 = vst.msk [vmem:[#allocation2] sm:$0xff] %vm1275_vm10, %v2085_v52  ;;  %v2087_v35 = vpop.f32.mrb[1].mxu1  ;;  %7328 = vmatpush1.bf16.msra.mxu0 %v7327_v44  ;;  %v7353_v52 = vpack.c.bf16 %v3986_v20, %v3984_v7  ;;  %v3988_v44 = vld [vmem:[%s11799_s4 + $0x168] sm:$0xff] }
 0x253   : > { %6859 = vmatprep.mubr.msk.f32.mxu1 %vm1934_vm12, %v1912_v47  ;;  %7330 = vmatprep.subr.bf16.mxu0 %v7329_v18  ;;  %v7357_v46 = vpack.c.bf16 %v3990_v61, %v3988_v44  ;;  %v3987_v18 = vld [vmem:[%s11799_s4 + $0x160] sm:$0xff] }
 0x254   : > { %2219 = vmatmul.mubr.f32.gmra.mrb[54].mxu1 %v1911_v26 }
 0x255   : > { %v2090_v0 = vpop.f32.mrb[2].mxu1 }
 0x256   : > { %2225 = vst.msk [vmem:[#allocation2 + $0x8] sm:$0xff] %vm1275_vm10, %v2090_v0  ;;  %v2092_v10 = vpop.f32.mrb[3].mxu1  ;;  %7332 = vmatpush1.bf16.msra.mxu0 %v7331_v6  ;;  %v7359_v0 = vpack.c.bf16 %v3989_v34, %v3987_v18 }
 0x257   : > { %7334 = vmatprep.subr.bf16.mxu0 %v7333_v22  ;;  %v3992_v10 = vld [vmem:[%s11799_s4 + $0x188] sm:$0xff] }
 0x258   : > { %v7361_v22 = vpack.c.bf16 %v3994_v40, %v3992_v10 }
 0x25a   : > { %7336 = vmatpush1.bf16.msra.mxu0 %v7335_v39 }
 0x25b   : > { %7338 = vmatprep.subr.bf16.mxu0 %v7337_v25 }
 0x25d   : > { %v2252_v45 = vld [vmem:[#allocation2] ss:$2 sm:$0xff]  ;;  %v2280_v54 = vld [vmem:[#allocation2 + $0x1] ss:$2 sm:$0xff] }
 0x25e   : > { %7340 = vmatpush1.bf16.msra.mxu0 %v7339_v14  ;;  %v2307_v55 = vadd.f32 %v2280_v54, %v2252_v45 }
 0x25f   : > { %7342 = vmatprep.subr.bf16.mxu0 %v7341_v48 }
 0x260   : > { %v2095_v13 = vpop.f32.mrb[4].mxu1  ;;  %v2335_v57 = vcombine.high %v2307_v55, %v2307_v55  ;;  %v2342_v26 = vrot.slane %v2307_v55, %v9289_v37  ;;  %v4002_v55 = vld [vmem:[%s11799_s4 + $0x1d8] sm:$0xff] }
 0x261   : > { %2226 = vst.msk [vmem:[#allocation2 + $0x10] sm:$0xff] %vm1275_vm10, %v2095_v13  ;;  %v2097_v3 = vpop.f32.mrb[5].mxu1  ;;  %v3996_v13 = vld [vmem:[%s11799_s4 + $0x1a8] sm:$0xff]  ;;  %v7369_v41 = vpack.c.bf16 %v4002_v55, %v4000_v19 }
 0x262   : > { %7344 = vmatpush1.bf16.msra.mxu0 %v7343_v28  ;;  %v2349_v47 = vrot.slane %v2335_v57, %v9289_v37  ;;  %v2350_v6 = vcombine.high %v2342_v26, %v2342_v26  ;;  %v7365_v48 = vpack.c.bf16 %v3998_v21, %v3996_v13  ;;  %v7367_v28 = vpack.c.bf16 %v3997_v24, %v3995_v15 }
 0x263   : > { %7346 = vmatprep.subr.bf16.mxu0 %v7345_v42 }
 0x264   : > { %v2351_v49 = vcombine.high %v2349_v47, %v2349_v47  ;;  %v2573_v59 = vcombine.low %v2342_v26, %v2350_v6  ;;  %v2917_v38 = vcombine.low %v2350_v6, %v2349_v47  ;;  %v4005_v26 = vld [vmem:[%s11799_s4 + $0x1f0] sm:$0xff] }
 0x266   : > { %7348 = vmatpush1.bf16.msra.mxu0 %v7347_v5  ;;  %v2574_v63 = vcombine.low %v2349_v47, %v2351_v49  ;;  %v2581_v12 = vrot.slane %v2573_v59, %v9289_v37  ;;  %v2925_v42 = vrot.slane %v2917_v38, %v9289_v37  ;;  %v4001_v5 = vld [vmem:[%s11799_s4 + $0x1d0] sm:$0xff] }
 0x267   : > { %7350 = vmatprep.subr.bf16.mxu0 %v7349_v1  ;;  %v7371_v7 = vpack.c.bf16 %v4001_v5, %v3999_v29 }
 0x268   : > { %v9338_v3 = vrot.slane %v2574_v63, %v9289_v37 }
 0x26a   : > { %7352 = vmatpush1.bf16.msra.mxu0 %v7351_v23  ;;  %v9364_v56 = vcombine.low %v2581_v12, %v9338_v3 }
 0x26b   : > { %7354 = vmatprep.subr.bf16.mxu0 %v7353_v52  ;;  %v4004_v52 = vld [vmem:[%s11799_s4 + $0x1e8] sm:$0xff] }
 0x26e   : > { %7356 = vmatpush1.bf16.msra.mxu0 %v7355_v33  ;;  %v7373_v33 = vpack.c.bf16 %v4006_v43, %v4004_v52 }
 0x26f   : > { %v2100_v31 = vpop.f32.mrb[6].mxu1  ;;  %7358 = vmatprep.subr.bf16.mxu0 %v7357_v46 }
 0x270   : > { %2227 = vst.msk [vmem:[#allocation2 + $0x18] sm:$0xff] %vm1275_vm10, %v2100_v31  ;;  %v2102_v35 = vpop.f32.mrb[7].mxu1  ;;  %v4003_v31 = vld [vmem:[%s11799_s4 + $0x1e0] sm:$0xff] }
 0x271   : > { %v2845_v35 = vrot.slane %v9364_v56, 1  ;;  %v7375_v61 = vpack.c.bf16 %v4005_v26, %v4003_v31 }
 0x272   : > { %7360 = vmatpush1.bf16.msra.mxu0 %v7359_v0 }
 0x273   : > { %7362 = vmatprep.subr.bf16.mxu0 %v7361_v22 }
 0x276   : > { %v2105_v39 = vpop.f32.mrb[8].mxu1  ;;  %7364 = vmatpush1.bf16.msra.mxu0 %v7363_v9 }
 0x277   : > { %2228 = vst.msk [vmem:[#allocation2 + $0x20] sm:$0xff] %vm1275_vm10, %v2105_v39  ;;  %v2107_v17 = vpop.f32.mrb[9].mxu1  ;;  %v2254_v58 = vld [vmem:[#allocation2 + $0x10] ss:$2 sm:$0xff]  ;;  %v2282_v25 = vld [vmem:[#allocation2 + $0x11] ss:$2 sm:$0xff]  ;;  %7366 = vmatprep.subr.bf16.mxu0 %v7365_v48 }
 0x278   : > { %v2308_v14 = vadd.f32 %v2282_v25, %v2254_v58 }
 0x27a   : > { %v9347_v45 = vrot.slane %v2308_v14, %v9289_v37  ;;  %v2352_v54 = vcombine.high %v2308_v14, %v2308_v14  ;;  %7368 = vmatpush1.bf16.msra.mxu0 %v7367_v28 }
 0x27b   : > { %7370 = vmatprep.subr.bf16.mxu0 %v7369_v41 }
 0x27c   : > { %v2367_v62 = vcombine.high %v9347_v45, %v9347_v45  ;;  %v2918_v16 = vcombine.low %v2351_v49, %v9347_v45  ;;  %v9354_v50 = vrot.slane %v2352_v54, %v9289_v37 }
 0x27e   : > { %v2110_v60 = vpop.f32.mrb[10].mxu1  ;;  %v2940_v1 = vrot.slane %v2367_v62, %v9289_v37  ;;  %v2932_v57 = vrot.slane %v2918_v16, %v9289_v37  ;;  %v2781_v11 = vcombine.low %v9347_v45, %v2367_v62  ;;  %v3157_v32 = vcombine.low %v2367_v62, %v9354_v50  ;;  %7372 = vmatpush1.bf16.msra.mxu0 %v7371_v7 }
 0x27f   : > { %2229 = vst.msk [vmem:[#allocation2 + $0x28] sm:$0xff] %vm1275_vm10, %v2110_v60  ;;  %v2112_v23 = vpop.f32.mrb[11].mxu1  ;;  %7374 = vmatprep.subr.bf16.mxu0 %v7373_v33 }
 0x280   : > { %3111 = vrot.lane.b32.xlu0 %v2940_v1, %s7937_s16  ;;  %v2933_v20 = vcombine.low %v2925_v42, %v2932_v57  ;;  %v9379_v8 = vrot.slane %v2781_v11, %v9289_v37  ;;  %v3164_v47 = vrot.slane %v3157_v32, %v9289_v37  ;;  %v2368_v42 = vcombine.high %v9354_v50, %v9354_v50 }
 0x282   : > { %3109 = vrot.lane.b32.xlu1 %v2933_v20, %s7937_s16  ;;  %v2846_v44 = vrot.slane %v9379_v8, 1  ;;  %v3221_v18 = vrot.slane %v2933_v20, 1  ;;  %v3222_v34 = vrot.slane %v3164_v47, 1  ;;  %7376 = vmatpush1.bf16.msra.mxu0 %v7375_v61 }
 0x284   : > { %v2847_v46 = vsel %vm598_vm2, %v2845_v35, %v2846_v44  ;;  %v3223_v63 = vsel %vm598_vm2, %v3221_v18, %v3222_v34 }
 0x285   : > { %2869 = vrot.lane.b32.xlu0 %v2847_v46, %s11812_s23 }
 0x286   : > { %2871 = vrot.lane.b32.xlu1 %v2846_v44, %s11812_s23  ;;  %v2115_v0 = vpop.f32.mrb[12].mxu1  ;;  %v2256_v6 = vld [vmem:[#allocation2 + $0x20] ss:$2 sm:$0xff]  ;;  %v2284_v10 = vld [vmem:[#allocation2 + $0x21] ss:$2 sm:$0xff] }
 0x287   : > { %2230 = vst.msk [vmem:[#allocation2 + $0x30] sm:$0xff] %vm1275_vm10, %v2115_v0  ;;  %v2117_v40 = vpop.f32.mrb[13].mxu1  ;;  %v2309_v27 = vadd.f32 %v2284_v10, %v2256_v6 }
 0x289   : > { %3245 = vrot.lane.b32.xlu0 %v3223_v63, %s7938_s26  ;;  %v2369_v22 = vcombine.high %v2309_v27, %v2309_v27  ;;  %v2376_v30 = vrot.slane %v2309_v27, %v9289_v37 }
 0x28a   : > { %3247 = vrot.lane.b32.xlu1 %v3222_v34, %s7938_s26  ;;  %v2120_v39 = vpop.f32.mrb[14].mxu1 }
 0x28b   : > { %2231 = vst.msk [vmem:[#allocation2 + $0x38] sm:$0xff] %vm1275_vm10, %v2120_v39  ;;  %v2122_v9 = vpop.f32.mrb[15].mxu1  ;;  %v2383_v17 = vrot.slane %v2369_v22, %v9289_v37  ;;  %v2384_v58 = vcombine.high %v2376_v30, %v2376_v30  ;;  %v2597_v60 = vcombine.low %v2368_v42, %v2376_v30 }
 0x28d   : > { %v9409_v25 = vcombine.high %v2383_v17, %v2383_v17  ;;  %v2941_v59 = vcombine.low %v2376_v30, %v2384_v58  ;;  %v2598_v19 = vcombine.low %v2384_v58, %v2383_v17  ;;  %v2605_v20 = vrot.slane %v2597_v60, %v9289_v37 }
 0x28e   : > { %v2125_v14 = vpop.f32.mrb[16].mxu1 }
 0x28f   : > { %2232 = vst.msk [vmem:[#allocation2 + $0x40] sm:$0xff] %vm1275_vm10, %v2125_v14  ;;  %v2127_v13 = vpop.f32.mrb[17].mxu1  ;;  %v2942_v21 = vcombine.low %v2383_v17, %v9409_v25  ;;  %v2949_v38 = vrot.slane %v2941_v59, %v9289_v37  ;;  %v2612_v1 = vrot.slane %v2598_v19, %v9289_v37 }
 0x291   : > { %v2956_v48 = vrot.slane %v2942_v21, %v9289_v37  ;;  %v9432_v35 = vcombine.low %v2605_v20, %v2612_v1 }
 0x292   : > { %v2258_v15 = vld [vmem:[#allocation2 + $0x30] ss:$2 sm:$0xff]  ;;  %v2286_v24 = vld [vmem:[#allocation2 + $0x31] ss:$2 sm:$0xff] }
 0x293   : > { %v2957_v54 = vcombine.low %v2949_v38, %v2956_v48  ;;  %v2310_v28 = vadd.f32 %v2286_v24, %v2258_v15  ;;  %v2848_v10 = vrot.slane %v9432_v35, 1 }
 0x294   : > { %v2130_v12 = vpop.f32.mrb[18].mxu1 }
 0x295   : > { %3113 = vrot.lane.b32.xlu1 %v2957_v54, %s7937_s16  ;;  %2233 = vst.msk [vmem:[#allocation2 + $0x48] sm:$0xff] %vm1275_vm10, %v2130_v12  ;;  %v2132_v62 = vpop.f32.mrb[19].mxu1  ;;  %v2393_v16 = vrot.slane %v2310_v28, %v9289_v37  ;;  %v2386_v55 = vcombine.high %v2310_v28, %v2310_v28  ;;  %v3224_v43 = vrot.slane %v2957_v54, 1 }
 0x297   : > { %v2964_v41 = vrot.slane %v2393_v16, %v9289_v37  ;;  %v2789_v29 = vcombine.low %v9409_v25, %v2393_v16  ;;  %v9422_v5 = vcombine.high %v2393_v16, %v2393_v16  ;;  %v2400_v32 = vrot.slane %v2386_v55, %v9289_v37 }
 0x299   : > { %3115 = vrot.lane.b32.xlu1 %v2964_v41, %s7937_s16  ;;  %v2796_v57 = vrot.slane %v2789_v29, %v9289_v37  ;;  %v3165_v11 = vcombine.low %v2393_v16, %v9422_v5  ;;  %v2402_v26 = vcombine.high %v2400_v32, %v2400_v32 }
 0x29b   : > { %v3301_v23 = vcombine.low %v2612_v1, %v2796_v57  ;;  %v3172_v7 = vrot.slane %v3165_v11, %v9289_v37  ;;  %v2849_v61 = vrot.slane %v2796_v57, 1  ;;  %v2621_v6 = vcombine.low %v2400_v32, %v2402_v26 }
 0x29c   : > { %v2260_v47 = vld [vmem:[#allocation2 + $0x40] ss:$2 sm:$0xff]  ;;  %v2288_v52 = vld [vmem:[#allocation2 + $0x41] ss:$2 sm:$0xff] }
 0x29d   : > { %3361 = vrot.lane.b32.xlu0 %v3301_v23, %s7939_s30  ;;  %v3225_v33 = vrot.slane %v3172_v7, 1  ;;  %v2311_v31 = vadd.f32 %v2288_v52, %v2260_v47  ;;  %v2850_v30 = vsel %vm598_vm2, %v2848_v10, %v2849_v61  ;;  %v2629_v39 = vrot.slane %v2621_v6, %v9289_v37 }
 0x29f   : > { %v3226_v44 = vsel %vm598_vm2, %v3224_v43, %v3225_v33  ;;  %v2403_v46 = vcombine.high %v2311_v31, %v2311_v31  ;;  %v2410_v18 = vrot.slane %v2311_v31, %v9289_v37 }
 0x2a0   : > { %3249 = vrot.lane.b32.xlu1 %v3226_v44, %s7938_s26 }
 0x2a1   : > { %2875 = vrot.lane.b32.xlu0 %v2849_v61, %s11812_s23  ;;  %v9439_v34 = vrot.slane %v2403_v46, %v9289_v37  ;;  %v2418_v0 = vcombine.high %v2410_v18, %v2410_v18  ;;  %v2965_v38 = vcombine.low %v2402_v26, %v2410_v18 }
 0x2a3   : > { %v2135_v40 = vpop.f32.mrb[20].mxu1  ;;  %v2419_v27 = vcombine.high %v9439_v34, %v9439_v34  ;;  %v2622_v63 = vcombine.low %v2410_v18, %v2418_v0  ;;  %v2966_v14 = vcombine.low %v2418_v0, %v9439_v34  ;;  %v2973_v62 = vrot.slane %v2965_v38, %v9289_v37 }
 0x2a4   : > { %2234 = vst.msk [vmem:[#allocation2 + $0x50] sm:$0xff] %vm1275_vm10, %v2135_v40  ;;  %v2137_v22 = vpop.f32.mrb[21].mxu1 }
 0x2a5   : > { %2873 = vrot.lane.b32.xlu0 %v2850_v30, %s11812_s23  ;;  %v9449_v9 = vrot.slane %v2622_v63, %v9289_v37  ;;  %v2797_v17 = vcombine.low %v9439_v34, %v2419_v27  ;;  %v2988_v54 = vrot.slane %v2419_v27, %v9289_v37  ;;  %v2980_v12 = vrot.slane %v2966_v14, %v9289_v37 }
 0x2a7   : > { %v9453_v58 = vcombine.low %v2629_v39, %v9449_v9  ;;  %v9456_v59 = vrot.slane %v2797_v17, %v9289_v37  ;;  %v2981_v16 = vcombine.low %v2973_v62, %v2980_v12 }
 0x2a9   : > { %3251 = vrot.lane.b32.xlu0 %v3225_v33, %s7938_s26  ;;  %v2851_v13 = vrot.slane %v9453_v58, 1  ;;  %v2852_v21 = vrot.slane %v9456_v59, 1  ;;  %v3227_v7 = vrot.slane %v2981_v16, 1 }
 0x2aa   : > { %v2140_v15 = vpop.f32.mrb[22].mxu1 }
 0x2ab   : > { %2235 = vst.msk [vmem:[#allocation2 + $0x58] sm:$0xff] %vm1275_vm10, %v2140_v15  ;;  %v2142_v24 = vpop.f32.mrb[23].mxu1  ;;  %v2853_v28 = vsel %vm598_vm2, %v2851_v13, %v2852_v21 }
 0x2ac   : > { %2877 = vrot.lane.b32.xlu1 %v2853_v28, %s11812_s23 }
 0x2ad   : > { %3119 = vrot.lane.b32.xlu0 %v2988_v54, %s7937_s16 }
 0x2b1   : > { %3117 = vrot.lane.b32.xlu0 %v2981_v16, %s7937_s16 }
 0x2b2   : > { %v2145_v19 = vpop.f32.mrb[24].mxu1  ;;  %v2262_v55 = vld [vmem:[#allocation2 + $0x50] ss:$2 sm:$0xff]  ;;  %v2290_v42 = vld [vmem:[#allocation2 + $0x51] ss:$2 sm:$0xff] }
 0x2b3   : > { %2236 = vst.msk [vmem:[#allocation2 + $0x60] sm:$0xff] %vm1275_vm10, %v2145_v19  ;;  %v2147_v41 = vpop.f32.mrb[25].mxu1  ;;  %v2312_v29 = vadd.f32 %v2290_v42, %v2262_v55 }
 0x2b5   : > { %2879 = vrot.lane.b32.xlu0 %v2852_v21, %s11812_s23  ;;  %v9475_v60 = vrot.slane %v2312_v29, %v9289_v37  ;;  %v2420_v20 = vcombine.high %v2312_v29, %v2312_v29 }
 0x2b7   : > { %v3173_v1 = vcombine.low %v2419_v27, %v9475_v60  ;;  %v2434_v33 = vrot.slane %v2420_v20, %v9289_v37  ;;  %v2435_v0 = vcombine.high %v9475_v60, %v9475_v60 }
 0x2b9   : > { %v3180_v57 = vrot.slane %v3173_v1, %v9289_v37  ;;  %v2436_v18 = vcombine.high %v2434_v33, %v2434_v33  ;;  %v2645_v30 = vcombine.low %v2435_v0, %v2434_v33 }
 0x2ba   : > { %v2150_v11 = vpop.f32.mrb[26].mxu1 }
 0x2bb   : > { %2237 = vst.msk [vmem:[#allocation2 + $0x68] sm:$0xff] %vm1275_vm10, %v2150_v11  ;;  %v2152_v32 = vpop.f32.mrb[27].mxu1  ;;  %v3228_v23 = vrot.slane %v3180_v57, 1  ;;  %v2989_v63 = vcombine.low %v2434_v33, %v2436_v18  ;;  %v2653_v24 = vrot.slane %v2645_v30, %v9289_v37 }
 0x2bd   : > { %3255 = vrot.lane.b32.xlu0 %v3228_v23, %s7938_s26  ;;  %v3229_v47 = vsel %vm598_vm2, %v3227_v7, %v3228_v23  ;;  %v2997_v21 = vrot.slane %v2989_v63, %v9289_v37 }
 0x2be   : > { %3253 = vrot.lane.b32.xlu1 %v3229_v47, %s7938_s26  ;;  %v2155_v52 = vpop.f32.mrb[28].mxu1 }
 0x2bf   : > { %2238 = vst.msk [vmem:[#allocation2 + $0x70] sm:$0xff] %vm1275_vm10, %v2155_v52  ;;  %v2157_v43 = vpop.f32.mrb[29].mxu1 }
 0x2c2   : > { %v2160_v31 = vpop.f32.mrb[30].mxu1  ;;  %v2264_v26 = vld [vmem:[#allocation2 + $0x60] ss:$2 sm:$0xff]  ;;  %v2292_v44 = vld [vmem:[#allocation2 + $0x61] ss:$2 sm:$0xff] }
 0x2c3   : > { %2239 = vst.msk [vmem:[#allocation2 + $0x78] sm:$0xff] %vm1275_vm10, %v2160_v31  ;;  %v2162_v61 = vpop.f32.mrb[31].mxu1  ;;  %v2313_v46 = vadd.f32 %v2292_v44, %v2264_v26 }
 0x2c5   : > { %v2437_v6 = vcombine.high %v2313_v46, %v2313_v46  ;;  %v2444_v10 = vrot.slane %v2313_v46, %v9289_v37 }
 0x2c7   : > { %v2451_v40 = vrot.slane %v2437_v6, %v9289_v37  ;;  %v9490_v27 = vcombine.high %v2444_v10, %v2444_v10  ;;  %v2646_v22 = vcombine.low %v2436_v18, %v2444_v10 }
 0x2c9   : > { %v3012_v39 = vrot.slane %v2451_v40, %v9289_v37  ;;  %v2990_v17 = vcombine.low %v2444_v10, %v9490_v27  ;;  %v2805_v14 = vcombine.low %v9490_v27, %v2451_v40  ;;  %v2660_v13 = vrot.slane %v2646_v22, %v9289_v37 }
 0x2ca   : > { %v9501_v12 = vcombine.high %v2451_v40, %v2451_v40  ;;  %v2266_v57 = vld [vmem:[#allocation2 + $0x70] ss:$2 sm:$0xff]  ;;  %v2294_v11 = vld [vmem:[#allocation2 + $0x71] ss:$2 sm:$0xff] }
 0x2cb   : > { %3123 = vrot.lane.b32.xlu0 %v3012_v39, %s7937_s16  ;;  %v3004_v38 = vrot.slane %v2990_v17, %v9289_v37  ;;  %v2812_v15 = vrot.slane %v2805_v14, %v9289_v37  ;;  %v9503_v62 = vcombine.low %v2653_v24, %v2660_v13  ;;  %v2314_v23 = vadd.f32 %v2294_v11, %v2266_v57 }
 0x2cc   : > { %v3181_v55 = vcombine.low %v2451_v40, %v9501_v12 }
 0x2cd   : > { %v3005_v54 = vcombine.low %v2997_v21, %v3004_v38  ;;  %v3317_v28 = vcombine.low %v2660_v13, %v2812_v15  ;;  %v2855_v19 = vrot.slane %v2812_v15, 1  ;;  %v2854_v41 = vrot.slane %v9503_v62, 1 }
 0x2ce   : > { %v3188_v29 = vrot.slane %v3181_v55, %v9289_v37  ;;  %v2454_v20 = vcombine.high %v2314_v23, %v2314_v23  ;;  %v2461_v26 = vrot.slane %v2314_v23, %v9289_v37 }
 0x2cf   : > { %3121 = vrot.lane.b32.xlu1 %v3005_v54, %s7937_s16  ;;  %3369 = vrot.lane.b32.xlu0 %v3317_v28, %s7939_s30  ;;  %v2856_v1 = vsel %vm598_vm2, %v2854_v41, %v2855_v19  ;;  %v3230_v7 = vrot.slane %v3005_v54, 1 }
 0x2d0   : > { %v3231_v32 = vrot.slane %v3188_v29, 1  ;;  %v2468_v33 = vrot.slane %v2454_v20, %v9289_v37  ;;  %v2469_v0 = vcombine.high %v2461_v26, %v2461_v26 }
 0x2d1   : > { %v2165_v16 = vpop.f32.mrb[32].mxu1 }
 0x2d2   : > { %2240 = vst.msk [vmem:[#allocation2 + $0x80] sm:$0xff] %vm1275_vm10, %v2165_v16  ;;  %v2167_v42 = vpop.f32.mrb[33].mxu1  ;;  %v3232_v47 = vsel %vm598_vm2, %v3230_v7, %v3231_v32  ;;  %v2470_v61 = vcombine.high %v2468_v33, %v2468_v33  ;;  %v2669_v30 = vcombine.low %v2461_v26, %v2469_v0  ;;  %v3013_v14 = vcombine.low %v2469_v0, %v2468_v33 }
 0x2d3   : > { %2883 = vrot.lane.b32.xlu1 %v2855_v19, %s11812_s23 }
 0x2d4   : > { %v2670_v10 = vcombine.low %v2468_v33, %v2470_v61  ;;  %v2677_v16 = vrot.slane %v2669_v30, %v9289_v37  ;;  %v3021_v19 = vrot.slane %v3013_v14, %v9289_v37 }
 0x2d6   : > { %v9532_v38 = vrot.slane %v2670_v10, %v9289_v37 }
 0x2d7   : > { %2881 = vrot.lane.b32.xlu1 %v2856_v1, %s11812_s23 }
 0x2d8   : > { %v9545_v42 = vcombine.low %v2677_v16, %v9532_v38 }
 0x2db   : > { %3259 = vrot.lane.b32.xlu1 %v3231_v32, %s7938_s26 }
 0x2df   : > { %3257 = vrot.lane.b32.xlu1 %v3232_v47, %s7938_s26  ;;  %v2170_v52 = vpop.f32.mrb[34].mxu1 }
 0x2e0   : > { %2241 = vst.msk [vmem:[#allocation2 + $0x88] sm:$0xff] %vm1275_vm10, %v2170_v52  ;;  %v2172_v43 = vpop.f32.mrb[35].mxu1  ;;  %v2857_v52 = vrot.slane %v9545_v42, 1 }
 0x2e3   : > { %v2175_v31 = vpop.f32.mrb[36].mxu1 }
 0x2e4   : > { %2242 = vst.msk [vmem:[#allocation2 + $0x90] sm:$0xff] %vm1275_vm10, %v2175_v31  ;;  %v2177_v44 = vpop.f32.mrb[37].mxu1 }
 0x2e7   : > { %v2268_v46 = vld [vmem:[#allocation2 + $0x80] ss:$2 sm:$0xff]  ;;  %v2296_v18 = vld [vmem:[#allocation2 + $0x81] ss:$2 sm:$0xff] }
 0x2e8   : > { %v2315_v6 = vadd.f32 %v2296_v18, %v2268_v46 }
 0x2ea   : > { %v9522_v40 = vrot.slane %v2315_v6, %v9289_v37  ;;  %v2471_v63 = vcombine.high %v2315_v6, %v2315_v6 }
 0x2eb   : > { %v2180_v22 = vpop.f32.mrb[38].mxu1 }
 0x2ec   : > { %2243 = vst.msk [vmem:[#allocation2 + $0x98] sm:$0xff] %vm1275_vm10, %v2180_v22  ;;  %v2182_v39 = vpop.f32.mrb[39].mxu1  ;;  %v2486_v17 = vcombine.high %v9522_v40, %v9522_v40  ;;  %v3014_v13 = vcombine.low %v2470_v61, %v9522_v40  ;;  %v9529_v21 = vrot.slane %v2471_v63, %v9289_v37 }
 0x2ee   : > { %v3036_v15 = vrot.slane %v2486_v17, %v9289_v37  ;;  %v3028_v24 = vrot.slane %v3014_v13, %v9289_v37  ;;  %v2813_v54 = vcombine.low %v9522_v40, %v2486_v17  ;;  %v3189_v28 = vcombine.low %v2486_v17, %v9529_v21 }
 0x2ef   : > { %v2487_v13 = vcombine.high %v9529_v21, %v9529_v21 }
 0x2f0   : > { %3127 = vrot.lane.b32.xlu0 %v3036_v15, %s7937_s16  ;;  %v9542_v55 = vrot.slane %v2813_v54, %v9289_v37  ;;  %v3029_v29 = vcombine.low %v3021_v19, %v3028_v24  ;;  %v3196_v57 = vrot.slane %v3189_v28, %v9289_v37 }
 0x2f2   : > { %v9547_v41 = vpop.permute.xlu0 %3111  ;;  %v2858_v1 = vrot.slane %v9542_v55, 1  ;;  %v3234_v43 = vrot.slane %v3196_v57, 1  ;;  %v3233_v46 = vrot.slane %v3029_v29, 1 }
 0x2f3   : > { %v2185_v32 = vpop.f32.mrb[40].mxu1  ;;  %v2270_v23 = vld [vmem:[#allocation2 + $0x90] ss:$2 sm:$0xff]  ;;  %v2298_v7 = vld [vmem:[#allocation2 + $0x91] ss:$2 sm:$0xff] }
 0x2f4   : > { %2244 = vst.msk [vmem:[#allocation2 + $0xa0] sm:$0xff] %vm1275_vm10, %v2185_v32  ;;  %3125 = vrot.lane.b32.xlu0 %v3029_v29, %s7937_s16  ;;  %2887 = vrot.lane.b32.xlu1 %v2858_v1, %s11812_s23  ;;  %v2187_v20 = vpop.f32.mrb[41].mxu1  ;;  %v2316_v47 = vadd.f32 %v2298_v7, %v2270_v23  ;;  %v2859_v61 = vsel %vm598_vm2, %v2857_v52, %v2858_v1  ;;  %v3110_v18 = vpop.permute.xlu1 %3109 }
 0x2f5   : > { %v3235_v17 = vsel %vm598_vm2, %v3233_v46, %v3234_v43 }
 0x2f6   : > { %v2488_v33 = vcombine.high %v2316_v47, %v2316_v47  ;;  %v2495_v31 = vrot.slane %v2316_v47, %v9289_v37 }
 0x2f7   : > { %v2870_v26 = vpop.permute.xlu0 %2869  ;;  %v2190_v44 = vpop.f32.mrb[42].mxu1 }
 0x2f8   : > { %2245 = vst.msk [vmem:[#allocation2 + $0xa8] sm:$0xff] %vm1275_vm10, %v2190_v44  ;;  %2885 = vrot.lane.b32.xlu0 %v2859_v61, %s11812_s23  ;;  %3263 = vrot.lane.b32.xlu1 %v3234_v43, %s7938_s26  ;;  %v2192_v0 = vpop.f32.mrb[43].mxu1  ;;  %v2502_v6 = vrot.slane %v2488_v33, %v9289_v37  ;;  %v2503_v10 = vcombine.high %v2495_v31, %v2495_v31  ;;  %v9578_v1 = vpop.permute.xlu1 %2871 }
 0x2f9   : > { %v3421_v22 = vsel %vm1934_vm12, %v2870_v26, %v3110_v18  ;;  %v3405_v15 = vsel %vm1275_vm10, %v9364_v56, %v2870_v26  ;;  %v2693_v56 = vcombine.low %v2487_v13, %v2495_v31 }
 0x2fa   : > { %v9563_v63 = vcombine.high %v2502_v6, %v2502_v6  ;;  %v3037_v14 = vcombine.low %v2495_v31, %v2503_v10  ;;  %v2694_v16 = vcombine.low %v2503_v10, %v2502_v6 }
 0x2fb   : > { %v9566_v30 = vpop.permute.xlu0 %3245  ;;  %v2195_v39 = vpop.f32.mrb[44].mxu1  ;;  %v2701_v31 = vrot.slane %v2693_v56, %v9289_v37 }
 0x2fc   : > { %v3438_v24 = vsel %vm3437_vm13, %v3421_v22, %v9566_v30  ;;  %2246 = vst.msk [vmem:[#allocation2 + $0xb0] sm:$0xff] %vm1275_vm10, %v2195_v39  ;;  %3261 = vrot.lane.b32.xlu0 %v3235_v17, %s7938_s26  ;;  %v2197_v54 = vpop.f32.mrb[45].mxu1  ;;  %v3038_v28 = vcombine.low %v2502_v6, %v9563_v63  ;;  %v3045_v57 = vrot.slane %v3037_v14, %v9289_v37  ;;  %v9590_v0 = vpop.permute.xlu1 %3247 }
 0x2fd   : > { %v3519_v19 = vcombine.low %v3405_v15, %v3438_v24  ;;  %v3520_v29 = vcombine.high %v3405_v15, %v3438_v24  ;;  %v2708_v33 = vrot.slane %v2694_v16, %v9289_v37 }
 0x2fe   : > { %v3052_v32 = vrot.slane %v3038_v28, %v9289_v37 }
 0x2ff   : > { %v3529_v23 = vrot.slane %v3519_v19, %v9289_v37  ;;  %v3536_v7 = vrot.slane %v3520_v29, %v9289_v37  ;;  %v2272_v20 = vld [vmem:[#allocation2 + $0xa0] ss:$2 sm:$0xff]  ;;  %v2300_v47 = vld [vmem:[#allocation2 + $0xa1] ss:$2 sm:$0xff]  ;;  %v9594_v22 = vcombine.low %v2701_v31, %v2708_v33 }
 0x300   : > { %v3053_v52 = vcombine.low %v3045_v57, %v3052_v32  ;;  %v2317_v43 = vadd.f32 %v2300_v47, %v2272_v20 }
 0x301   : > { %v4071_v26 = vrot.slane %v3529_v23, %v9289_v37  ;;  %v4085_v44 = vrot.slane %v3536_v7, %v9289_v37  ;;  %v2860_v16 = vrot.slane %v9594_v22, 1 }
 0x302   : > { %3129 = vrot.lane.b32.xlu1 %v3053_v52, %s7937_s16  ;;  %v2512_v61 = vrot.slane %v2317_v43, %v9289_v37  ;;  %v2505_v24 = vcombine.high %v2317_v43, %v2317_v43  ;;  %v3236_v23 = vrot.slane %v3053_v52, 1 }
 0x303   : > { %v4093_v46 = vcombine.low %v4071_v26, %v4085_v44  ;;  %v4094_v18 = vcombine.high %v4071_v26, %v4085_v44 }
 0x304   : > { %v3060_v6 = vrot.slane %v2512_v61, %v9289_v37  ;;  %v2821_v10 = vcombine.low %v9563_v63, %v2512_v61  ;;  %v9596_v39 = vcombine.high %v2512_v61, %v2512_v61  ;;  %v2519_v56 = vrot.slane %v2505_v24, %v9289_v37 }
 0x305   : > { %v2200_v17 = vpop.f32.mrb[46].mxu1  ;;  %4542 = vmatprep.mubr.f32.mxu0 %v4094_v18 }
 0x306   : > { %2247 = vst.msk [vmem:[#allocation2 + $0xb8] sm:$0xff] %vm1275_vm10, %v2200_v17  ;;  %4543 = vmatmul.mubr.f32.vlgmr.msra.gmra.mrb[56].mxu0 %v4093_v46  ;;  %3131 = vrot.lane.b32.xlu1 %v3060_v6, %s7937_s16  ;;  %v2202_v14 = vpop.f32.mrb[47].mxu1  ;;  %v2828_v13 = vrot.slane %v2821_v10, %v9289_v37  ;;  %v3197_v15 = vcombine.low %v2512_v61, %v9596_v39 }
 0x307   : > { %v3114_v54 = vpop.permute.xlu1 %3113  ;;  %v2521_v26 = vcombine.high %v2519_v56, %v2519_v56  ;;  %v3422_v10 = vsel %vm1934_vm12, %v9578_v1, %v9547_v41 }
 0x308   : > { %v3333_v28 = vcombine.low %v2708_v33, %v2828_v13  ;;  %v2861_v19 = vrot.slane %v2828_v13, 1  ;;  %v3204_v29 = vrot.slane %v3197_v15, %v9289_v37  ;;  %v2596_v13 = vrot.slane %v9347_v45, %v9289_v37 }
 0x309   : > { %v2717_v6 = vcombine.low %v2519_v56, %v2521_v26  ;;  %v3439_v15 = vsel %vm3437_vm13, %v3422_v10, %v9590_v0 }
 0x30a   : > { %3377 = vrot.lane.b32.xlu0 %v3333_v28, %s7939_s30  ;;  %v2862_v57 = vsel %vm598_vm2, %v2860_v16, %v2861_v19  ;;  %v3237_v32 = vrot.slane %v3204_v29, 1  ;;  %v3406_v45 = vsel %vm1275_vm10, %v2596_v13, %v9578_v1 }
 0x30b   : > { %2889 = vrot.lane.b32.xlu1 %v2862_v57, %s11812_s23  ;;  %v9608_v47 = vpop.permute.xlu1 %3115  ;;  %v2725_v57 = vrot.slane %v2717_v6, %v9289_v37 }
 0x30c   : > { %v3238_v43 = vsel %vm598_vm2, %v3236_v23, %v3237_v32 }
 0x30d   : > { %v2274_v7 = vld [vmem:[#allocation2 + $0xb0] ss:$2 sm:$0xff]  ;;  %v2302_v20 = vld [vmem:[#allocation2 + $0xb1] ss:$2 sm:$0xff] }
 0x30e   : > { %2891 = vrot.lane.b32.xlu0 %v2861_v19, %s11812_s23  ;;  %v2318_v33 = vadd.f32 %v2302_v20, %v2274_v7 }
 0x30f   : > { %v9612_v44 = vpop.permute.xlu0 %3361  ;;  %3265 = vrot.lane.b32.xlu1 %v3238_v43, %s7938_s26 }
 0x310   : > { %v2522_v61 = vcombine.high %v2318_v33, %v2318_v33  ;;  %v2529_v31 = vrot.slane %v2318_v33, %v9289_v37  ;;  %v3555_v33 = vcombine.low %v3406_v45, %v3439_v15 }
 0x312   : > { %v3250_v46 = vpop.permute.xlu1 %3249  ;;  %3267 = vrot.lane.b32.xlu0 %v3237_v32, %s7938_s26  ;;  %v9618_v52 = vrot.slane %v2522_v61, %v9289_v37  ;;  %v2537_v18 = vcombine.high %v2529_v31, %v2529_v31  ;;  %v3061_v28 = vcombine.low %v2521_v26, %v2529_v31 }
 0x313   : > { %v9623_v17 = vpop.permute.xlu0 %2875  ;;  %v2205_v14 = vpop.f32.mrb[48].mxu1  ;;  %v9632_v16 = vsel %vm3454_vm14, %v3250_v46, %v9612_v44 }
 0x314   : > { %2248 = vst.msk [vmem:[#allocation2 + $0xc0] sm:$0xff] %vm1275_vm10, %v2205_v14  ;;  %v2207_v24 = vpop.f32.mrb[49].mxu1  ;;  %v9636_v41 = vcombine.high %v9618_v52, %v9618_v52  ;;  %v3062_v19 = vcombine.low %v2537_v18, %v9618_v52  ;;  %v2718_v29 = vcombine.low %v2529_v31, %v2537_v18  ;;  %v3574_v26 = vcombine.low %v9632_v16, %v9612_v44 }
 0x315   : > { %v3069_v6 = vrot.slane %v3061_v28, %v9289_v37 }
 0x316   : > { %v3084_v23 = vrot.slane %v9636_v41, %v9289_v37  ;;  %v3076_v7 = vrot.slane %v3062_v19, %v9289_v37  ;;  %v9646_v20 = vrot.slane %v2718_v29, %v9289_v37  ;;  %v2829_v43 = vcombine.low %v9618_v52, %v9636_v41 }
 0x317   : > { %v2874_v32 = vpop.permute.xlu0 %2873  ;;  %v2210_v56 = vpop.f32.mrb[50].mxu1  ;;  %v3563_v19 = vrot.slane %v3555_v33, %v9289_v37  ;;  %v9673_v28 = vrot.slane %v3574_v26, %v9289_v37 }
 0x318   : > { %v3407_v1 = vsel %vm1275_vm10, %v9432_v35, %v2874_v32  ;;  %v3423_v61 = vsel %vm1934_vm12, %v2874_v32, %v3114_v54  ;;  %2249 = vst.msk [vmem:[#allocation2 + $0xc8] sm:$0xff] %vm1275_vm10, %v2210_v56  ;;  %v2212_v31 = vpop.f32.mrb[51].mxu1  ;;  %3135 = vrot.lane.b32.xlu0 %v3084_v23, %s7937_s16  ;;  %v9660_v10 = vcombine.low %v2725_v57, %v9646_v20 }
 0x319   : > { %v3440_v18 = vsel %vm3437_vm13, %v3423_v61, %v3250_v46  ;;  %v9663_v14 = vrot.slane %v2829_v43, %v9289_v37  ;;  %v9665_v35 = vcombine.low %v3069_v6, %v3076_v7  ;;  %v4008_v31 = vld [vmem:[%s11799_s4 + $0x208] sm:$0xff]  ;;  %v4007_v6 = vld [vmem:[%s11799_s4 + $0x200] sm:$0xff] }
 0x31a   : > { %v3572_v13 = vcombine.low %v3407_v1, %v3440_v18  ;;  %v3573_v15 = vcombine.high %v3407_v1, %v3440_v18  ;;  %v2863_v54 = vrot.slane %v9660_v10, 1  ;;  %v4010_v18 = vld [vmem:[%s11799_s4 + $0x218] sm:$0xff] }
 0x31b   : > { %v2864_v24 = vrot.slane %v9663_v14, 1  ;;  %v9686_v61 = vpop.permute.xlu0 %3251 }
 0x31c   : > { %v3582_v29 = vrot.slane %v3572_v13, %v9289_v37  ;;  %3133 = vrot.lane.b32.xlu0 %v9665_v35, %s7937_s16  ;;  %v9680_v57 = vrot.slane %v3573_v15, %v9289_v37 }
 0x31d   : > { %v2865_v45 = vsel %vm598_vm2, %v2863_v54, %v2864_v24 }
 0x31e   : > { %v3605_v32 = vcombine.high %v3582_v29, %v9673_v28  ;;  %v6860_v56 = vcombine.low %v3563_v19, %v3582_v29  ;;  %2893 = vrot.lane.b32.xlu1 %v2865_v45, %s11812_s23  ;;  %v4009_v19 = vld [vmem:[%s11799_s4 + $0x210] sm:$0xff] }
 0x31f   : > { %v2215_v23 = vpop.f32.mrb[52].mxu1  ;;  %v2276_v7 = vld [vmem:[#allocation2 + $0xc0] ss:$2 sm:$0xff]  ;;  %v2304_v43 = vld [vmem:[#allocation2 + $0xc1] ss:$2 sm:$0xff]  ;;  %v7379_v29 = vpack.c.bf16 %v4009_v19, %v4007_v6  ;;  %v3575_v6 = vcombine.high %v9632_v16, %v9612_v44  ;;  %v4013_v19 = vld [vmem:[%s11799_s4 + $0x230] sm:$0xff] }
 0x320   : > { %2250 = vst.msk [vmem:[#allocation2 + $0xd0] sm:$0xff] %vm1275_vm10, %v2215_v23  ;;  %v2217_v33 = vpop.f32.mrb[53].mxu1  ;;  %v6862_v26 = vcombine.low %v3605_v32, %v9680_v57  ;;  %v2319_v1 = vadd.f32 %v2304_v43, %v2276_v7  ;;  %2895 = vrot.lane.b32.xlu0 %v2864_v24, %s11812_s23  ;;  %v4107_v13 = vrot.slane %v6860_v56, %v9289_v37 }
 0x321   : > { %v7377_v24 = vpack.c.bf16 %v4010_v18, %v4008_v31  ;;  %v3424_v56 = vsel %vm1934_vm12, %v9623_v17, %v9608_v47  ;;  %v2620_v43 = vrot.slane %v9409_v25, %v9289_v37  ;;  %v4012_v18 = vld [vmem:[%s11799_s4 + $0x228] sm:$0xff]  ;;  %v4014_v47 = vld [vmem:[%s11799_s4 + $0x238] sm:$0xff] }
 0x322   : > { %v4121_v15 = vrot.slane %v6862_v26, %v9289_v37  ;;  %v9701_v54 = vrot.slane %v2319_v1, %v9289_v37  ;;  %v3441_v33 = vsel %vm3437_vm13, %v3424_v56, %v9686_v61  ;;  %v9716_v26 = vpop.permute.xlu0 %3119 }
 0x323   : > { %7378 = vmatprep.subr.bf16.mxu0 %v7377_v24  ;;  %v7381_v24 = vpack.c.bf16 %v4014_v47, %v4012_v18  ;;  %v3408_v44 = vsel %vm1275_vm10, %v2620_v43, %v9623_v17  ;;  %v2878_v18 = vpop.permute.xlu1 %2877 }
 0x324   : > { %v4130_v45 = vcombine.high %v4107_v13, %v4121_v15  ;;  %v4129_v32 = vcombine.low %v4107_v13, %v4121_v15  ;;  %v3205_v23 = vcombine.low %v9636_v41, %v9701_v54  ;;  %7380 = vmatpush1.bf16.msra.mxu0 %v7379_v29  ;;  %v2539_v41 = vcombine.high %v2319_v1, %v2319_v1  ;;  %v4011_v1 = vld [vmem:[%s11799_s4 + $0x220] sm:$0xff]  ;;  %v4016_v29 = vld [vmem:[%s11799_s4 + $0x248] sm:$0xff] }
 0x325   : > { %v3239_v15 = vrot.slane %v9665_v35, 1  ;;  %v7383_v16 = vpack.c.bf16 %v4013_v19, %v4011_v1  ;;  %v4018_v35 = vld [vmem:[%s11799_s4 + $0x258] sm:$0xff]  ;;  %7382 = vmatprep.subr.bf16.mxu0 %v7381_v24 }
 0x326   : > { %4548 = vmatprep.mubr.f32.mxu0 %v4130_v45  ;;  %v3212_v7 = vrot.slane %v3205_v23, %v9289_v37  ;;  %v4015_v45 = vld [vmem:[%s11799_s4 + $0x240] sm:$0xff]  ;;  %v3608_v23 = vcombine.low %v3408_v44, %v3441_v33  ;;  %v7385_v17 = vpack.c.bf16 %v4018_v35, %v4016_v29  ;;  %v3118_v47 = vpop.permute.xlu0 %3117  ;;  %v4021_v29 = vld [vmem:[%s11799_s4 + $0x270] sm:$0xff] }
 0x327   : > { %4549 = vmatmul.mubr.f32.gmra.mrb[58].mxu0 %v4129_v32  ;;  %v2220_v31 = vpop.f32.mrb[54].mxu1  ;;  %v4017_v32 = vld [vmem:[%s11799_s4 + $0x250] sm:$0xff]  ;;  %v3425_v44 = vsel %vm1934_vm12, %v2878_v18, %v3118_v47 }
 0x328   : > { %2251 = vst.msk [vmem:[#allocation2 + $0xd8] sm:$0xff] %vm1275_vm10, %v2220_v31  ;;  %v2222_v25 = vpop.f32.mrb[55].mxu1  ;;  %v3240_v13 = vrot.slane %v3212_v7, 1  ;;  %v2553_v7 = vrot.slane %v2539_v41, %v9289_v37  ;;  %7384 = vmatpush1.bf16.msra.mxu0 %v7383_v16  ;;  %v7387_v43 = vpack.c.bf16 %v4017_v32, %v4015_v45  ;;  %v9753_v31 = vrot.slane %v3575_v6, %v9289_v37  ;;  %v4022_v41 = vld [vmem:[%s11799_s4 + $0x278] sm:$0xff]  ;;  %v4019_v6 = vld [vmem:[%s11799_s4 + $0x260] sm:$0xff] }
 0x329   : > { %7386 = vmatprep.subr.bf16.mxu0 %v7385_v17  ;;  %v9758_v25 = vrot.slane %v3608_v23, %v9289_v37  ;;  %v7391_v45 = vpack.c.bf16 %v4021_v29, %v4019_v6  ;;  %v9777_v32 = vsel %vm1275_vm10, %v9453_v58, %v2878_v18  ;;  %v4024_v58 = vld [vmem:[%s11799_s4 + $0x288] sm:$0xff]  ;;  %v4026_v18 = vld [vmem:[%s11799_s4 + $0x298] sm:$0xff] }
 0x32a   : > { %3271 = vrot.lane.b32.xlu0 %v3240_v13, %s7938_s26  ;;  %v3241_v56 = vsel %vm598_vm2, %v3239_v15, %v3240_v13  ;;  %v3607_v33 = vcombine.high %v9680_v57, %v9753_v31  ;;  %v4020_v13 = vld [vmem:[%s11799_s4 + $0x268] sm:$0xff]  ;;  %v2555_v1 = vcombine.high %v2553_v7, %v2553_v7 }
 0x32b   : > { %3269 = vrot.lane.b32.xlu1 %v3241_v56, %s7938_s26  ;;  %v7389_v19 = vpack.c.bf16 %v4022_v41, %v4020_v13  ;;  %v2554_v56 = vcombine.high %v9701_v54, %v9701_v54 }
 0x32c   : > { %7388 = vmatpush1.bf16.msra.mxu0 %v7387_v43  ;;  %v6864_v17 = vcombine.low %v3607_v33, %v9758_v25  ;;  %v3085_v41 = vcombine.low %v2553_v7, %v2555_v1  ;;  %v4023_v33 = vld [vmem:[%s11799_s4 + $0x280] sm:$0xff] }
 0x32d   : > { %7390 = vmatprep.subr.bf16.mxu0 %v7389_v19  ;;  %v4025_v19 = vld [vmem:[%s11799_s4 + $0x290] sm:$0xff] }
 0x32e   : > { %v4143_v36 = vrot.slane %v6864_v17, %v9289_v37  ;;  %v3093_v48 = vrot.slane %v3085_v41, %v9289_v37  ;;  %v4028_v17 = vld [vmem:[%s11799_s4 + $0x2a8] sm:$0xff] }
 0x32f   : > { %v2278_v15 = vld [vmem:[#allocation2 + $0xd0] ss:$2 sm:$0xff]  ;;  %v2306_v24 = vld [vmem:[#allocation2 + $0xd1] ss:$2 sm:$0xff] }
 0x330   : > { %v9773_v16 = vpop.permute.xlu1 %3253  ;;  %v2320_v35 = vadd.f32 %v2306_v24, %v2278_v15  ;;  %7392 = vmatpush1.bf16.msra.mxu0 %v7391_v45  ;;  %v7395_v45 = vpack.c.bf16 %v4025_v19, %v4023_v33 }
 0x331   : > { %v9781_v23 = vsel %vm3437_vm13, %v3425_v44, %v9773_v16  ;;  %v2741_v44 = vcombine.low %v2554_v56, %v2553_v7 }
 0x332   : > { %v3625_v43 = vcombine.low %v9777_v32, %v9781_v23  ;;  %v2563_v47 = vrot.slane %v2320_v35, %v9289_v37  ;;  %v2556_v13 = vcombine.high %v2320_v35, %v2320_v35  ;;  %v7393_v35 = vpack.c.bf16 %v4026_v18, %v4024_v58 }
 0x333   : > { %v2749_v41 = vrot.slane %v2741_v44, %v9289_v37  ;;  %v4031_v44 = vld [vmem:[%s11799_s4 + $0x2c0] sm:$0xff] }
 0x334   : > { %v3635_v6 = vrot.slane %v3625_v43, %v9289_v37  ;;  %v9799_v15 = vcombine.high %v2563_v47, %v2563_v47  ;;  %v2570_v24 = vrot.slane %v2556_v13, %v9289_v37  ;;  %v2742_v29 = vcombine.low %v2555_v1, %v2563_v47  ;;  %7394 = vmatprep.subr.bf16.mxu0 %v7393_v35  ;;  %v4033_v35 = vld [vmem:[%s11799_s4 + $0x2d0] sm:$0xff] }
 0x335   : > { %7396 = vmatpush1.bf16.msra.mxu0 %v7395_v45 }
 0x336   : > { %v4157_v2 = vrot.slane %v3635_v6, %v9289_v37  ;;  %v3086_v46 = vcombine.low %v2563_v47, %v9799_v15  ;;  %v2837_v43 = vcombine.low %v9799_v15, %v2570_v24  ;;  %v2756_v13 = vrot.slane %v2742_v29, %v9289_v37  ;;  %v4030_v47 = vld [vmem:[%s11799_s4 + $0x2b8] sm:$0xff]  ;;  %v4032_v29 = vld [vmem:[%s11799_s4 + $0x2c8] sm:$0xff] }
 0x337   : > { %v9811_v11 = vcombine.high %v2570_v24, %v2570_v24  ;;  %v7397_v58 = vpack.c.bf16 %v4030_v47, %v4028_v17  ;;  %v3108_v45 = vrot.slane %v2570_v24, %v9289_v37  ;;  %v4036_v17 = vld [vmem:[%s11799_s4 + $0x2e8] sm:$0xff]  ;;  %v4038_v47 = vld [vmem:[%s11799_s4 + $0x2f8] sm:$0xff] }
 0x338   : > { %v4166_v49 = vcombine.high %v4143_v36, %v4157_v2  ;;  %v4165_v1 = vcombine.low %v4143_v36, %v4157_v2  ;;  %v3100_v7 = vrot.slane %v3086_v46, %v9289_v37  ;;  %v2844_v56 = vrot.slane %v2837_v43, %v9289_v37  ;;  %v4027_v2 = vld [vmem:[%s11799_s4 + $0x2a0] sm:$0xff]  ;;  %v4029_v36 = vld [vmem:[%s11799_s4 + $0x2b0] sm:$0xff] }
 0x339   : > { %v7399_v33 = vpack.c.bf16 %v4029_v36, %v4027_v2  ;;  %v9828_v6 = vcombine.low %v2749_v41, %v2756_v13  ;;  %v3213_v19 = vcombine.low %v2570_v24, %v9811_v11  ;;  %7398 = vmatprep.subr.bf16.mxu0 %v7397_v58  ;;  %v4035_v41 = vld [vmem:[%s11799_s4 + $0x2e0] sm:$0xff]  ;;  %v4037_v58 = vld [vmem:[%s11799_s4 + $0x2f0] sm:$0xff]  ;;  %v2880_v36 = vpop.permute.xlu0 %2879 }
 0x33a   : > { %4554 = vmatprep.mubr.f32.mxu0 %v4166_v49  ;;  %v3101_v46 = vcombine.low %v3093_v48, %v3100_v7  ;;  %v3349_v18 = vcombine.low %v2756_v13, %v2844_v56  ;;  %v4034_v49 = vld [vmem:[%s11799_s4 + $0x2d8] sm:$0xff]  ;;  %v2867_v43 = vrot.slane %v2844_v56, 1  ;;  %v7403_v13 = vpack.c.bf16 %v4033_v35, %v4031_v44  ;;  %v4039_v35 = vld [vmem:[%s11799_s4 + $0x300] sm:$0xff] }
 0x33b   : > { %4555 = vmatmul.mubr.f32.gmra.mrb[60].mxu0 %v4165_v1  ;;  %v7401_v48 = vpack.c.bf16 %v4034_v49, %v4032_v29  ;;  %v2866_v1 = vrot.slane %v9828_v6, 1  ;;  %v3220_v7 = vrot.slane %v3213_v19, %v9289_v37  ;;  %v7405_v56 = vpack.c.bf16 %v4038_v47, %v4036_v17  ;;  %v4040_v49 = vld [vmem:[%s11799_s4 + $0x308] sm:$0xff]  ;;  %v4043_v47 = vld [vmem:[%s11799_s4 + $0x320] sm:$0xff] }
 0x33c   : > { %3137 = vrot.lane.b32.xlu1 %v3101_v46, %s7937_s16  ;;  %3385 = vrot.lane.b32.xlu0 %v3349_v18, %s7939_s30  ;;  %v7407_v2 = vpack.c.bf16 %v4037_v58, %v4035_v41  ;;  %v11831_v29 = vcombine.low %v9338_v3, %v9379_v8  ;;  %v4041_v3 = vld [vmem:[%s11799_s4 + $0x310] sm:$0xff]  ;;  %v3308_v8 = vrot.slane %v9422_v5, %v9289_v37 }
 0x33d   : > { %7400 = vmatpush1.bf16.msra.mxu0 %v7399_v33  ;;  %v2868_v18 = vsel %vm598_vm2, %v2866_v1, %v2867_v43  ;;  %v3242_v33 = vrot.slane %v3101_v46, 1  ;;  %v3243_v19 = vrot.slane %v3220_v7, 1  ;;  %v4044_v1 = vld [vmem:[%s11799_s4 + $0x328] sm:$0xff]  ;;  %v4046_v7 = vld [vmem:[%s11799_s4 + $0x338] sm:$0xff]  ;;  %v3316_v41 = vrot.slane %v9475_v60, %v9289_v37 }
 0x33e   : > { %7402 = vmatprep.subr.bf16.mxu0 %v7401_v48  ;;  %v4042_v48 = vld [vmem:[%s11799_s4 + $0x318] sm:$0xff]  ;;  %v7413_v5 = vpack.c.bf16 %v4046_v7, %v4044_v1 }
 0x33f   : > { %v7409_v46 = vpack.c.bf16 %v4042_v48, %v4040_v49  ;;  %v3300_v48 = vrot.slane %v9354_v50, %v9289_v37  ;;  %v11832_v50 = vcombine.low %v9532_v38, %v9542_v55 }
 0x340   : > { %3139 = vrot.lane.b32.xlu0 %v3108_v45, %s7937_s16  ;;  %2899 = vrot.lane.b32.xlu1 %v2867_v43, %s11830_s29  ;;  %v7411_v45 = vpack.c.bf16 %v4041_v3, %v4039_v35  ;;  %v9882_v43 = vpop.permute.xlu0 %3255  ;;  %v3626_v3 = vcombine.high %v9777_v32, %v9781_v23  ;;  %v3340_v32 = vrot.slane %v9596_v39, %v9289_v37  ;;  %s404_s16 = sand.u32 1, %s7919_s22  }
 0x341   : > { %v3122_v24 = vpop.permute.xlu1 %3121  ;;  %7404 = vmatpush1.bf16.msra.mxu0 %v7403_v13  ;;  %v3244_v13 = vsel %vm598_vm2, %v3242_v33, %v3243_v19  ;;  %v2644_v33 = vrot.slane %v9439_v34, %v9289_v37  ;;  %v4048_v34 = vld [vmem:[%s11799_s4 + $0x348] sm:$0xf]  ;;  %vm5016_vm2 = vcmask 1043459  }
 0x342   : > { %7406 = vmatprep.subr.bf16.mxu0 %v7405_v56  ;;  %v4045_v56 = vld [vmem:[%s11799_s4 + $0x330] sm:$0xff]  ;;  %v3642_v39 = vrot.slane %v3626_v3, %v9289_v37 }
 0x343   : > { %v7415_v58 = vpack.c.bf16 %v4045_v56, %v4043_v47 }
 0x344   : > { %3357 = vrot.lane.b32.xlu0 %v11831_v29, %s7939_s30  ;;  %2897 = vrot.lane.b32.xlu1 %v2868_v18, %s11830_s29  ;;  %v3426_v18 = vsel %vm1934_vm12, %v2880_v36, %v9716_v26  ;;  %v3410_v26 = vsel %vm1275_vm10, %v2644_v33, %v2880_v36  ;;  %s6691_s29 = scalar_lea.sflag [#allocation4], %s404_s16 }
 0x345   : > { %v2884_v44 = vpop.permute.xlu1 %2883  ;;  %7408 = vmatpush1.bf16.msra.mxu0 %v7407_v2  ;;  %v3124_v2 = vpop.permute.xlu0 %3123  ;;  %v3443_v29 = vsel %vm3437_vm13, %v3426_v18, %v9882_v43  ;;  %v3324_v18 = vrot.slane %v9501_v12, %v9289_v37 }
 0x346   : > { %7410 = vmatprep.subr.bf16.mxu0 %v7409_v46  ;;  %v3428_v60 = vsel %vm1934_vm12, %v2884_v44, %v3124_v2  ;;  %v2668_v46 = vrot.slane %v9490_v27, %v9289_v37  ;;  %v3661_v35 = vcombine.low %v3410_v26, %v3443_v29  ;;  %v4047_v27 = vld [vmem:[%s11799_s4 + $0x340] sm:$0xf]  ;;  %v3348_v2 = vrot.slane %v9701_v54, %v9289_v37 }
 0x347   : > { %v3332_v26 = vrot.slane %v9529_v21, %v9289_v37 }
 0x348   : > { %3363 = vrot.lane.b32.xlu0 %v3308_v8, %s7939_s30  ;;  %3273 = vrot.lane.b32.xlu1 %v3244_v13, %s7938_s26  ;;  %v3412_v8 = vsel %vm1275_vm10, %v2668_v46, %v2884_v44  ;;  %v3669_v47 = vrot.slane %v3661_v35, %v9289_v37 }
 0x349   : > { %v2882_v17 = vpop.permute.xlu1 %2881  ;;  %7412 = vmatpush1.bf16.msra.mxu0 %v7411_v45  ;;  %v3370_v36 = vpop.permute.xlu0 %3369 }
 0x34a   : > { %7414 = vmatprep.subr.bf16.mxu0 %v7413_v5  ;;  %v3427_v45 = vsel %vm1934_vm12, %v2882_v17, %v3122_v24  ;;  %v3411_v38 = vsel %vm1275_vm10, %v9503_v62, %v2882_v17  ;;  %v11833_v62 = vcombine.low %v9449_v9, %v9456_v59 }
 0x34c   : > { %3367 = vrot.lane.b32.xlu0 %v3316_v41, %s7939_s30  ;;  %3275 = vrot.lane.b32.xlu1 %v3243_v19, %s7938_s26  ;;  %s7942_s26 = smov 96  }
 0x34d   : > { %v9909_v49 = vpop.permute.xlu1 %3259  ;;  %7416 = vmatpush1.bf16.msra.mxu0 %v7415_v58 }
 0x34e   : > { %v3445_v19 = vsel %vm3437_vm13, %v3428_v60, %v9909_v49  ;;  %6884 = vmatprep.subr.msk.mxu0 %vm1056_vm3, %v4048_v34  ;;  %v4179_v60 = vrot.slane %v3642_v39, %v9289_v37 }
 0x34f   : > { %v3714_v55 = vcombine.low %v3412_v8, %v3445_v19 }
 0x350   : > { %3373 = vrot.lane.b32.xlu0 %v11832_v50, %s7939_s30  ;;  %3359 = vrot.lane.b32.xlu1 %v3300_v48, %s7939_s30  ;;  %v11834_v50 = vcombine.low %v9646_v20, %v9663_v14 }
 0x351   : > { %v3258_v13 = vpop.permute.xlu1 %3257  ;;  %6885 = vmatpush1.msk.msra.mxu0 %vm1056_vm3, %v4047_v27  ;;  %v9964_v9 = vrot.slane %v3714_v55, %v9289_v37  ;;  %vm5018_vm3 = vcmask 1044484  }
 0x352   : > { %v3444_v23 = vsel %vm3437_vm13, %v3427_v45, %v3258_v13  ;;  %v3461_v1 = vsel %vm3454_vm14, %v3258_v13, %v3370_v36 }
 0x353   : > { %v3678_v7 = vcombine.low %v3411_v38, %v3444_v23  ;;  %v3679_v44 = vcombine.high %v3411_v38, %v3444_v23  ;;  %v3680_v5 = vcombine.low %v3461_v1, %v3370_v36  ;;  %v3681_v24 = vcombine.high %v3461_v1, %v3370_v36 }
 0x354   : > { %3379 = vrot.lane.b32.xlu0 %v3340_v32, %s7939_s30  ;;  %3365 = vrot.lane.b32.xlu1 %v11833_v62, %s7939_s30  ;;  %v3356_v36 = vrot.slane %v9811_v11, %v9289_v37 }
 0x355   : > { %v3688_v17 = vrot.slane %v3678_v7, %v9289_v37  ;;  %v9951_v56 = vrot.slane %v3679_v44, %v9289_v37  ;;  %v9954_v41 = vrot.slane %v3680_v5, %v9289_v37  ;;  %v9957_v58 = vrot.slane %v3681_v24, %v9289_v37 }
 0x357   : > { %v3711_v59 = vcombine.high %v3688_v17, %v9954_v41  ;;  %v3713_v33 = vcombine.high %v9951_v56, %v9957_v58  ;;  %v6866_v29 = vcombine.low %v3669_v47, %v3688_v17 }
 0x358   : > { %3383 = vrot.lane.b32.xlu0 %v3348_v2, %s7939_s30  ;;  %3371 = vrot.lane.b32.xlu1 %v3324_v18, %s7939_s30  ;;  %v2692_v2 = vrot.slane %v9522_v40, %v9289_v37 }
 0x359   : > { %v4193_v54 = vrot.slane %v6866_v29, %v9289_v37  ;;  %v6868_v48 = vcombine.low %v3711_v59, %v9951_v56  ;;  %v6870_v12 = vcombine.low %v3713_v33, %v9964_v9 }
 0x35b   : > { %v4202_v46 = vcombine.high %v4179_v60, %v4193_v54  ;;  %v4201_v19 = vcombine.low %v4179_v60, %v4193_v54  ;;  %v4215_v34 = vrot.slane %v6868_v48, %v9289_v37  ;;  %v4229_v35 = vrot.slane %v6870_v12, %v9289_v37 }
 0x35c   : > { %3375 = vrot.lane.b32.xlu1 %v3332_v26, %s7939_s30 }
 0x35d   : > { %4560 = vmatprep.mubr.f32.mxu0 %v4202_v46  ;;  %v4238_v3 = vcombine.high %v4215_v34, %v4229_v35  ;;  %v4237_v27 = vcombine.low %v4215_v34, %v4229_v35 }
 0x35e   : > { %4561 = vmatmul.mubr.f32.gmra.mrb[62].mxu0 %v4201_v19 }
 0x35f   : > { %4566 = vmatprep.mubr.f32.mxu0 %v4238_v3 }
 0x360   : > { %3381 = vrot.lane.b32.xlu1 %v11834_v50, %s7939_s30 }
 0x362   : > { %4567 = vmatmul.mubr.f32.gmra.mrb[64].mxu0 %v4237_v27  ;;  %v3128_v21 = vpop.permute.xlu0 %3127 }
 0x364   : > { %3387 = vrot.lane.b32.xlu1 %v3356_v36, %s7939_s30 }
 0x366   : > { %v3126_v8 = vpop.permute.xlu0 %3125  ;;  %v2888_v45 = vpop.permute.xlu1 %2887 }
 0x367   : > { %v3430_v62 = vsel %vm1934_vm12, %v2888_v45, %v3128_v21  ;;  %v3414_v59 = vsel %vm1275_vm10, %v2692_v2, %v2888_v45 }
 0x36a   : > { %v2886_v13 = vpop.permute.xlu0 %2885  ;;  %v9994_v14 = vpop.permute.xlu1 %3263 }
 0x36b   : > { %v3429_v32 = vsel %vm1934_vm12, %v2886_v13, %v3126_v8  ;;  %v3413_v55 = vsel %vm1275_vm10, %v9545_v42, %v2886_v13  ;;  %v3447_v18 = vsel %vm3437_vm13, %v3430_v62, %v9994_v14 }
 0x36c   : > { %v3767_v33 = vcombine.low %v3414_v59, %v3447_v18 }
 0x36e   : > { %v9988_v38 = vpop.permute.xlu0 %3261  ;;  %v3775_v34 = vrot.slane %v3767_v33, %v9289_v37 }
 0x36f   : > { %v3446_v20 = vsel %vm3437_vm13, %v3429_v32, %v9988_v38 }
 0x370   : > { %v3731_v23 = vcombine.low %v3413_v55, %v3446_v20  ;;  %v3732_v1 = vcombine.high %v3413_v55, %v3446_v20 }
 0x372   : > { %v3741_v11 = vrot.slane %v3731_v23, %v9289_v37  ;;  %v3748_v7 = vrot.slane %v3732_v1, %v9289_v37  ;;  %v2716_v1 = vrot.slane %v9563_v63, %v9289_v37 }
 0x374   : > { %v3130_v44 = vpop.permute.xlu1 %3129  ;;  %v4251_v5 = vrot.slane %v3741_v11, %v9289_v37  ;;  %v4265_v24 = vrot.slane %v3748_v7, %v9289_v37 }
 0x376   : > { %v4274_v47 = vcombine.high %v4251_v5, %v4265_v24  ;;  %v4273_v39 = vcombine.low %v4251_v5, %v4265_v24 }
 0x378   : > { %4572 = vmatprep.mubr.f32.mxu0 %v4274_v47  ;;  %v3132_v42 = vpop.permute.xlu1 %3131 }
 0x379   : > { %4573 = vmatmul.mubr.f32.gmra.mrb[66].mxu0 %v4273_v39 }
 0x37c   : > { %v3378_v29 = vpop.permute.xlu0 %3377 }
 0x37d   : > { %v2890_v17 = vpop.permute.xlu1 %2889 }
 0x37e   : > { %v3431_v60 = vsel %vm1934_vm12, %v2890_v17, %v3130_v44  ;;  %v3415_v48 = vsel %vm1275_vm10, %v9594_v22, %v2890_v17 }
 0x380   : > { %v2892_v36 = vpop.permute.xlu0 %2891 }
 0x381   : > { %v3266_v54 = vpop.permute.xlu1 %3265  ;;  %v3432_v20 = vsel %vm1934_vm12, %v2892_v36, %v3132_v42  ;;  %v3416_v44 = vsel %vm1275_vm10, %v2716_v1, %v2892_v36 }
 0x382   : > { %v3448_v12 = vsel %vm3437_vm13, %v3431_v60, %v3266_v54  ;;  %v3465_v26 = vsel %vm3454_vm14, %v3266_v54, %v3378_v29 }
 0x383   : > { %v3784_v46 = vcombine.low %v3415_v48, %v3448_v12  ;;  %v3785_v19 = vcombine.high %v3415_v48, %v3448_v12  ;;  %v3786_v40 = vcombine.low %v3465_v26, %v3378_v29  ;;  %v3787_v23 = vcombine.high %v3465_v26, %v3378_v29 }
 0x384   : > { %v10023_v55 = vpop.permute.xlu0 %3267 }
 0x385   : > { %v3794_v35 = vrot.slane %v3784_v46, %v9289_v37  ;;  %v10014_v3 = vrot.slane %v3786_v40, %v9289_v37  ;;  %v10017_v50 = vrot.slane %v3785_v19, %v9289_v37  ;;  %v3449_v11 = vsel %vm3437_vm13, %v3432_v20, %v10023_v55 }
 0x386   : > { %v10032_v5 = vrot.slane %v3787_v23, %v9289_v37  ;;  %v3820_v24 = vcombine.low %v3416_v44, %v3449_v11 }
 0x387   : > { %v3817_v27 = vcombine.high %v3794_v35, %v10014_v3  ;;  %v6872_v22 = vcombine.low %v3775_v34, %v3794_v35 }
 0x388   : > { %v3819_v62 = vcombine.high %v10017_v50, %v10032_v5  ;;  %v10037_v42 = vrot.slane %v3820_v24, %v9289_v37  ;;  %v2764_v24 = vrot.slane %v9799_v15, %v9289_v37 }
 0x389   : > { %v6874_v21 = vcombine.low %v3817_v27, %v10017_v50  ;;  %v4287_v8 = vrot.slane %v6872_v22, %v9289_v37  ;;  %v2740_v27 = vrot.slane %v9618_v52, %v9289_v37 }
 0x38a   : > { %v3136_v7 = vpop.permute.xlu0 %3135  ;;  %v6876_v59 = vcombine.low %v3819_v62, %v10037_v42 }
 0x38b   : > { %v4301_v45 = vrot.slane %v6874_v21, %v9289_v37 }
 0x38c   : > { %v4323_v60 = vrot.slane %v6876_v59, %v9289_v37 }
 0x38d   : > { %v4310_v13 = vcombine.high %v4287_v8, %v4301_v45  ;;  %v4309_v32 = vcombine.low %v4287_v8, %v4301_v45 }
 0x38e   : > { %v3134_v39 = vpop.permute.xlu0 %3133 }
 0x38f   : > { %4578 = vmatprep.mubr.f32.mxu0 %v4310_v13 }
 0x390   : > { %4579 = vmatmul.mubr.f32.gmra.mrb[68].mxu0 %v4309_v32  ;;  %v2894_v47 = vpop.permute.xlu1 %2893 }
 0x391   : > { %v3433_v63 = vsel %vm1934_vm12, %v2894_v47, %v3134_v39  ;;  %v3417_v2 = vsel %vm1275_vm10, %v9660_v10, %v2894_v47 }
 0x392   : > { %v2896_v26 = vpop.permute.xlu0 %2895 }
 0x393   : > { %v3434_v35 = vsel %vm1934_vm12, %v2896_v26, %v3136_v7  ;;  %v3418_v8 = vsel %vm1275_vm10, %v2740_v27, %v2896_v26 }
 0x39c   : > { %v10050_v46 = vpop.permute.xlu0 %3271 }
 0x39d   : > { %v10040_v17 = vpop.permute.xlu1 %3269  ;;  %v3451_v22 = vsel %vm3437_vm13, %v3434_v35, %v10050_v46 }
 0x39e   : > { %v3450_v18 = vsel %vm3437_vm13, %v3433_v63, %v10040_v17  ;;  %v3873_v45 = vcombine.low %v3418_v8, %v3451_v22 }
 0x39f   : > { %v3837_v33 = vcombine.low %v3417_v2, %v3450_v18  ;;  %v3838_v13 = vcombine.high %v3417_v2, %v3450_v18 }
 0x3a0   : > { %v3881_v44 = vrot.slane %v3873_v45, %v9289_v37 }
 0x3a1   : > { %v3847_v29 = vrot.slane %v3837_v33, %v9289_v37 }
 0x3a3   : > { %v4337_v54 = vrot.slane %v3847_v29, %v9289_v37 }
 0x3a5   : > { %v4346_v48 = vcombine.high %v4323_v60, %v4337_v54  ;;  %v4345_v12 = vcombine.low %v4323_v60, %v4337_v54 }
 0x3a7   : > { %4584 = vmatprep.mubr.f32.mxu0 %v4346_v48 }
 0x3a8   : > { %4585 = vmatmul.mubr.f32.gmra.mrb[70].mxu0 %v4345_v12 }
 0x3ae   : > { %v3138_v10 = vpop.permute.xlu1 %3137  ;;  %v3386_v19 = vpop.permute.xlu0 %3385 }
 0x3b2   : > { %v3140_v40 = vpop.permute.xlu0 %3139  ;;  %v2900_v34 = vpop.permute.xlu1 %2899 }
 0x3b3   : > { %v3436_v60 = vsel %vm1934_vm12, %v2900_v34, %v3140_v40  ;;  %v3420_v48 = vsel %vm1275_vm10, %v2764_v24, %v2900_v34 }
 0x3b6   : > { %v3358_v21 = vpop.permute.xlu0 %3357  ;;  %v2898_v36 = vpop.permute.xlu1 %2897 }
 0x3b7   : > { %v3435_v32 = vsel %vm1934_vm12, %v2898_v36, %v3138_v10  ;;  %v3455_v1 = vsel %vm3454_vm14, %v9566_v30, %v3358_v21  ;;  %v3419_v11 = vsel %vm1275_vm10, %v9828_v6, %v2898_v36  ;;  %v3854_v30 = vrot.slane %v3838_v13, %v9289_v37 }
 0x3b8   : > { %v3521_v18 = vcombine.low %v3455_v1, %v3358_v21  ;;  %v3522_v6 = vcombine.high %v3455_v1, %v3358_v21  ;;  %vm7943_vm10 = vmmov 0  }
 0x3b9   : > { %v4359_v13 = vrot.slane %v3854_v30, %v9289_v37 }
 0x3ba   : > { %v3364_v20 = vpop.permute.xlu0 %3363  ;;  %v3274_v23 = vpop.permute.xlu1 %3273  ;;  %v3543_v40 = vrot.slane %v3521_v18, %v9289_v37  ;;  %v3550_v27 = vrot.slane %v3522_v6, %v9289_v37 }
 0x3bb   : > { %v3452_v52 = vsel %vm3437_vm13, %v3435_v32, %v3274_v23  ;;  %v3469_v7 = vsel %vm3454_vm14, %v3274_v23, %v3386_v19  ;;  %v3458_v39 = vsel %vm3454_vm14, %v9686_v61, %v3364_v20  ;;  %v3606_v32 = vcombine.low %v9680_v57, %v9753_v31 }
 0x3bc   : > { %v3890_v47 = vcombine.low %v3419_v11, %v3452_v52  ;;  %v3891_v62 = vcombine.high %v3419_v11, %v3452_v52  ;;  %v3892_v63 = vcombine.low %v3469_v7, %v3386_v19  ;;  %v3893_v2 = vcombine.high %v3469_v7, %v3386_v19 }
 0x3bd   : > { %v3609_v12 = vcombine.low %v3458_v39, %v3364_v20  ;;  %v4092_v24 = vrot.slane %v3550_v27, %v9289_v37  ;;  %v6863_v18 = vcombine.high %v9673_v28, %v3606_v32 }
 0x3be   : > { %v3900_v59 = vrot.slane %v3890_v47, %v9289_v37  ;;  %v3368_v33 = vpop.permute.xlu0 %3367  ;;  %v10072_v29 = vpop.permute.xlu1 %3275  ;;  %v10076_v15 = vrot.slane %v3891_v62, %v9289_v37  ;;  %v10079_v54 = vrot.slane %v3892_v63, %v9289_v37  ;;  %v10082_v61 = vrot.slane %v3893_v2, %v9289_v37 }
 0x3bf   : > { %v3453_v10 = vsel %vm3437_vm13, %v3436_v60, %v10072_v29  ;;  %v3623_v20 = vrot.slane %v3609_v12, %v9289_v37 }
 0x3c0   : > { %v6878_v26 = vcombine.low %v3881_v44, %v3900_v59  ;;  %v3923_v19 = vcombine.high %v3900_v59, %v10079_v54  ;;  %v3926_v35 = vcombine.low %v3420_v48, %v3453_v10  ;;  %v3925_v34 = vcombine.high %v10076_v15, %v10082_v61 }
 0x3c1   : > { %v4078_v44 = vrot.slane %v3543_v40, %v9289_v37  ;;  %v3624_v6 = vcombine.low %v9758_v25, %v3623_v20 }
 0x3c2   : > { %v10090_v22 = vpop.permute.xlu0 %3373  ;;  %v3360_v21 = vpop.permute.xlu1 %3359  ;;  %v4373_v36 = vrot.slane %v6878_v26, %v9289_v37  ;;  %v10096_v8 = vrot.slane %v3926_v35, %v9289_v37  ;;  %v6880_v7 = vcombine.low %v3923_v19, %v10076_v15 }
 0x3c3   : > { %v3456_v45 = vsel %vm3454_vm14, %v9590_v0, %v3360_v21  ;;  %v3460_v0 = vsel %vm3454_vm14, %v9882_v43, %v3368_v33  ;;  %v4096_v25 = vcombine.high %v4078_v44, %v4092_v24 }
 0x3c4   : > { %v3556_v23 = vcombine.low %v3456_v45, %v3360_v21  ;;  %v6882_v1 = vcombine.low %v3925_v34, %v10096_v8  ;;  %v4382_v11 = vcombine.high %v4359_v13, %v4373_v36  ;;  %v4381_v52 = vcombine.low %v4359_v13, %v4373_v36 }
 0x3c5   : > { %v4395_v2 = vrot.slane %v6880_v7, %v9289_v37  ;;  %v3662_v60 = vcombine.low %v3460_v0, %v3368_v33  ;;  %v6865_v33 = vcombine.high %v9753_v31, %v3624_v6  ;;  %v4128_v21 = vrot.slane %v6863_v18, %v9289_v37 }
 0x3c6   : > { %v3570_v47 = vrot.slane %v3556_v23, %v9289_v37  ;;  %v3380_v39 = vpop.permute.xlu0 %3379  ;;  %v3366_v57 = vpop.permute.xlu1 %3365  ;;  %4590 = vmatprep.mubr.f32.mxu0 %v4382_v11  ;;  %v4409_v30 = vrot.slane %v6882_v1, %v9289_v37  ;;  %v4095_v36 = vcombine.low %v4078_v44, %v4092_v24  ;;  %v3463_v34 = vsel %vm3454_vm14, %v9988_v38, %v10090_v22 }
 0x3c7   : > { %v3466_v62 = vsel %vm3454_vm14, %v10023_v55, %v3380_v39  ;;  %v3459_v63 = vsel %vm3454_vm14, %v9773_v16, %v3366_v57  ;;  %4591 = vmatmul.mubr.f32.gmra.mrb[72].mxu0 %v4381_v52  ;;  %v3676_v27 = vrot.slane %v3662_v60, %v9289_v37  ;;  %v3712_v11 = vcombine.low %v9951_v56, %v9957_v58 }
 0x3c8   : > { %v6861_v43 = vcombine.low %v3570_v47, %v9673_v28  ;;  %v3821_v59 = vcombine.low %v3466_v62, %v3380_v39  ;;  %v3627_v48 = vcombine.low %v3459_v63, %v3366_v57  ;;  %v4418_v12 = vcombine.high %v4395_v2, %v4409_v30 }
 0x3c9   : > { %v4417_v55 = vcombine.low %v4395_v2, %v4409_v30  ;;  %v3628_v26 = vcombine.high %v3459_v63, %v3366_v57  ;;  %v6867_v38 = vcombine.low %v3676_v27, %v9954_v41  ;;  %v3733_v52 = vcombine.low %v3463_v34, %v10090_v22 }
 0x3ca   : > { %v3372_v10 = vpop.permute.xlu1 %3371  ;;  %v4114_v16 = vrot.slane %v6861_v43, %v9289_v37  ;;  %v3649_v19 = vrot.slane %v3627_v48, %v9289_v37  ;;  %4596 = vmatprep.mubr.f32.mxu0 %v4418_v12  ;;  %v3835_v28 = vrot.slane %v3821_v59, %v9289_v37  ;;  %v4150_v7 = vrot.slane %v6865_v33, %v9289_v37 }
 0x3cb   : > { %v3462_v35 = vsel %vm3454_vm14, %v9909_v49, %v3372_v10  ;;  %4597 = vmatmul.mubr.f32.gmra.mrb[74].mxu0 %v4417_v55  ;;  %v3656_v49 = vrot.slane %v3628_v26, %v9289_v37  ;;  %v3734_v44 = vcombine.high %v3463_v34, %v10090_v22  ;;  %v6869_v62 = vcombine.high %v9954_v41, %v3712_v11 }
 0x3cc   : > { %v3715_v40 = vcombine.low %v3462_v35, %v3372_v10  ;;  %6886 = vmatprep.mubr.msk.f32.mxu0 %vm4451_vm15, %v4096_v25  ;;  %v4164_v32 = vrot.slane %v3649_v19, %v9289_v37  ;;  %v4132_v20 = vcombine.high %v4114_v16, %v4128_v21  ;;  %v3836_v31 = vcombine.low %v10037_v42, %v3835_v28 }
 0x3cd   : > { %v4186_v42 = vrot.slane %v3656_v49, %v9289_v37  ;;  %v4131_v24 = vcombine.low %v4114_v16, %v4128_v21  ;;  %v4200_v63 = vrot.slane %v6867_v38, %v9289_v37  ;;  %v3755_v22 = vrot.slane %v3733_v52, %v9289_v37 }
 0x3ce   : > { %v3729_v45 = vrot.slane %v3715_v40, %v9289_v37  ;;  %v3376_v13 = vpop.permute.xlu1 %3375  ;;  %v4168_v47 = vcombine.high %v4150_v7, %v4164_v32  ;;  %v6877_v39 = vcombine.high %v10032_v5, %v3836_v31  ;;  %v4167_v30 = vcombine.low %v4150_v7, %v4164_v32 }
 0x3cf   : > { %v3464_v1 = vsel %vm3454_vm14, %v9994_v14, %v3376_v13  ;;  %4668 = vmatmul.mubr.f32.vlgmr.msra.gmra.mrb[56].mxu0 %v4095_v36  ;;  %v3762_v18 = vrot.slane %v3734_v44, %v9289_v37  ;;  %v4204_v43 = vcombine.high %v4186_v42, %v4200_v63  ;;  %v3818_v12 = vcombine.low %v10017_v50, %v10032_v5 }
 0x3d0   : > { %v3730_v23 = vcombine.low %v9964_v9, %v3729_v45  ;;  %6887 = vmatprep.mubr.msk.f32.mxu0 %vm4451_vm15, %v4132_v20  ;;  %v3768_v0 = vcombine.low %v3464_v1, %v3376_v13  ;;  %v4330_v48 = vrot.slane %v6877_v39, %v9289_v37  ;;  %v4258_v55 = vrot.slane %v3755_v22, %v9289_v37  ;;  %v5818_v39 = vld [vmem:[%s11801_s6 + $0x98] sm:$0xff] }
 0x3d1   : > { %v4222_v26 = vrot.slane %v6869_v62, %v9289_v37  ;;  %v4203_v16 = vcombine.low %v4186_v42, %v4200_v63  ;;  %v6875_v50 = vcombine.high %v10014_v3, %v3818_v12  ;;  %v3924_v20 = vcombine.low %v10076_v15, %v10082_v61  ;;  %v5802_v63 = vld [vmem:[%s11801_s6 + $0x18] sm:$0xff]  ;;  %v5823_v12 = vld [vmem:[%s11801_s6 + $0xc0] sm:$0xff] }
 0x3d2   : > { %v3382_v9 = vpop.permute.xlu1 %3381  ;;  %v6871_v14 = vcombine.high %v9957_v58, %v3730_v23  ;;  %v3782_v6 = vrot.slane %v3768_v0, %v9289_v37  ;;  %v5800_v0 = vld [vmem:[%s11801_s6 + $0x8] sm:$0xff] }
 0x3d3   : > { %v3467_v56 = vsel %vm3454_vm14, %v10040_v17, %v3382_v9  ;;  %4674 = vmatmul.mubr.f32.gmra.mrb[58].mxu0 %v4131_v24  ;;  %v3384_v17 = vpop.permute.xlu0 %3383  ;;  %v4308_v49 = vrot.slane %v6875_v50, %v9289_v37  ;;  %v6881_v38 = vcombine.high %v10079_v54, %v3924_v20  ;;  %v5896_v50 = vld [vmem:[%s11801_s6 + $0x308] sm:$0xff]  ;;  %v5898_v20 = vld [vmem:[%s11801_s6 + $0x318] sm:$0xff] }
 0x3d4   : > { %v3839_v57 = vcombine.low %v3467_v56, %v3382_v9  ;;  %6888 = vmatprep.mubr.msk.f32.mxu0 %vm4451_vm15, %v4168_v47  ;;  %v4236_v59 = vrot.slane %v6871_v14, %v9289_v37  ;;  %v3468_v10 = vsel %vm3454_vm14, %v10050_v46, %v3384_v17  ;;  %v6873_v25 = vcombine.low %v3782_v6, %v10014_v3  ;;  %v5799_v14 = vld [vmem:[%s11801_s6] sm:$0xff]  ;;  %v5817_v47 = vld [vmem:[%s11801_s6 + $0x90] sm:$0xff] }
 0x3d5   : > { %v3874_v5 = vcombine.low %v3468_v10, %v3384_v17  ;;  %v3840_v21 = vcombine.high %v3467_v56, %v3382_v9  ;;  %v4402_v15 = vrot.slane %v6881_v38, %v9289_v37  ;;  %v5816_v9 = vld [vmem:[%s11801_s6 + $0x88] sm:$0xff]  ;;  %v7419_v56 = vpack.c.bf16 %v5800_v0, %v5799_v14  ;;  %v5821_v6 = vld [vmem:[%s11801_s6 + $0xb0] sm:$0xff]  ;;  %v5811_v38 = vld [vmem:[%s11801_s6 + $0x60] sm:$0xff] }
 0x3d6   : > { %v3861_v2 = vrot.slane %v3839_v57, %v9289_v37  ;;  %v3388_v58 = vpop.permute.xlu1 %3387  ;;  %v4240_v40 = vcombine.high %v4222_v26, %v4236_v59  ;;  %v4239_v33 = vcombine.low %v4222_v26, %v4236_v59  ;;  %v4294_v27 = vrot.slane %v6873_v25, %v9289_v37  ;;  %v5801_v57 = vld [vmem:[%s11801_s6 + $0x10] sm:$0xff]  ;;  %v5804_v17 = vld [vmem:[%s11801_s6 + $0x28] sm:$0xff]  ;;  %v5911_v25 = vld [vmem:[%s11801_s6 + $0x380] sm:$0xff] }
 0x3d7   : > { %v3470_v60 = vsel %vm3454_vm14, %v10072_v29, %v3388_v58  ;;  %4680 = vmatmul.mubr.f32.gmra.mrb[60].mxu0 %v4167_v30  ;;  %v4272_v29 = vrot.slane %v3762_v18, %v9289_v37  ;;  %v3888_v34 = vrot.slane %v3874_v5, %v9289_v37  ;;  %v3868_v3 = vrot.slane %v3840_v21, %v9289_v37  ;;  %v5803_v30 = vld [vmem:[%s11801_s6 + $0x20] sm:$0xff] }
 0x3d8   : > { %v4344_v41 = vrot.slane %v3861_v2, %v9289_v37  ;;  %6889 = vmatprep.mubr.msk.f32.mxu0 %vm4451_vm15, %v4204_v43  ;;  %v3927_v28 = vcombine.low %v3470_v60, %v3388_v58  ;;  %v4312_v32 = vcombine.high %v4294_v27, %v4308_v49  ;;  %v4311_v23 = vcombine.low %v4294_v27, %v4308_v49  ;;  %v5819_v2 = vld [vmem:[%s11801_s6 + $0xa0] sm:$0xff]  ;;  %v5820_v58 = vld [vmem:[%s11801_s6 + $0xa8] sm:$0xff]  ;;  %v5822_v43 = vld [vmem:[%s11801_s6 + $0xb8] sm:$0xff] }
 0x3d9   : > { %v4276_v36 = vcombine.high %v4258_v55, %v4272_v29  ;;  %v4275_v45 = vcombine.low %v4258_v55, %v4272_v29  ;;  %v6879_v31 = vcombine.low %v3888_v34, %v10079_v54  ;;  %v4366_v1 = vrot.slane %v3868_v3, %v9289_v37  ;;  %v5815_v54 = vld [vmem:[%s11801_s6 + $0x80] sm:$0xff]  ;;  %v5805_v60 = vld [vmem:[%s11801_s6 + $0x30] sm:$0xff]  ;;  %v5824_v55 = vld [vmem:[%s11801_s6 + $0xc8] sm:$0xff] }
 0x3da   : > { %v4348_v19 = vcombine.high %v4330_v48, %v4344_v41  ;;  %v4347_v35 = vcombine.low %v4330_v48, %v4344_v41  ;;  %v3941_v46 = vrot.slane %v3927_v28, %v9289_v37  ;;  %v7417_v24 = vpack.c.bf16 %v5816_v9, %v5815_v54  ;;  %v5806_v48 = vld [vmem:[%s11801_s6 + $0x38] sm:$0xff]  ;;  %v5912_v28 = vld [vmem:[%s11801_s6 + $0x388] sm:$0xff]  ;;  %v5827_v21 = vld [vmem:[%s11801_s6 + $0xe0] sm:$0xff] }
 0x3db   : > { %4686 = vmatmul.mubr.f32.gmra.mrb[62].mxu0 %v4203_v16  ;;  %v4380_v52 = vrot.slane %v6879_v31, %v9289_v37  ;;  %v7421_v62 = vpack.c.bf16 %v5818_v39, %v5817_v47  ;;  %v7423_v22 = vpack.c.bf16 %v5802_v63, %v5801_v57  ;;  %v7425_v18 = vpack.c.bf16 %v5820_v58, %v5819_v2  ;;  %v5807_v16 = vld [vmem:[%s11801_s6 + $0x40] sm:$0xff]  ;;  %v5826_v29 = vld [vmem:[%s11801_s6 + $0xd8] sm:$0xff]  ;;  %v5828_v49 = vld [vmem:[%s11801_s6 + $0xe8] sm:$0xff] }
 0x3dc   : > { %6890 = vmatprep.mubr.msk.f32.mxu0 %vm4451_vm15, %v4240_v40  ;;  %v3942_v13 = vcombine.low %v10096_v8, %v3941_v46  ;;  %7418 = vmatprep.subr.bf16.mxu1 %v7417_v24  ;;  %v7427_v59 = vpack.c.bf16 %v5804_v17, %v5803_v30  ;;  %v7429_v41 = vpack.c.bf16 %v5822_v43, %v5821_v6  ;;  %v5895_v40 = vld [vmem:[%s11801_s6 + $0x300] sm:$0xff]  ;;  %v5810_v27 = vld [vmem:[%s11801_s6 + $0x58] sm:$0xff]  ;;  %v5829_v54 = vld [vmem:[%s11801_s6 + $0xf0] sm:$0xff] }
 0x3dd   : > { %v4384_v8 = vcombine.high %v4366_v1, %v4380_v52  ;;  %v4383_v44 = vcombine.low %v4366_v1, %v4380_v52  ;;  %7420 = vmatpush3.bf16.msra.mxu1 %v7419_v56  ;;  %v7431_v26 = vpack.c.bf16 %v5806_v48, %v5805_v60  ;;  %v7433_v10 = vpack.c.bf16 %v5824_v55, %v5823_v12  ;;  %v5914_v3 = vld [vmem:[%s11801_s6 + $0x398] sm:$0xff]  ;;  %v5915_v31 = vld [vmem:[%s11801_s6 + $0x3a0] sm:$0xff]  ;;  %v5916_v1 = vld [vmem:[%s11801_s6 + $0x3a8] sm:$0xff] }
 0x3de   : > { %v6883_v11 = vcombine.high %v10082_v61, %v3942_v13  ;;  %7422 = vmatprep.subr.bf16.mxu1 %v7421_v62  ;;  %v7513_v46 = vpack.c.bf16 %v5912_v28, %v5911_v25  ;;  %v7521_v52 = vpack.c.bf16 %v5916_v1, %v5915_v31  ;;  %v5830_v9 = vld [vmem:[%s11801_s6 + $0xf8] sm:$0xff]  ;;  %v5901_v56 = vld [vmem:[%s11801_s6 + $0x330] sm:$0xff]  ;;  %v4049_v2 = vld [vmem:[%s11800_s5] sm:$0x3] }
 0x3df   : > { %4692 = vmatmul.mubr.f32.gmra.mrb[64].mxu0 %v4239_v33  ;;  %v5809_v33 = vld [vmem:[%s11801_s6 + $0x50] sm:$0xff]  ;;  %v5902_v47 = vld [vmem:[%s11801_s6 + $0x338] sm:$0xff]  ;;  %v7445_v39 = vpack.c.bf16 %v5830_v9, %v5829_v54  ;;  %v10342_v58 = vrot.slane %v4049_v2, %v9062_v51  ;;  %v10345_v30 = vrot.slane %v4049_v2, %v9069_v4 }
 0x3e0   : > { %6891 = vmatprep.mubr.msk.f32.mxu0 %vm4451_vm15, %v4276_v36  ;;  %v4416_v7 = vrot.slane %v6883_v11, %v9289_v37  ;;  %v7515_v36 = vpack.c.bf16 %v5896_v50, %v5895_v40  ;;  %7514 = vmatprep.subr.bf16.mxu0 %v7513_v46  ;;  %v7439_v11 = vpack.c.bf16 %v5810_v27, %v5809_v33  ;;  %v5813_v57 = vld [vmem:[%s11801_s6 + $0x70] sm:$0xff]  ;;  %v5814_v62 = vld [vmem:[%s11801_s6 + $0x78] sm:$0xff] }
 0x3e1   : > { %7424 = vmatpush3.bf16.msra.mxu1 %v7423_v22  ;;  %v7527_v63 = vpack.c.bf16 %v5902_v47, %v5901_v56  ;;  %v7447_v22 = vpack.c.bf16 %v5814_v62, %v5813_v57 }
 0x3e2   : > { %v4420_v42 = vcombine.high %v4402_v15, %v4416_v7  ;;  %v4419_v61 = vcombine.low %v4402_v15, %v4416_v7  ;;  %7426 = vmatprep.subr.bf16.mxu1 %v7425_v18  ;;  %7516 = vmatpush3.bf16.msra.mxu0 %v7515_v36  ;;  %v5900_v7 = vld [vmem:[%s11801_s6 + $0x328] sm:$0xff]  ;;  %v7441_v15 = vpack.c.bf16 %v5828_v49, %v5827_v21 }
 0x3e3   : > { %4698 = vmatmul.mubr.f32.gmra.mrb[66].mxu0 %v4275_v45  ;;  %v5913_v45 = vld [vmem:[%s11801_s6 + $0x390] sm:$0xff] }
 0x3e4   : > { %6892 = vmatprep.mubr.msk.f32.mxu0 %vm4451_vm15, %v4312_v32  ;;  %v7517_v13 = vpack.c.bf16 %v5914_v3, %v5913_v45  ;;  %v5897_v32 = vld [vmem:[%s11801_s6 + $0x310] sm:$0xff] }
 0x3e5   : > { %7428 = vmatpush3.bf16.msra.mxu1 %v7427_v59 }
 0x3e6   : > { %7430 = vmatprep.subr.bf16.mxu1 %v7429_v41  ;;  %7518 = vmatprep.subr.bf16.mxu0 %v7517_v13 }
 0x3e7   : > { %4704 = vmatmul.mubr.f32.gmra.mrb[68].mxu0 %v4311_v23  ;;  %v7519_v23 = vpack.c.bf16 %v5898_v20, %v5897_v32 }
 0x3e8   : > { %6893 = vmatprep.mubr.msk.f32.mxu0 %vm4451_vm15, %v4348_v19  ;;  %v5808_v19 = vld [vmem:[%s11801_s6 + $0x48] sm:$0xff] }
 0x3e9   : > { %7432 = vmatpush3.bf16.msra.mxu1 %v7431_v26  ;;  %v7435_v5 = vpack.c.bf16 %v5808_v19, %v5807_v16  ;;  %7520 = vmatpush3.bf16.msra.mxu0 %v7519_v23 }
 0x3ea   : > { %7434 = vmatprep.subr.bf16.mxu1 %v7433_v10  ;;  %7522 = vmatprep.subr.bf16.mxu0 %v7521_v52 }
 0x3eb   : > { %4710 = vmatmul.mubr.f32.gmra.mrb[70].mxu0 %v4347_v35  ;;  %v5825_v35 = vld [vmem:[%s11801_s6 + $0xd0] sm:$0xff] }
 0x3ec   : > { %6894 = vmatprep.mubr.msk.f32.mxu0 %vm4451_vm15, %v4384_v8  ;;  %v7437_v34 = vpack.c.bf16 %v5826_v29, %v5825_v35  ;;  %v5899_v8 = vld [vmem:[%s11801_s6 + $0x320] sm:$0xff]  ;;  %v10358_v29 = vsub.s32 2, %v9057_v53 }
 0x3ed   : > { %7436 = vmatpush3.bf16.msra.mxu1 %v7435_v5  ;;  %v7523_v24 = vpack.c.bf16 %v5900_v7, %v5899_v8  ;;  %v10365_v5 = vsub.s32 3, %v9057_v53 }
 0x3ee   : > { %7438 = vmatprep.subr.bf16.mxu1 %v7437_v34 }
 0x3ef   : > { %4716 = vmatmul.mubr.f32.gmra.mrb[72].mxu0 %v4383_v44  ;;  %v5812_v44 = vld [vmem:[%s11801_s6 + $0x68] sm:$0xff] }
 0x3f0   : > { %6895 = vmatprep.mubr.msk.f32.mxu0 %vm4451_vm15, %v4420_v42  ;;  %v5917_v42 = vld [vmem:[%s11801_s6 + $0x3b0] sm:$0xff]  ;;  %v7443_v14 = vpack.c.bf16 %v5812_v44, %v5811_v38  ;;  %7524 = vmatpush3.bf16.msra.mxu0 %v7523_v24 }
 0x3f1   : > { %7440 = vmatpush3.bf16.msra.mxu1 %v7439_v11 }
 0x3f2   : > { %7442 = vmatprep.subr.bf16.mxu1 %v7441_v15 }
 0x3f3   : > { %4722 = vmatmul.mubr.f32.gmra.mrb[74].mxu0 %v4419_v61  ;;  %v5918_v61 = vld [vmem:[%s11801_s6 + $0x3b8] sm:$0xff] }
 0x3f4   : > { %v7525_v0 = vpack.c.bf16 %v5918_v61, %v5917_v42 }
 0x3f5   : > { %7444 = vmatpush3.bf16.msra.mxu1 %v7443_v14 }
 0x3f6   : > { %7526 = vmatprep.subr.bf16.mxu0 %v7525_v0  ;;  %7446 = vmatprep.subr.bf16.mxu1 %v7445_v39 }
 0x3f7   : > { %7528 = vmatpush3.bf16.msra.mxu0 %v7527_v63 }
 0x3f9   : > { %7448 = vmatpush3.bf16.msra.mxu1 %v7447_v22 }
 0x4a2   : > { %v4669_v18 = vpop.f32.mrb[56].mxu0 }
 0x4a3   : > { %v7666_v17 = vadd.f32 %v4669_v18, %v10342_v58  ;;  %v4671_v6 = vpop.f32.mrb[57].mxu0 }
 0x4a4   : > { %v7667_v43 = vadd.f32 %v4671_v6, %v10345_v30 }
 0x4a5   : > { %v4728_v59 = vmax.f32 %v7666_v17, 0.0 }
 0x4a6   : > { %v4729_v41 = vmax.f32 %v7667_v43, 0.0  ;;  %v4675_v60 = vpop.f32.mrb[58].mxu0 }
 0x4a7   : > { %v7668_v48 = vadd.f32 %v4675_v60, %v10342_v58  ;;  %v4677_v12 = vpop.f32.mrb[59].mxu0 }
 0x4a8   : > { %v4768_v55 = vcombine.low %v4728_v59, %v4729_v41  ;;  %v4769_v26 = vcombine.high %v4728_v59, %v4729_v41  ;;  %v7669_v10 = vadd.f32 %v4677_v12, %v10345_v30 }
 0x4a9   : > { %v4730_v25 = vmax.f32 %v7668_v48, 0.0 }
 0x4aa   : > { %v10352_v16 = vrot.slane %v4768_v55, %v9289_v37  ;;  %v10355_v19 = vrot.slane %v4769_v26, %v9289_v37  ;;  %v4681_v35 = vpop.f32.mrb[60].mxu0  ;;  %v4731_v28 = vmax.f32 %v7669_v10, 0.0 }
 0x4ab   : > { %v4683_v40 = vpop.f32.mrb[61].mxu0  ;;  %v7670_v27 = vadd.f32 %v4681_v35, %v10342_v58 }
 0x4ac   : > { %11835 = vst [vmem:[#allocation10_spill] sm:$0xff] %v10352_v16  ;;  %v10362_v50 = vcombine.high %v10352_v16, %v10352_v16  ;;  %v10369_v33 = vcombine.high %v10355_v19, %v10355_v19  ;;  %v4786_v34 = vcombine.low %v4730_v25, %v4731_v28  ;;  %v4787_v49 = vcombine.high %v4730_v25, %v4731_v28 }
 0x4ad   : > { %v5038_v53 = vrot.slane %v10352_v16, %v9069_v4  ;;  %v7671_v3 = vadd.f32 %v4683_v40, %v10345_v30  ;;  %v5042_v20 = vrot.slane %v10352_v16, %v10365_v5  ;;  %v4732_v11 = vmax.f32 %v7670_v27, 0.0 }
 0x4ae   : > { %v4687_v21 = vpop.f32.mrb[62].mxu0  ;;  %v5124_v31 = vrot.slane %v10362_v50, %v9062_v51  ;;  %v10386_v23 = vrot.slane %v4786_v34, %v9289_v37  ;;  %v10389_v1 = vrot.slane %v4787_v49, %v9289_v37 }
 0x4af   : > { %v4689_v45 = vpop.f32.mrb[63].mxu0  ;;  %v7672_v13 = vadd.f32 %v4687_v21, %v10342_v58  ;;  %v4733_v38 = vmax.f32 %v7671_v3, 0.0 }
 0x4b0   : > { %v7673_v32 = vadd.f32 %v4689_v45, %v10345_v30  ;;  %v10403_v24 = vcombine.high %v10389_v1, %v10389_v1  ;;  %v10411_v56 = vcombine.high %v10386_v23, %v10386_v23 }
 0x4b1   : > { %v4734_v52 = vmax.f32 %v7672_v13, 0.0  ;;  %v4804_v63 = vcombine.low %v4732_v11, %v4733_v38  ;;  %v4805_v22 = vcombine.high %v4732_v11, %v4733_v38 }
 0x4b2   : > { %v4735_v8 = vmax.f32 %v7673_v32, 0.0  ;;  %v4693_v7 = vpop.f32.mrb[64].mxu0 }
 0x4b3   : > { %v4695_v54 = vpop.f32.mrb[65].mxu0  ;;  %v7674_v6 = vadd.f32 %v4693_v7, %v10342_v58  ;;  %v10429_v12 = vrot.slane %v4804_v63, %v9289_v37  ;;  %v10432_v55 = vrot.slane %v4805_v22, %v9289_v37 }
 0x4b4   : > { %v4822_v2 = vcombine.low %v4734_v52, %v4735_v8  ;;  %v4823_v17 = vcombine.high %v4734_v52, %v4735_v8  ;;  %v7675_v43 = vadd.f32 %v4695_v54, %v10345_v30 }
 0x4b5   : > { %11836 = vst [vmem:[#allocation11_spill] sm:$0xff] %v10432_v55  ;;  %v4736_v40 = vmax.f32 %v7674_v6, 0.0  ;;  %v10449_v49 = vcombine.high %v10429_v12, %v10429_v12  ;;  %v10453_v45 = vcombine.high %v10432_v55, %v10432_v55  ;;  %v5054_v38 = vrot.slane %v10432_v55, %v9069_v4 }
 0x4b6   : > { %v4699_v18 = vpop.f32.mrb[66].mxu0  ;;  %v10441_v25 = vrot.slane %v4822_v2, %v9289_v37  ;;  %v10444_v28 = vrot.slane %v4823_v17, %v9289_v37  ;;  %v4737_v27 = vmax.f32 %v7675_v43, 0.0  ;;  %v5058_v52 = vrot.slane %v10432_v55, %v10365_v5 }
 0x4b7   : > { %v7676_v59 = vadd.f32 %v4699_v18, %v10342_v58  ;;  %v4701_v41 = vpop.f32.mrb[67].mxu0  ;;  %v5140_v39 = vrot.slane %v10453_v45, %v9062_v51 }
 0x4b8   : > { %v7677_v21 = vadd.f32 %v4701_v41, %v10345_v30  ;;  %v10473_v22 = vcombine.high %v10441_v25, %v10441_v25  ;;  %v10477_v2 = vcombine.high %v10444_v28, %v10444_v28  ;;  %v4840_v6 = vcombine.low %v4736_v40, %v4737_v27 }
 0x4b9   : > { %v4738_v13 = vmax.f32 %v7676_v59, 0.0  ;;  %v4841_v59 = vcombine.high %v4736_v40, %v4737_v27 }
 0x4ba   : > { %v4705_v34 = vpop.f32.mrb[68].mxu0  ;;  %v4739_v41 = vmax.f32 %v7677_v21, 0.0  ;;  %v10488_v10 = vrot.slane %v4840_v6, %v9289_v37 }
 0x4bb   : > { %v4707_v32 = vpop.f32.mrb[69].mxu0  ;;  %v7678_v3 = vadd.f32 %v4705_v34, %v10342_v58  ;;  %v10493_v63 = vrot.slane %v4841_v59, %v9289_v37 }
 0x4bc   : > { %v7679_v46 = vadd.f32 %v4707_v32, %v10345_v30  ;;  %v4858_v40 = vcombine.low %v4738_v13, %v4739_v41  ;;  %v4859_v27 = vcombine.high %v4738_v13, %v4739_v41  ;;  %v10497_v34 = vcombine.high %v10488_v10, %v10488_v10 }
 0x4bd   : > { %v4740_v21 = vmax.f32 %v7678_v3, 0.0 }
 0x4be   : > { %v4711_v43 = vpop.f32.mrb[70].mxu0  ;;  %v4741_v36 = vmax.f32 %v7679_v46, 0.0  ;;  %v10512_v59 = vrot.slane %v4858_v40, %v9289_v37  ;;  %v10515_v46 = vrot.slane %v4859_v27, %v9289_v37 }
 0x4bf   : > { %v4713_v11 = vpop.f32.mrb[71].mxu0  ;;  %v7680_v35 = vadd.f32 %v4711_v43, %v10342_v58  ;;  %v5046_v43 = vrot.slane %v10411_v56, %v9069_v4 }
 0x4c0   : > { %v7681_v7 = vadd.f32 %v4713_v11, %v10345_v30  ;;  %v10505_v11 = vcombine.high %v10493_v63, %v10493_v63  ;;  %v4876_v9 = vcombine.low %v4740_v21, %v4741_v36  ;;  %v4877_v54 = vcombine.high %v4740_v21, %v4741_v36 }
 0x4c1   : > { %v4742_v61 = vmax.f32 %v7680_v35, 0.0  ;;  %v10523_v40 = vcombine.high %v10512_v59, %v10512_v59  ;;  %v10527_v27 = vcombine.high %v10515_v46, %v10515_v46  ;;  %v5099_v62 = vsel %vm5012_vm0, %v5046_v43, %v5038_v53 }
 0x4c2   : > { %v4717_v6 = vpop.f32.mrb[72].mxu0  ;;  %v4743_v18 = vmax.f32 %v7681_v7, 0.0  ;;  %v10534_v21 = vrot.slane %v4876_v9, %v9289_v37  ;;  %v5100_v53 = vsel %vm5014_vm1, %v5054_v38, %v5099_v62  ;;  %v5066_v43 = vrot.slane %v10477_v2, %v10365_v5 }
 0x4c3   : > { %v4719_v41 = vpop.f32.mrb[73].mxu0  ;;  %v7682_v26 = vadd.f32 %v4717_v6, %v10342_v58  ;;  %v10537_v6 = vrot.slane %v4877_v54, %v9289_v37  ;;  %v5074_v60 = vrot.slane %v10512_v59, %v10365_v5 }
 0x4c4   : > { %v7683_v3 = vadd.f32 %v4719_v41, %v10345_v30  ;;  %v4894_v41 = vcombine.low %v4742_v61, %v4743_v18  ;;  %v4895_v17 = vcombine.high %v4742_v61, %v4743_v18  ;;  %v10543_v35 = vcombine.high %v10534_v21, %v10534_v21 }
 0x4c5   : > { %v4744_v48 = vmax.f32 %v7682_v26, 0.0  ;;  %v10547_v9 = vcombine.high %v10537_v6, %v10537_v6 }
 0x4c6   : > { %v4723_v7 = vpop.f32.mrb[74].mxu0  ;;  %v4745_v44 = vmax.f32 %v7683_v3, 0.0  ;;  %v10550_v54 = vrot.slane %v4894_v41, %v9289_v37  ;;  %v10553_v61 = vrot.slane %v4895_v17, %v9289_v37  ;;  %v5070_v17 = vrot.slane %v10512_v59, %v9069_v4 }
 0x4c7   : > { %v4725_v42 = vpop.f32.mrb[75].mxu0  ;;  %v7684_v8 = vadd.f32 %v4723_v7, %v10342_v58  ;;  %v5062_v7 = vrot.slane %v10477_v2, %v9069_v4 }
 0x4c8   : > { %v7685_v36 = vadd.f32 %v4725_v42, %v10345_v30  ;;  %v4912_v58 = vcombine.low %v4744_v48, %v4745_v44  ;;  %v4913_v26 = vcombine.high %v4744_v48, %v4745_v44  ;;  %v10557_v18 = vcombine.high %v10550_v54, %v10550_v54 }
 0x4c9   : > { %v4746_v30 = vmax.f32 %v7684_v8, 0.0  ;;  %v10561_v3 = vcombine.high %v10553_v61, %v10553_v61  ;;  %v5086_v57 = vrot.slane %v10553_v61, %v9069_v4  ;;  %v5101_v14 = vsel %vm5016_vm2, %v5062_v7, %v5100_v53 }
 0x4ca   : > { %v4747_v42 = vmax.f32 %v7685_v36, 0.0  ;;  %v10568_v41 = vrot.slane %v4912_v58, %v9289_v37  ;;  %v10571_v44 = vrot.slane %v4913_v26, %v9289_v37  ;;  %v5078_v36 = vrot.slane %v10543_v35, %v9069_v4 }
 0x4cb   : > { %v5050_v58 = vrot.slane %v10411_v56, %v10365_v5  ;;  %v5090_v62 = vrot.slane %v10553_v61, %v10365_v5  ;;  %v5102_v38 = vsel %vm5018_vm3, %v5070_v17, %v5101_v14  ;;  %v5144_v14 = vrot.slane %v10453_v45, %v10358_v29 }
 0x4cc   : > { %v4930_v48 = vcombine.low %v4746_v30, %v4747_v42  ;;  %v4931_v8 = vcombine.high %v4746_v30, %v4747_v42  ;;  %v10585_v26 = vcombine.high %v10568_v41, %v10568_v41  ;;  %v10595_v0 = vcombine.high %v10571_v44, %v10571_v44 }
 0x4cd   : > { %v5106_v32 = vsel %vm5012_vm0, %v5050_v58, %v5042_v20  ;;  %v5103_v15 = vsel %vm5020_vm5, %v5078_v36, %v5102_v38  ;;  %v5156_v17 = vrot.slane %v10523_v40, %v9062_v51  ;;  %v5160_v58 = vrot.slane %v10523_v40, %v10358_v29 }
 0x4ce   : > { %v10588_v30 = vrot.slane %v4930_v48, %v9289_v37  ;;  %v10591_v42 = vrot.slane %v4931_v8, %v9289_v37  ;;  %v5082_v48 = vrot.slane %v10543_v35, %v10365_v5  ;;  %v5094_v8 = vrot.slane %v10595_v0, %v9069_v4 }
 0x4cf   : > { %v5098_v13 = vrot.slane %v10595_v0, %v10365_v5  ;;  %v5107_v7 = vsel %vm5014_vm1, %v5058_v52, %v5106_v32  ;;  %v5104_v53 = vsel %vm5022_vm4, %v5086_v57, %v5103_v15  ;;  %v5164_v36 = vrot.slane %v10537_v6, %v9062_v51 }
 0x4d0   : > { %v10609_v37 = vcombine.high %v10588_v30, %v10588_v30  ;;  %v5108_v20 = vsel %vm5016_vm2, %v5066_v43, %v5107_v7  ;;  %v5105_v38 = vsel %vm5024_vm6, %v5094_v8, %v5104_v53  ;;  %v5168_v32 = vrot.slane %v10537_v6, %v10358_v29 }
 0x4d1   : > { %v5109_v52 = vsel %vm5018_vm3, %v5074_v60, %v5108_v20  ;;  %v5172_v47 = vrot.slane %v10561_v3, %v9062_v51  ;;  %5113 = vrot.lane.b32.xlu0 %v5105_v38, %s7940_s18  ;;  %v5176_v57 = vrot.slane %v10561_v3, %v10358_v29  ;;  %v5180_v43 = vrot.slane %v10588_v30, %v9062_v51 }
 0x4d2   : > { %v5110_v15 = vsel %vm5020_vm5, %v5082_v48, %v5109_v52  ;;  %v5184_v60 = vrot.slane %v10588_v30, %v10358_v29  ;;  %v11837_v7 = vrot.slane %v10389_v1, %v9062_v51  ;;  %v11838_v48 = vrot.slane %v10362_v50, %v10358_v29 }
 0x4d3   : > { %v5111_v8 = vsel %vm5022_vm4, %v5090_v62, %v5110_v15  ;;  %v11839_v20 = vrot.slane %v10389_v1, %v10358_v29  ;;  %v5230_v52 = vrot.slane %v10453_v45, %v10365_v5 }
 0x4d4   : > { %v5185_v53 = vsel %vm5012_vm0, %v11837_v7, %v5124_v31  ;;  %v5112_v62 = vsel %vm5024_vm6, %v5098_v13, %v5111_v8  ;;  %v5238_v31 = vrot.slane %v10488_v10, %v10365_v5  ;;  %v11840_v7 = vrot.slane %v10488_v10, %v9062_v51 }
 0x4d5   : > { %v5192_v38 = vsel %vm5012_vm0, %v11839_v20, %v11838_v48  ;;  %v5186_v15 = vsel %vm5014_vm1, %v5140_v39, %v5185_v53  ;;  %v11841_v48 = vrot.slane %v10488_v10, %v10358_v29  ;;  %v5246_v13 = vrot.slane %v10523_v40, %v10365_v5  ;;  %5115 = vrot.lane.b32.xlu0 %v5112_v62, %s7940_s18 }
 0x4d6   : > { %v5193_v55 = vsel %vm5014_vm1, %v5144_v14, %v5192_v38  ;;  %v5187_v16 = vsel %vm5016_vm2, %v11840_v7, %v5186_v15  ;;  %v5254_v39 = vrot.slane %v10537_v6, %v10365_v5  ;;  %v5262_v53 = vrot.slane %v10561_v3, %v10365_v5 }
 0x4d7   : > { %v5194_v20 = vsel %vm5016_vm2, %v11841_v48, %v5193_v55  ;;  %v5188_v14 = vsel %vm5018_vm3, %v5156_v17, %v5187_v16  ;;  %v5270_v38 = vrot.slane %v10588_v30, %v10365_v5  ;;  %v11842_v7 = vrot.slane %v10362_v50, %v10365_v5 }
 0x4d8   : > { %v5195_v8 = vsel %vm5018_vm3, %v5160_v58, %v5194_v20  ;;  %v5189_v55 = vsel %vm5020_vm5, %v5164_v36, %v5188_v14  ;;  %v11843_v62 = vrot.slane %v10389_v1, %v10365_v5  ;;  %v5226_v17 = vrot.slane %v10453_v45, %v9069_v4 }
 0x4d9   : > { %v5196_v15 = vsel %vm5020_vm5, %v5168_v32, %v5195_v8  ;;  %v5190_v58 = vsel %vm5022_vm4, %v5172_v47, %v5189_v55  ;;  %v5234_v36 = vrot.slane %v10488_v10, %v9069_v4  ;;  %v5250_v47 = vrot.slane %v10537_v6, %v9069_v4 }
 0x4da   : > { %v5278_v16 = vsel %vm5012_vm0, %v11843_v62, %v11842_v7  ;;  %v5197_v48 = vsel %vm5022_vm4, %v5176_v57, %v5196_v15  ;;  %v5191_v32 = vsel %vm5024_vm6, %v5180_v43, %v5190_v58  ;;  %v5242_v7 = vrot.slane %v10523_v40, %v9069_v4 }
 0x4db   : > { %v5279_v20 = vsel %vm5014_vm1, %v5230_v52, %v5278_v16  ;;  %v5198_v14 = vsel %vm5024_vm6, %v5184_v60, %v5197_v48  ;;  %v5258_v57 = vrot.slane %v10561_v3, %v9069_v4  ;;  %v5266_v43 = vrot.slane %v10588_v30, %v9069_v4 }
 0x4dc   : > { %v5280_v8 = vsel %vm5016_vm2, %v5238_v31, %v5279_v20  ;;  %v7850_v62 = vpack.i.bf16 %v5198_v14, %v5191_v32  ;;  %v11844_v60 = vrot.slane %v10362_v50, %v9069_v4  ;;  %v11845_v40 = vrot.slane %v10389_v1, %v9069_v4 }
 0x4dd   : > { %v5281_v45 = vsel %vm5018_vm3, %v5246_v13, %v5280_v8  ;;  %v5477_v31 = vrot.slane %v10473_v22, %v9062_v51  ;;  %v5485_v30 = vrot.slane %v10493_v63, %v9062_v51  ;;  %v5493_v50 = vrot.slane %v10527_v27, %v9062_v51 }
 0x4de   : > { %v5282_v10 = vsel %vm5020_vm5, %v5254_v39, %v5281_v45  ;;  %v5271_v52 = vsel %vm5012_vm0, %v11845_v40, %v11844_v60  ;;  %7851 = vrot.lane.b32.xlu1 %v7850_v62, %s7941_s15  ;;  %v5501_v39 = vrot.slane %v10550_v54, %v9062_v51  ;;  %v5509_v55 = vrot.slane %v10585_v26, %v9062_v51 }
 0x4df   : > { %v5283_v6 = vsel %vm5022_vm4, %v5262_v53, %v5282_v10  ;;  %v5272_v3 = vsel %vm5014_vm1, %v5226_v17, %v5271_v52  ;;  %v5517_v15 = vrot.slane %v10591_v42, %v9062_v51  ;;  %v11846_v16 = vrot.slane %v10369_v33, %v9062_v51 }
 0x4e0   : > { %v5284_v1 = vsel %vm5024_vm6, %v5270_v38, %v5283_v6  ;;  %v5273_v13 = vsel %vm5016_vm2, %v5234_v36, %v5272_v3  ;;  %v11847_v38 = vrot.slane %v10429_v12, %v9062_v51  ;;  %v5400_v58 = vrot.slane %v10497_v34, %v9069_v4 }
 0x4e1   : > { %5287 = vrot.lane.b32.xlu0 %v5284_v1, %s7942_s26  ;;  %v5274_v53 = vsel %vm5018_vm3, %v5242_v7, %v5273_v13  ;;  %v5404_v36 = vrot.slane %v10497_v34, %v10365_v5  ;;  %v5416_v32 = vrot.slane %v10547_v9, %v9069_v4  ;;  %v5420_v7 = vrot.slane %v10547_v9, %v10365_v5 }
 0x4e2   : > { %v5522_v17 = vsel %vm5012_vm0, %v11847_v38, %v11846_v16  ;;  %v5275_v48 = vsel %vm5020_vm5, %v5250_v47, %v5274_v53  ;;  %v5424_v62 = vrot.slane %v10568_v41, %v9069_v4  ;;  %v5428_v10 = vrot.slane %v10568_v41, %v10365_v5 }
 0x4e3   : > { %v5523_v20 = vsel %vm5014_vm1, %v5477_v31, %v5522_v17  ;;  %v5276_v14 = vsel %vm5022_vm4, %v5258_v57, %v5275_v48  ;;  %v5432_v60 = vrot.slane %v10609_v37, %v9069_v4  ;;  %v5436_v40 = vrot.slane %v10609_v37, %v10365_v5 }
 0x4e4   : > { %v5524_v8 = vsel %vm5016_vm2, %v5485_v30, %v5523_v20  ;;  %v5277_v45 = vsel %vm5024_vm6, %v5266_v43, %v5276_v14  ;;  %v11848_v52 = vrot.slane %v10355_v19, %v9069_v4  ;;  %v11849_v43 = vrot.slane %v10403_v24, %v9069_v4 }
 0x4e5   : > { %v5525_v47 = vsel %vm5018_vm3, %v5493_v50, %v5524_v8  ;;  %5285 = vrot.lane.b32.xlu1 %v5277_v45, %s7942_s26  ;;  %v11850_v6 = vrot.slane %v10355_v19, %v10365_v5  ;;  %v11851_v3 = vrot.slane %v10403_v24, %v10365_v5  ;;  %v11852_v1 = vrot.slane %v10441_v25, %v9069_v4 }
 0x4e6   : > { %v5526_v57 = vsel %vm5020_vm5, %v5501_v39, %v5525_v47  ;;  %v5437_v31 = vsel %vm5012_vm0, %v11849_v43, %v11848_v52  ;;  %v11853_v39 = vrot.slane %v10441_v25, %v10365_v5  ;;  %v5562_v16 = vrot.slane %v10473_v22, %v9069_v4 }
 0x4e7   : > { %v5444_v30 = vsel %vm5012_vm0, %v11851_v3, %v11850_v6  ;;  %v5527_v50 = vsel %vm5022_vm4, %v5509_v55, %v5526_v57  ;;  %v5438_v13 = vsel %vm5014_vm1, %v11852_v1, %v5437_v31  ;;  %v5566_v55 = vrot.slane %v10473_v22, %v10365_v5 }
 0x4e8   : > { %v5445_v53 = vsel %vm5014_vm1, %v11853_v39, %v5444_v30  ;;  %v5528_v38 = vsel %vm5024_vm6, %v5517_v15, %v5527_v50  ;;  %v5439_v17 = vsel %vm5016_vm2, %v5400_v58, %v5438_v13  ;;  %v11854_v20 = vrot.slane %v10515_v46, %v9069_v4 }
 0x4e9   : > { %v5446_v48 = vsel %vm5016_vm2, %v5404_v36, %v5445_v53  ;;  %5536 = vrot.lane.b32.xlu0 %v5528_v38, %s7941_s15  ;;  %v11855_v8 = vrot.slane %v10515_v46, %v10365_v5  ;;  %v5578_v15 = vrot.slane %v10527_v27, %v9069_v4  ;;  %v5582_v58 = vrot.slane %v10527_v27, %v10365_v5 }
 0x4ea   : > { %v5440_v14 = vsel %vm5018_vm3, %v11854_v20, %v5439_v17  ;;  %v5586_v57 = vrot.slane %v10550_v54, %v9069_v4  ;;  %v5590_v52 = vrot.slane %v10550_v54, %v10365_v5  ;;  %v5594_v6 = vrot.slane %v10585_v26, %v9069_v4 }
 0x4eb   : > { %v5447_v45 = vsel %vm5018_vm3, %v11855_v8, %v5446_v48  ;;  %v5441_v36 = vsel %vm5020_vm5, %v5416_v32, %v5440_v14  ;;  %v5598_v3 = vrot.slane %v10585_v26, %v10365_v5  ;;  %v5602_v30 = vrot.slane %v10591_v42, %v9069_v4 }
 0x4ec   : > { %v5448_v47 = vsel %vm5020_vm5, %v5420_v7, %v5447_v45  ;;  %v5442_v43 = vsel %vm5022_vm4, %v5424_v62, %v5441_v36  ;;  %v5606_v50 = vrot.slane %v10591_v42, %v10365_v5  ;;  %v11856_v62 = vrot.slane %v10369_v33, %v9069_v4 }
 0x4ed   : > { %v5449_v31 = vsel %vm5022_vm4, %v5428_v10, %v5448_v47  ;;  %v5443_v32 = vsel %vm5024_vm6, %v5432_v60, %v5442_v43  ;;  %v11857_v10 = vrot.slane %v10429_v12, %v9069_v4  ;;  %v11858_v60 = vrot.slane %v10369_v33, %v10365_v5 }
 0x4ee   : > { %v5450_v7 = vsel %vm5024_vm6, %v5436_v40, %v5449_v31  ;;  %v11859_v40 = vrot.slane %v10429_v12, %v10365_v5  ;;  %v5465_v53 = vrot.slane %v10369_v33, %v10358_v29  ;;  %v5481_v48 = vrot.slane %v10473_v22, %v10358_v29 }
 0x4ef   : > { %v7855_v1 = vpack.i.bf16 %v5450_v7, %v5443_v32  ;;  %v5607_v13 = vsel %vm5012_vm0, %v11857_v10, %v11856_v62  ;;  %v5489_v20 = vrot.slane %v10493_v63, %v10358_v29  ;;  %v11860_v14 = vrot.slane %v10493_v63, %v9069_v4 }
 0x4f0   : > { %v5614_v39 = vsel %vm5012_vm0, %v11859_v40, %v11858_v60  ;;  %v5608_v38 = vsel %vm5014_vm1, %v5562_v16, %v5607_v13  ;;  %v11861_v33 = vrot.slane %v10493_v63, %v10365_v5  ;;  %v5505_v22 = vrot.slane %v10550_v54, %v10358_v29 }
 0x4f1   : > { %v5615_v17 = vsel %vm5014_vm1, %v5566_v55, %v5614_v39  ;;  %7856 = vrot.lane.b32.xlu1 %v7855_v1, %s7940_s18  ;;  %v5609_v8 = vsel %vm5016_vm2, %v11860_v14, %v5608_v38  ;;  %v5497_v55 = vrot.slane %v10527_v27, %v10358_v29  ;;  %v5513_v47 = vrot.slane %v10585_v26, %v10358_v29 }
 0x4f2   : > { %v5616_v16 = vsel %vm5016_vm2, %v11861_v33, %v5615_v17  ;;  %v5610_v45 = vsel %vm5018_vm3, %v5578_v15, %v5609_v8  ;;  %v5521_v43 = vrot.slane %v10591_v42, %v10358_v29  ;;  %v11862_v27 = vrot.slane %v10429_v12, %v10358_v29 }
 0x4f3   : > { %v5617_v36 = vsel %vm5018_vm3, %v5582_v58, %v5616_v16  ;;  %v5611_v63 = vsel %vm5020_vm5, %v5586_v57, %v5610_v45  ;;  %v10891_v54 = vcombine.high %v10591_v42, %v10591_v42  ;;  %v5723_v57 = vrot.slane %v10449_v49, %v10365_v5 }
 0x4f4   : > { %v5618_v31 = vsel %vm5020_vm5, %v5590_v52, %v5617_v36  ;;  %v5529_v32 = vsel %vm5012_vm0, %v11862_v27, %v5465_v53  ;;  %v5612_v15 = vsel %vm5022_vm4, %v5594_v6, %v5611_v63  ;;  %v5739_v1 = vrot.slane %v10505_v11, %v10365_v5  ;;  %v5847_v27 = vld [vmem:[%s11801_s6 + $0x180] sm:$0xff] }
 0x4f5   : > { %v5619_v26 = vsel %vm5022_vm4, %v5598_v3, %v5618_v31  ;;  %v5530_v58 = vsel %vm5014_vm1, %v5481_v48, %v5529_v32  ;;  %v5613_v52 = vsel %vm5024_vm6, %v5602_v30, %v5612_v15  ;;  %v5727_v42 = vrot.slane %v10444_v28, %v9069_v4  ;;  %v5919_v48 = vld [vmem:[%s11801_s6 + $0x3c0] sm:$0xff] }
 0x4f6   : > { %v5620_v7 = vsel %vm5024_vm6, %v5606_v50, %v5619_v26  ;;  %v5531_v12 = vsel %vm5016_vm2, %v5489_v20, %v5530_v58  ;;  %v5747_v62 = vrot.slane %v10534_v21, %v10365_v5  ;;  %v5755_v30 = vrot.slane %v10557_v18, %v10365_v5  ;;  %v5920_v20 = vld [vmem:[%s11801_s6 + $0x3c8] sm:$0xff] }
 0x4f7   : > { %v7860_v6 = vpack.i.bf16 %v5620_v7, %v5613_v52  ;;  %v5532_v3 = vsel %vm5018_vm3, %v5497_v55, %v5531_v12  ;;  %v5763_v50 = vrot.slane %v10571_v44, %v10365_v5  ;;  %v11863_v13 = vrot.slane %v10386_v23, %v10365_v5  ;;  %v5903_v52 = vld [vmem:[%s11801_s6 + $0x340] sm:$0xff]  ;;  %v5904_v7 = vld [vmem:[%s11801_s6 + $0x348] sm:$0xff] }
 0x4f8   : > { %v5533_v10 = vsel %vm5020_vm5, %v5505_v22, %v5532_v3  ;;  %v11864_v39 = vrot.slane %v10444_v28, %v10365_v5  ;;  %v5719_v38 = vrot.slane %v10449_v49, %v9069_v4  ;;  %v5735_v17 = vrot.slane %v10505_v11, %v9069_v4 }
 0x4f9   : > { %v5779_v60 = vsel %vm5012_vm0, %v5723_v57, %v11863_v13  ;;  %7861 = vrot.lane.b32.xlu0 %v7860_v6, %s7942_s26  ;;  %v5534_v40 = vsel %vm5022_vm4, %v5513_v47, %v5533_v10  ;;  %v5771_v8 = vrot.slane %v10891_v54, %v10365_v5  ;;  %v5743_v16 = vrot.slane %v10534_v21, %v9069_v4  ;;  %v5848_v57 = vld [vmem:[%s11801_s6 + $0x188] sm:$0xff]  ;;  %v11866_v10 = vld [vmem:[#allocation10_spill] sm:$0xff] }
 0x4fa   : > { %v5780_v53 = vsel %vm5014_vm1, %v11864_v39, %v5779_v60  ;;  %v5535_v14 = vsel %vm5024_vm6, %v5521_v43, %v5534_v40  ;;  %v5751_v22 = vrot.slane %v10557_v18, %v9069_v4  ;;  %v5759_v45 = vrot.slane %v10571_v44, %v9069_v4  ;;  %v11868_v60 = vld [vmem:[#allocation11_spill] sm:$0xff] }
 0x4fb   : > { %v5781_v33 = vsel %vm5016_vm2, %v5739_v1, %v5780_v53  ;;  %5538 = vrot.lane.b32.xlu1 %v5535_v14, %s7941_s15  ;;  %v11865_v36 = vrot.slane %v10386_v23, %v9069_v4  ;;  %v7529_v63 = vpack.c.bf16 %v5920_v20, %v5919_v48  ;;  %v4963_v31 = vrot.slane %v10411_v56, %v10358_v29  ;;  %s6902_s15 = sshll.u32 %s8031_s25, 7  ;;  %s7944_s25 = smov [#allocation3]  }
 0x4fc   : > { %v5782_v55 = vsel %vm5018_vm3, %v5747_v62, %v5781_v33  ;;  %v5767_v15 = vrot.slane %v10891_v54, %v9069_v4  ;;  %v4979_v58 = vrot.slane %v10477_v2, %v10358_v29  ;;  %v4987_v1 = vrot.slane %v10512_v59, %v10358_v29  ;;  %v5922_v33 = vld [vmem:[%s11801_s6 + $0x3d8] sm:$0xff]  ;;  %s11753_s30 = scalar_lea.hbm %s11807_s12, %s6902_s15  ;;  %s7869_s23 = sshll.u32 %s7944_s25, 4  ;;  %s7870_s23 = int_to_ptr.vmem [resolvable:$false] %s7869_s23 }
 0x4fd   : > { %v5772_v5 = vsel %vm5012_vm0, %v5719_v38, %v11865_v36  ;;  %v5783_v47 = vsel %vm5020_vm5, %v5755_v30, %v5782_v55  ;;  %7530 = vmatprep.subr.bf16.mxu0 %v7529_v63  ;;  %v5003_v3 = vrot.slane %v10553_v61, %v10358_v29  ;;  %v5011_v62 = vrot.slane %v10595_v0, %v10358_v29 }
 0x4fe   : > { %v5773_v43 = vsel %vm5014_vm1, %v5727_v42, %v5772_v5  ;;  %v5784_v32 = vsel %vm5022_vm4, %v5763_v50, %v5783_v47  ;;  %v4995_v42 = vrot.slane %v10543_v35, %v10358_v29  ;;  %v11867_v30 = vrot.slane %v11866_v10, %v10358_v29  ;;  %v5924_v47 = vld [vmem:[%s11801_s6 + $0x3e8] sm:$0xff] }
 0x4ff   : > { %v5774_v26 = vsel %vm5016_vm2, %v5735_v17, %v5773_v43  ;;  %v5785_v12 = vsel %vm5024_vm6, %v5771_v8, %v5784_v32  ;;  %v11869_v40 = vrot.slane %v11868_v60, %v10358_v29  ;;  %v7449_v53 = vpack.c.bf16 %v5848_v57, %v5847_v27  ;;  %v5921_v8 = vld [vmem:[%s11801_s6 + $0x3d0] sm:$0xff]  ;;  %v5907_v32 = vld [vmem:[%s11801_s6 + $0x360] sm:$0xff] }
 0x500   : > { %v5775_v4 = vsel %vm5018_vm3, %v5743_v16, %v5774_v26  ;;  %5788 = vrot.lane.b32.xlu0 %v5785_v12, %s7940_s18  ;;  %v5026_v50 = vsel %vm5012_vm0, %v4963_v31, %v11867_v30  ;;  %v7531_v38 = vpack.c.bf16 %v5904_v7, %v5903_v52  ;;  %v4959_v20 = vrot.slane %v10411_v56, %v9062_v51  ;;  %v5905_v56 = vld [vmem:[%s11801_s6 + $0x350] sm:$0xff]  ;;  %v5926_v7 = vld [vmem:[%s11801_s6 + $0x3f8] sm:$0xff] }
 0x501   : > { %v5776_v6 = vsel %vm5020_vm5, %v5751_v22, %v5775_v4  ;;  %v5027_v39 = vsel %vm5014_vm1, %v11869_v40, %v5026_v50  ;;  %v4975_v14 = vrot.slane %v10477_v2, %v9062_v51  ;;  %7450 = vmatprep.subr.bf16.mxu1 %v7449_v53  ;;  %v4983_v55 = vrot.slane %v10512_v59, %v9062_v51  ;;  %v5906_v2 = vld [vmem:[%s11801_s6 + $0x358] sm:$0xff]  ;;  %v5923_v59 = vld [vmem:[%s11801_s6 + $0x3e0] sm:$0xff]  ;;  %v5925_v52 = vld [vmem:[%s11801_s6 + $0x3f0] sm:$0xff] }
 0x502   : > { %v5777_v13 = vsel %vm5022_vm4, %v5759_v45, %v5776_v6  ;;  %v5028_v48 = vsel %vm5016_vm2, %v4979_v58, %v5027_v39  ;;  %7532 = vmatpush3.bf16.msra.mxu0 %v7531_v38  ;;  %v4991_v45 = vrot.slane %v10543_v35, %v9062_v51  ;;  %v11870_v36 = vrot.slane %v11866_v10, %v9062_v51  ;;  %v5909_v10 = vld [vmem:[%s11801_s6 + $0x370] sm:$0xff]  ;;  %v5910_v30 = vld [vmem:[%s11801_s6 + $0x378] sm:$0xff]  ;;  %v5976_v40 = vld [vmem:[%s11801_s6 + $0x588] sm:$0xff] }
 0x503   : > { %v5778_v17 = vsel %vm5024_vm6, %v5767_v15, %v5777_v13  ;;  %v5029_v16 = vsel %vm5018_vm3, %v4987_v1, %v5028_v48  ;;  %v4999_v63 = vrot.slane %v10553_v61, %v9062_v51  ;;  %v11871_v35 = vrot.slane %v11868_v60, %v9062_v51  ;;  %v5908_v15 = vld [vmem:[%s11801_s6 + $0x368] sm:$0xff]  ;;  %v5975_v60 = vld [vmem:[%s11801_s6 + $0x580] sm:$0xff] }
 0x504   : > { %5786 = vrot.lane.b32.xlu1 %v5778_v17, %s7940_s18  ;;  %v5030_v22 = vsel %vm5020_vm5, %v4995_v42, %v5029_v16  ;;  %v5013_v5 = vsel %vm5012_vm0, %v4959_v20, %v11870_v36  ;;  %v7533_v27 = vpack.c.bf16 %v5922_v33, %v5921_v8  ;;  %v5007_v61 = vrot.slane %v10595_v0, %v9062_v51  ;;  %s6767_s18 = sshll.u32 %s404_s16, 3 }
 0x505   : > { %v5031_v43 = vsel %vm5022_vm4, %v5003_v3, %v5030_v22  ;;  %v5015_v31 = vsel %vm5014_vm1, %v11871_v35, %v5013_v5  ;;  %v7535_v57 = vpack.c.bf16 %v5906_v2, %v5905_v56  ;;  %v7537_v4 = vpack.c.bf16 %v5924_v47, %v5923_v59  ;;  %s406_s26 = scalar_lea.vmem [#allocation3], %s6767_s18  ;;  %s7871_s18 = scalar_lea.vmem %s7870_s23, 256 }
 0x506   : > { %v11041_v26 = vsel %vm5024_vm6, %v5011_v62, %v5031_v43  ;;  %v5017_v58 = vsel %vm5016_vm2, %v4975_v14, %v5015_v31  ;;  %7534 = vmatprep.subr.bf16.mxu0 %v7533_v27  ;;  %v5308_v1 = vrot.slane %v10403_v24, %v10358_v29  ;;  %v7539_v42 = vpack.c.bf16 %v5908_v15, %v5907_v32  ;;  %s6704_s27 = sshll.u32 %s406_s26, 4  ;;  %s11755_s27 = int_to_ptr.vmem [resolvable:$true] %s6704_s27 }
 0x507   : > { %v5019_v12 = vsel %vm5018_vm3, %v4983_v55, %v5017_v58  ;;  %7536 = vmatpush3.bf16.msra.mxu0 %v7535_v57  ;;  %v5316_v6 = vrot.slane %v10441_v25, %v10358_v29  ;;  %v7541_v62 = vpack.c.bf16 %v5926_v7, %v5925_v52  ;;  %v5300_v50 = vrot.slane %v10355_v19, %v10358_v29  ;;  %s7865_s20 = scalar_lea.vmem %s11755_s27, 128  ;;  %p7872_p0 = scmp.lt.s32.totalorder %s11755_s27, %s7870_s23 }
 0x508   : > { %v5021_v0 = vsel %vm5020_vm5, %v4991_v45, %v5019_v12  ;;  %7538 = vmatprep.subr.bf16.mxu0 %v7537_v4  ;;  %v5635_v39 = vrot.slane %v10386_v23, %v10358_v29  ;;  %v5332_v53 = vrot.slane %v10515_v46, %v10358_v29  ;;  %v5324_v38 = vrot.slane %v10497_v34, %v10358_v29  ;;  %p7866_p11 = scmp.ne.s32.totalorder %s11755_s27, %s7865_s20  ;;  %p7873_p1 = scmp.lt.s32.totalorder %s7871_s18, %s7865_s20 }
 0x509   : > { %v5023_v3 = vsel %vm5022_vm4, %v4999_v63, %v5021_v0  ;;  %v5651_v17 = vrot.slane %v10444_v28, %v10358_v29  ;;  %v7543_v48 = vpack.c.bf16 %v5910_v30, %v5909_v10  ;;  %v5340_v20 = vrot.slane %v10547_v9, %v10358_v29 }
 0x50a   : > { %v11068_v13 = vsel %vm5024_vm6, %v5007_v61, %v5023_v3  ;;  %v5364_v14 = vsel %vm5012_vm0, %v5308_v1, %v5300_v50  ;;  %v7577_v8 = vpack.c.bf16 %v5976_v40, %v5975_v60  ;;  %v5348_v33 = vrot.slane %v10568_v41, %v10358_v29  ;;  %p7867_p12 = pnand %p7866_p11, %p8048_p5  ;;  %p7874_p2 = por %p7873_p1, %p7872_p0 }
 0x50b   : > { %7540 = vmatpush3.bf16.msra.mxu0 %v7539_v42  ;;  %v5365_v16 = vsel %vm5014_vm1, %v5316_v6, %v5364_v14  ;;  %v5643_v55 = vrot.slane %v10449_v49, %v10358_v29  ;;  %v5356_v56 = vrot.slane %v10609_v37, %v10358_v29  ;;  %v5659_v22 = vrot.slane %v10505_v11, %v10358_v29  ;;  %v5834_v14 = vld [vmem:[%s11801_s6 + $0x118] sm:$0xff] }
 0x50c   : > { %7542 = vmatprep.subr.bf16.mxu0 %v7541_v62  ;;  %v5366_v2 = vsel %vm5016_vm2, %v5324_v38, %v5365_v16  ;;  %v5667_v45 = vrot.slane %v10534_v21, %v10358_v29  ;;  %v5675_v5 = vrot.slane %v10557_v18, %v10358_v29  ;;  %v5683_v43 = vrot.slane %v10571_v44, %v10358_v29  ;;  %p7868_p13 = pneg %p7867_p12 }
 0x50d   : > { %v5367_v36 = vsel %vm5018_vm3, %v5332_v53, %v5366_v2  ;;  %v5699_v59 = vsel %vm5012_vm0, %v5643_v55, %v5635_v39  ;;  %v5691_v31 = vrot.slane %v10891_v54, %v10358_v29  ;;  %v5296_v57 = vrot.slane %v10355_v19, %v9062_v51  ;;  %v5832_v39 = vld [vmem:[%s11801_s6 + $0x108] sm:$0xff]  ;;  %v5835_v55 = vld [vmem:[%s11801_s6 + $0x120] sm:$0xff]  ;;  %v5853_v2 = vld [vmem:[%s11801_s6 + $0x1b0] sm:$0xff] }
 0x50e   : > { %v5368_v47 = vsel %vm5020_vm5, %v5340_v20, %v5367_v36  ;;  %v5700_v63 = vsel %vm5014_vm1, %v5651_v17, %v5699_v59  ;;  %v5304_v29 = vrot.slane %v10403_v24, %v9062_v51  ;;  %v5312_v7 = vrot.slane %v10441_v25, %v9062_v51  ;;  %v5833_v20 = vld [vmem:[%s11801_s6 + $0x110] sm:$0xff]  ;;  %p7875_p3 = pnand %p7874_p2, %p7868_p13 }
 0x50f   : > { %7544 = vmatpush3.bf16.msra.mxu0 %v7543_v48  ;;  %v5369_v35 = vsel %vm5022_vm4, %v5348_v33, %v5368_v47  ;;  %v5701_v27 = vsel %vm5016_vm2, %v5659_v22, %v5700_v63  ;;  %v5320_v12 = vrot.slane %v10497_v34, %v9062_v51  ;;  %v5328_v4 = vrot.slane %v10515_v46, %v9062_v51  ;;  %v5852_v33 = vld [vmem:[%s11801_s6 + $0x1a8] sm:$0xff]  ;;  %v5837_v36 = vld [vmem:[%s11801_s6 + $0x130] sm:$0xff]  ;;  %v5855_v47 = vld [vmem:[%s11801_s6 + $0x1c0] sm:$0xff] }
 0x510   : > { %7578 = vmatprep.subr.bf16.mxu0 %v7577_v8  ;;  %v11112_v32 = vsel %vm5024_vm6, %v5356_v56, %v5369_v35  ;;  %v5702_v15 = vsel %vm5018_vm3, %v5667_v45, %v5701_v27  ;;  %v5336_v1 = vrot.slane %v10547_v9, %v9062_v51  ;;  %v5357_v19 = vsel %vm5012_vm0, %v5304_v29, %v5296_v57  ;;  %v5851_v8 = vld [vmem:[%s11801_s6 + $0x1a0] sm:$0xff]  ;;  %v5836_v56 = vld [vmem:[%s11801_s6 + $0x128] sm:$0xff]  ;;  %v5857_v29 = vld [vmem:[%s11801_s6 + $0x1d0] sm:$0xff] }
 0x511   : > { %v5703_v61 = vsel %vm5020_vm5, %v5675_v5, %v5702_v15  ;;  %v5344_v0 = vrot.slane %v10568_v41, %v9062_v51  ;;  %v5358_v42 = vsel %vm5014_vm1, %v5312_v7, %v5357_v19  ;;  %v5352_v24 = vrot.slane %v10609_v37, %v9062_v51  ;;  %v5838_v5 = vld [vmem:[%s11801_s6 + $0x138] sm:$0xff]  ;;  %v5839_v15 = vld [vmem:[%s11801_s6 + $0x140] sm:$0xff] }
 0x512   : > { %v5704_v58 = vsel %vm5022_vm4, %v5683_v43, %v5703_v61  ;;  %v5359_v25 = vsel %vm5016_vm2, %v5320_v12, %v5358_v42  ;;  %v5647_v34 = vrot.slane %v10444_v28, %v9062_v51  ;;  %v5631_v9 = vrot.slane %v10386_v23, %v9062_v51  ;;  %v5856_v43 = vld [vmem:[%s11801_s6 + $0x1c8] sm:$0xff]  ;;  %v5858_v7 = vld [vmem:[%s11801_s6 + $0x1d8] sm:$0xff] }
 0x513   : > { %v11120_v52 = vsel %vm5024_vm6, %v5691_v31, %v5704_v58  ;;  %v5360_v46 = vsel %vm5018_vm3, %v5328_v4, %v5359_v25  ;;  %v5639_v41 = vrot.slane %v10449_v49, %v9062_v51  ;;  %v5655_v3 = vrot.slane %v10505_v11, %v9062_v51  ;;  %v5840_v61 = vld [vmem:[%s11801_s6 + $0x148] sm:$0xff]  ;;  %v5842_v42 = vld [vmem:[%s11801_s6 + $0x158] sm:$0xff] }
 0x514   : > { %v5361_v6 = vsel %vm5020_vm5, %v5336_v1, %v5360_v46  ;;  %v5663_v62 = vrot.slane %v10534_v21, %v9062_v51  ;;  %v5671_v10 = vrot.slane %v10557_v18, %v9062_v51  ;;  %v5679_v30 = vrot.slane %v10571_v44, %v9062_v51  ;;  %v5831_v44 = vld [vmem:[%s11801_s6 + $0x100] sm:$0xff]  ;;  %v5860_v25 = vld [vmem:[%s11801_s6 + $0x1e8] sm:$0xff] }
 0x515   : > { %v5362_v37 = vsel %vm5022_vm4, %v5344_v0, %v5361_v6  ;;  %v5692_v23 = vsel %vm5012_vm0, %v5639_v41, %v5631_v9  ;;  %v5687_v11 = vrot.slane %v10891_v54, %v9062_v51  ;;  %v5849_v51 = vld [vmem:[%s11801_s6 + $0x190] sm:$0xff]  ;;  %v5850_v54 = vld [vmem:[%s11801_s6 + $0x198] sm:$0xff]  ;;  %v7451_v38 = vpack.c.bf16 %v5832_v39, %v5831_v44  ;;  %v5843_v6 = vld [vmem:[%s11801_s6 + $0x160] sm:$0xff] }
 0x516   : > { %v11153_v28 = vsel %vm5024_vm6, %v5352_v24, %v5362_v37  ;;  %v5693_v49 = vsel %vm5014_vm1, %v5647_v34, %v5692_v23  ;;  %v7453_v48 = vpack.c.bf16 %v5850_v54, %v5849_v51  ;;  %v7457_v16 = vpack.c.bf16 %v5852_v33, %v5851_v8  ;;  %v5841_v0 = vld [vmem:[%s11801_s6 + $0x150] sm:$0xff]  ;;  %v5859_v24 = vld [vmem:[%s11801_s6 + $0x1e0] sm:$0xff]  ;;  %v5844_v41 = vld [vmem:[%s11801_s6 + $0x168] sm:$0xff] }
 0x517   : > { %v5694_v50 = vsel %vm5016_vm2, %v5655_v3, %v5693_v49  ;;  %v7459_v22 = vpack.c.bf16 %v5836_v56, %v5835_v55  ;;  %v7463_v31 = vpack.c.bf16 %v5838_v5, %v5837_v36  ;;  %v7465_v27 = vpack.c.bf16 %v5856_v43, %v5855_v47  ;;  %v5861_v3 = vld [vmem:[%s11801_s6 + $0x1f0] sm:$0xff]  ;;  %v5862_v37 = vld [vmem:[%s11801_s6 + $0x1f8] sm:$0xff]  ;;  %v5879_v51 = vld [vmem:[%s11801_s6 + $0x280] sm:$0xff] }
 0x518   : > { %v5695_v21 = vsel %vm5018_vm3, %v5663_v62, %v5694_v50  ;;  %v7467_v4 = vpack.c.bf16 %v5840_v61, %v5839_v15  ;;  %v7469_v19 = vpack.c.bf16 %v5858_v7, %v5857_v29  ;;  %v7471_v46 = vpack.c.bf16 %v5842_v42, %v5841_v0  ;;  %v5959_v62 = vld [vmem:[%s11801_s6 + $0x500] sm:$0xff]  ;;  %v5977_v49 = vld [vmem:[%s11801_s6 + $0x590] sm:$0xff]  ;;  %v5978_v39 = vld [vmem:[%s11801_s6 + $0x598] sm:$0xff] }
 0x519   : > { %v5696_v60 = vsel %vm5020_vm5, %v5671_v10, %v5695_v21  ;;  %v7473_v9 = vpack.c.bf16 %v5860_v25, %v5859_v24  ;;  %v5960_v10 = vld [vmem:[%s11801_s6 + $0x508] sm:$0xff]  ;;  %v7475_v23 = vpack.c.bf16 %v5844_v41, %v5843_v6  ;;  %v5845_v50 = vld [vmem:[%s11801_s6 + $0x170] sm:$0xff]  ;;  %v5846_v21 = vld [vmem:[%s11801_s6 + $0x178] sm:$0xff]  ;;  %v7581_v8 = vpack.c.bf16 %v5978_v39, %v5977_v49 }
 0x51a   : > { %v5697_v40 = vsel %vm5022_vm4, %v5679_v30, %v5696_v60  ;;  %v5880_v54 = vld [vmem:[%s11801_s6 + $0x288] sm:$0xff]  ;;  %v5962_v33 = vld [vmem:[%s11801_s6 + $0x518] sm:$0xff]  ;;  %v5963_v47 = vld [vmem:[%s11801_s6 + $0x520] sm:$0xff] }
 0x51b   : > { %v11168_v18 = vsel %vm5024_vm6, %v5687_v11, %v5697_v40  ;;  %v7477_v11 = vpack.c.bf16 %v5862_v37, %v5861_v3  ;;  %v5864_v55 = vld [vmem:[%s11801_s6 + $0x208] sm:$0xff]  ;;  %v5865_v15 = vld [vmem:[%s11801_s6 + $0x210] sm:$0xff]  ;;  %v5866_v61 = vld [vmem:[%s11801_s6 + $0x218] sm:$0xff] }
 0x51c   : > { %v7487_v42 = vpack.c.bf16 %v5866_v61, %v5865_v15  ;;  %v5867_v6 = vld [vmem:[%s11801_s6 + $0x220] sm:$0xff]  ;;  %v5868_v41 = vld [vmem:[%s11801_s6 + $0x228] sm:$0xff]  ;;  %v5885_v37 = vld [vmem:[%s11801_s6 + $0x2b0] sm:$0xff] }
 0x51d   : > { %v5984_v3 = vld [vmem:[%s11801_s6 + $0x5c8] sm:$0xff]  ;;  %v7491_v49 = vpack.c.bf16 %v5868_v41, %v5867_v6  ;;  %v5990_v15 = vld [vmem:[%s11801_s6 + $0x5f8] sm:$0xff]  ;;  %v5891_v61 = vld [vmem:[%s11801_s6 + $0x2e0] sm:$0xff] }
 0x51e   : > { %v5877_v6 = vld [vmem:[%s11801_s6 + $0x270] sm:$0xff]  ;;  %v5878_v41 = vld [vmem:[%s11801_s6 + $0x278] sm:$0xff] }
 0x543   : > { %v11182_v53 = vpop.permute.xlu0 %5113 }
 0x544   : > { %v5792_v17 = vsel %vm5117_vm7, %v11041_v26, %v11182_v53  ;;  %v7455_v26 = vpack.c.bf16 %v5834_v14, %v5833_v20  ;;  %v7479_v20 = vpack.c.bf16 %v5846_v21, %v5845_v50  ;;  %v5985_v21 = vld [vmem:[%s11801_s6 + $0x5d0] sm:$0xff] }
 0x545   : > { %6072 = vmatprep.mubr.f32.mxu1 %v5792_v17  ;;  %v7579_v17 = vpack.c.bf16 %v5960_v10, %v5959_v62 }
 0x546   : > { %6073 = vmatmul.mubr.f32.vlgmr.msra.gmra.mrb[56].mxu1 %v11068_v13  ;;  %v5854_v13 = vld [vmem:[%s11801_s6 + $0x1b8] sm:$0xff] }
 0x547   : > { %7452 = vmatpush3.bf16.msra.mxu1 %v7451_v38  ;;  %v7461_v45 = vpack.c.bf16 %v5854_v13, %v5853_v2  ;;  %v5116_v58 = vpop.permute.xlu0 %5115  ;;  %v5979_v2 = vld [vmem:[%s11801_s6 + $0x5a0] sm:$0xff]  ;;  %v5980_v13 = vld [vmem:[%s11801_s6 + $0x5a8] sm:$0xff] }
 0x548   : > { %7454 = vmatprep.subr.bf16.mxu1 %v7453_v48  ;;  %v5961_v48 = vld [vmem:[%s11801_s6 + $0x510] sm:$0xff] }
 0x549   : > { %v7583_v5 = vpack.c.bf16 %v5962_v33, %v5961_v48  ;;  %v5987_v33 = vld [vmem:[%s11801_s6 + $0x5e0] sm:$0xff] }
 0x54b   : > { %7456 = vmatpush3.bf16.msra.mxu1 %v7455_v26  ;;  %v7481_v26 = vpack.c.bf16 %v5880_v54, %v5879_v51  ;;  %v5986_v54 = vld [vmem:[%s11801_s6 + $0x5d8] sm:$0xff] }
 0x54c   : > { %7458 = vmatprep.subr.bf16.mxu1 %v7457_v16  ;;  %v5863_v16 = vld [vmem:[%s11801_s6 + $0x200] sm:$0xff] }
 0x54d   : > { %v7483_v43 = vpack.c.bf16 %v5864_v55, %v5863_v16  ;;  %v5871_v16 = vld [vmem:[%s11801_s6 + $0x240] sm:$0xff]  ;;  %v5872_v55 = vld [vmem:[%s11801_s6 + $0x248] sm:$0xff] }
 0x54f   : > { %7460 = vmatpush3.bf16.msra.mxu1 %v7459_v22  ;;  %v5118_v22 = vsel %vm5117_vm7, %v11182_v53, %v5116_v58  ;;  %v5964_v53 = vld [vmem:[%s11801_s6 + $0x528] sm:$0xff] }
 0x550   : > { %v11218_v59 = vpop.permute.xlu1 %7851  ;;  %7462 = vmatprep.subr.bf16.mxu1 %v7461_v45  ;;  %v5881_v45 = vld [vmem:[%s11801_s6 + $0x290] sm:$0xff]  ;;  %v7587_v0 = vpack.c.bf16 %v5964_v53, %v5963_v47 }
 0x551   : > { %v7854_v63 = vunpack.i.h.bf16 %v11218_v59  ;;  %v7853_v35 = vunpack.i.l.bf16 %v11218_v59  ;;  %v5965_v59 = vld [vmem:[%s11801_s6 + $0x530] sm:$0xff] }
 0x552   : > { %v5989_v53 = vld [vmem:[%s11801_s6 + $0x5f0] sm:$0xff] }
 0x553   : > { %v5204_v57 = vsel %vm5203_vm8, %v7853_v35, %v7854_v63  ;;  %7464 = vmatpush3.bf16.msra.mxu1 %v7463_v31  ;;  %v11259_v34 = vpop.permute.xlu0 %5287  ;;  %v7585_v31 = vpack.c.bf16 %v5980_v13, %v5979_v2  ;;  %v5793_v29 = vsel %vm5203_vm8, %v5118_v22, %v7853_v35  ;;  %v5966_v35 = vld [vmem:[%s11801_s6 + $0x538] sm:$0xff]  ;;  %v5889_v2 = vld [vmem:[%s11801_s6 + $0x2d0] sm:$0xff] }
 0x554   : > { %7466 = vmatprep.subr.bf16.mxu1 %v7465_v27  ;;  %v5981_v27 = vld [vmem:[%s11801_s6 + $0x5b0] sm:$0xff]  ;;  %v7591_v10 = vpack.c.bf16 %v5966_v35, %v5965_v59  ;;  %v5890_v13 = vld [vmem:[%s11801_s6 + $0x2d8] sm:$0xff]  ;;  %v5876_v59 = vld [vmem:[%s11801_s6 + $0x268] sm:$0xff] }
 0x555   : > { %v5893_v35 = vld [vmem:[%s11801_s6 + $0x2f0] sm:$0xff] }
 0x557   : > { %v11243_v12 = vpop.permute.xlu1 %5285  ;;  %7468 = vmatpush3.bf16.msra.mxu1 %v7467_v4  ;;  %v5883_v4 = vld [vmem:[%s11801_s6 + $0x2a0] sm:$0xff] }
 0x558   : > { %v5794_v1 = vsel %vm5289_vm9, %v5204_v57, %v11243_v12  ;;  %7470 = vmatprep.subr.bf16.mxu1 %v7469_v19  ;;  %v5982_v57 = vld [vmem:[%s11801_s6 + $0x5b8] sm:$0xff] }
 0x559   : > { %6142 = vmatprep.mubr.f32.mxu1 %v5794_v1  ;;  %v5884_v1 = vld [vmem:[%s11801_s6 + $0x2a8] sm:$0xff]  ;;  %v7589_v25 = vpack.c.bf16 %v5982_v57, %v5981_v27  ;;  %v5874_v27 = vld [vmem:[%s11801_s6 + $0x258] sm:$0xff] }
 0x55b   : > { %7472 = vmatpush3.bf16.msra.mxu1 %v7471_v46  ;;  %v5537_v60 = vpop.permute.xlu0 %5536  ;;  %v5983_v46 = vld [vmem:[%s11801_s6 + $0x5c0] sm:$0xff] }
 0x55c   : > { %7474 = vmatprep.subr.bf16.mxu1 %v7473_v9  ;;  %v7489_v9 = vpack.c.bf16 %v5884_v1, %v5883_v4  ;;  %v7593_v50 = vpack.c.bf16 %v5984_v3, %v5983_v46  ;;  %v7605_v4 = vpack.c.bf16 %v5990_v15, %v5989_v53  ;;  %v5974_v1 = vld [vmem:[%s11801_s6 + $0x578] sm:$0xff]  ;;  %v5943_v3 = vld [vmem:[%s11801_s6 + $0x480] sm:$0xff] }
 0x55d   : > { %v5938_v53 = vld [vmem:[%s11801_s6 + $0x458] sm:$0xff] }
 0x55f   : > { %7476 = vmatpush3.bf16.msra.mxu1 %v7475_v23  ;;  %v5967_v23 = vld [vmem:[%s11801_s6 + $0x540] sm:$0xff] }
 0x560   : > { %7478 = vmatprep.subr.bf16.mxu1 %v7477_v11 }
 0x563   : > { %v7857_v30 = vpop.permute.xlu1 %7856  ;;  %7480 = vmatpush3.bf16.msra.mxu1 %v7479_v20  ;;  %v5969_v20 = vld [vmem:[%s11801_s6 + $0x550] sm:$0xff] }
 0x564   : > { %v7859_v40 = vunpack.i.h.bf16 %v7857_v30  ;;  %v7858_v44 = vunpack.i.l.bf16 %v7857_v30  ;;  %7482 = vmatprep.subr.bf16.mxu1 %v7481_v26  ;;  %v5968_v30 = vld [vmem:[%s11801_s6 + $0x548] sm:$0xff] }
 0x565   : > { %v7595_v48 = vpack.c.bf16 %v5968_v30, %v5967_v23  ;;  %v5928_v23 = vld [vmem:[%s11801_s6 + $0x408] sm:$0xff]  ;;  %v11872_v30 = vmov 0.0|0.0  }
 0x566   : > { %v5455_v38 = vsel %vm5117_vm7, %v7858_v44, %v7859_v40  ;;  %v5795_v56 = vsel %vm5117_vm7, %v11112_v32, %v7858_v44  ;;  %v5882_v32 = vld [vmem:[%s11801_s6 + $0x298] sm:$0xff]  ;;  %6143 = vmatmul.mubr.f32.vlgmr.msra.gmra.mrb[58].mxu1 %v5793_v29  ;;  %v5869_v40 = vld [vmem:[%s11801_s6 + $0x230] sm:$0xff] }
 0x567   : > { %v5796_v14 = vsel %vm5203_vm8, %v5455_v38, %v5537_v60  ;;  %v7485_v7 = vpack.c.bf16 %v5882_v32, %v5881_v45  ;;  %7484 = vmatpush3.bf16.msra.mxu1 %v7483_v43  ;;  %6212 = vmatprep.mubr.f32.mxu1 %v11153_v28  ;;  %v5886_v28 = vld [vmem:[%s11801_s6 + $0x2b8] sm:$0xff]  ;;  %v5887_v38 = vld [vmem:[%s11801_s6 + $0x2c0] sm:$0xff]  ;;  %v5972_v32 = vld [vmem:[%s11801_s6 + $0x568] sm:$0xff]  ;;  %v7501_v43 = vpack.c.bf16 %v5890_v13, %v5889_v2 }
 0x568   : > { %6282 = vmatprep.mubr.f32.mxu0 %v5796_v14  ;;  %v5870_v44 = vld [vmem:[%s11801_s6 + $0x238] sm:$0xff]  ;;  %v5971_v45 = vld [vmem:[%s11801_s6 + $0x560] sm:$0xff]  ;;  %v5973_v29 = vld [vmem:[%s11801_s6 + $0x570] sm:$0xff] }
 0x569   : > { %6283 = vmatmul.mubr.f32.vlgmr.msra.gmra.mrb[76].mxu0 %v5795_v56  ;;  %7486 = vmatprep.subr.bf16.mxu1 %v7485_v7  ;;  %v7495_v14 = vpack.c.bf16 %v5870_v44, %v5869_v40  ;;  %v5988_v56 = vld [vmem:[%s11801_s6 + $0x5e8] sm:$0xff]  ;;  %v7603_v57 = vpack.c.bf16 %v5972_v32, %v5971_v45  ;;  %v5929_v44 = vld [vmem:[%s11801_s6 + $0x410] sm:$0xff]  ;;  %v5935_v2 = vld [vmem:[%s11801_s6 + $0x440] sm:$0xff] }
 0x56a   : > { %7580 = vmatpush3.bf16.msra.mxu0 %v7579_v17  ;;  %v5888_v17 = vld [vmem:[%s11801_s6 + $0x2c8] sm:$0xff]  ;;  %v7601_v47 = vpack.c.bf16 %v5988_v56, %v5987_v33  ;;  %v5934_v33 = vld [vmem:[%s11801_s6 + $0x438] sm:$0xff] }
 0x56b   : > { %v11327_v36 = vpop.permute.xlu0 %7861  ;;  %7582 = vmatprep.subr.bf16.mxu0 %v7581_v8  ;;  %7488 = vmatpush3.bf16.msra.mxu1 %v7487_v42  ;;  %v7597_v8 = vpack.c.bf16 %v5986_v54, %v5985_v21  ;;  %v7497_v26 = vpack.c.bf16 %v5888_v17, %v5887_v38  ;;  %v5894_v42 = vld [vmem:[%s11801_s6 + $0x2f8] sm:$0xff]  ;;  %v5947_v54 = vld [vmem:[%s11801_s6 + $0x4a0] sm:$0xff]  ;;  %v5948_v38 = vld [vmem:[%s11801_s6 + $0x4a8] sm:$0xff] }
 0x56c   : > { %v7863_v63 = vunpack.i.l.bf16 %v11327_v36  ;;  %7490 = vmatprep.subr.bf16.mxu1 %v7489_v9  ;;  %v7509_v9 = vpack.c.bf16 %v5894_v42, %v5893_v35  ;;  %v5936_v13 = vld [vmem:[%s11801_s6 + $0x448] sm:$0xff]  ;;  %v5954_v45 = vld [vmem:[%s11801_s6 + $0x4d8] sm:$0xff] }
 0x56d   : > { %v5539_v58 = vpop.permute.xlu1 %5538  ;;  %v7563_v32 = vpack.c.bf16 %v5936_v13, %v5935_v2  ;;  %v5992_v35 = vld [vmem:[%s11801_s6 + $0x608] sm:$0xff] }
 0x56e   : > { %v5540_v19 = vsel %vm5203_vm8, %v5537_v60, %v5539_v58  ;;  %7584 = vmatpush3.bf16.msra.mxu0 %v7583_v5  ;;  %v7493_v60 = vpack.c.bf16 %v5886_v28, %v5885_v37  ;;  %v7499_v5 = vpack.c.bf16 %v5872_v55, %v5871_v16  ;;  %v5892_v58 = vld [vmem:[%s11801_s6 + $0x2e8] sm:$0xff]  ;;  %v7511_v28 = vpack.c.bf16 %v5878_v41, %v5877_v6  ;;  %v5995_v6 = vld [vmem:[%s11801_s6 + $0x620] sm:$0xff] }
 0x56f   : > { %v11367_v24 = vsel %vm5289_vm9, %v5540_v19, %v7863_v63  ;;  %7586 = vmatprep.subr.bf16.mxu0 %v7585_v31  ;;  %7492 = vmatpush3.bf16.msra.mxu1 %v7491_v49  ;;  %v5873_v31 = vld [vmem:[%s11801_s6 + $0x250] sm:$0xff]  ;;  %v7505_v19 = vpack.c.bf16 %v5892_v58, %v5891_v61  ;;  %v5944_v37 = vld [vmem:[%s11801_s6 + $0x488] sm:$0xff]  ;;  %v5939_v61 = vld [vmem:[%s11801_s6 + $0x460] sm:$0xff] }
 0x570   : > { %7494 = vmatprep.subr.bf16.mxu1 %v7493_v60  ;;  %v7503_v7 = vpack.c.bf16 %v5874_v27, %v5873_v31  ;;  %v5945_v49 = vld [vmem:[%s11801_s6 + $0x490] sm:$0xff]  ;;  %v11873_v60 = vmov 0.0   ;;  %v5952_v16 = vld [vmem:[%s11801_s6 + $0x4c8] sm:$0xff] }
 0x571   : > { %v5956_v31 = vld [vmem:[%s11801_s6 + $0x4e8] sm:$0xff] }
 0x572   : > { %v5789_v62 = vpop.permute.xlu0 %5788  ;;  %7588 = vmatpush3.bf16.msra.mxu0 %v7587_v0  ;;  %v5875_v0 = vld [vmem:[%s11801_s6 + $0x260] sm:$0xff]  ;;  %v5940_v58 = vld [vmem:[%s11801_s6 + $0x468] sm:$0xff] }
 0x573   : > { %7590 = vmatprep.subr.bf16.mxu0 %v7589_v25  ;;  %7496 = vmatpush3.bf16.msra.mxu1 %v7495_v14  ;;  %v7607_v25 = vpack.c.bf16 %v5974_v1, %v5973_v29  ;;  %v7507_v46 = vpack.c.bf16 %v5876_v59, %v5875_v0  ;;  %v5958_v29 = vld [vmem:[%s11801_s6 + $0x4f8] sm:$0xff]  ;;  %v5941_v1 = vld [vmem:[%s11801_s6 + $0x470] sm:$0xff]  ;;  %v5991_v59 = vld [vmem:[%s11801_s6 + $0x600] sm:$0xff] }
 0x574   : > { %7498 = vmatprep.subr.bf16.mxu1 %v7497_v26  ;;  %v5951_v26 = vld [vmem:[%s11801_s6 + $0x4c0] sm:$0xff]  ;;  %v7610_v42 = vpack.c.bf16 %v5992_v35, %v5991_v59  ;;  %v5996_v41 = vld [vmem:[%s11801_s6 + $0x628] sm:$0xff] }
 0x575   : > { %v7561_v56 = vpack.c.bf16 %v5952_v16, %v5951_v26  ;;  %v6599_v26 = vld [vmem:[%s11805_s10 + $0x18] sm:$0xff]  ;;  %v6513_v16 = vld [vmem:[%s11803_s8 + $0x70] sm:$0xff]  ;;  %v6601_v2 = vld [vmem:[%s11805_s10 + $0x28] sm:$0xff] }
 0x576   : > { %v5787_v11 = vpop.permute.xlu1 %5786  ;;  %7592 = vmatpush3.bf16.msra.mxu0 %v7591_v10  ;;  %v5927_v10 = vld [vmem:[%s11801_s6 + $0x400] sm:$0xff] }
 0x577   : > { %v11404_v39 = vsel %vm5117_vm7, %v5787_v11, %v5789_v62  ;;  %v5798_v51 = vsel %vm5117_vm7, %v11120_v52, %v5787_v11  ;;  %v5970_v52 = vld [vmem:[%s11801_s6 + $0x558] sm:$0xff]  ;;  %7594 = vmatprep.subr.bf16.mxu0 %v7593_v50  ;;  %7500 = vmatpush3.bf16.msra.mxu1 %v7499_v5  ;;  %v7545_v62 = vpack.c.bf16 %v5944_v37, %v5943_v3  ;;  %v7864_v50 = vunpack.i.h.bf16 %v11327_v36 }
 0x578   : > { %6422 = vmatprep.mubr.f32.mxu0 %v5798_v51  ;;  %v7599_v22 = vpack.c.bf16 %v5970_v52, %v5969_v20  ;;  %7502 = vmatprep.subr.bf16.mxu1 %v7501_v43  ;;  %v5946_v11 = vld [vmem:[%s11801_s6 + $0x498] sm:$0xff]  ;;  %v7547_v21 = vpack.c.bf16 %v5928_v23, %v5927_v10  ;;  %v7553_v20 = vpack.c.bf16 %v5948_v38, %v5947_v54  ;;  %v5949_v52 = vld [vmem:[%s11801_s6 + $0x4b0] sm:$0xff]  ;;  %v5955_v43 = vld [vmem:[%s11801_s6 + $0x4e0] sm:$0xff] }
 0x579   : > { %v7549_v40 = vpack.c.bf16 %v5946_v11, %v5945_v49  ;;  %v5930_v51 = vld [vmem:[%s11801_s6 + $0x418] sm:$0xff]  ;;  %v5625_v17 = vsel %vm5289_vm9, %v7863_v63, %v7864_v50  ;;  %v7569_v15 = vpack.c.bf16 %v5956_v31, %v5955_v43  ;;  %v7616_v3 = vpack.c.bf16 %v5996_v41, %v5995_v6  ;;  %v6500_v10 = vld [vmem:[%s11803_s8 + $0x8] sm:$0xff]  ;;  %v6501_v23 = vld [vmem:[%s11803_s8 + $0x10] sm:$0xff] }
 0x57a   : > { %7596 = vmatpush3.bf16.msra.mxu0 %v7595_v48  ;;  %v7551_v48 = vpack.c.bf16 %v5930_v51, %v5929_v44  ;;  %v5950_v36 = vld [vmem:[%s11801_s6 + $0x4b8] sm:$0xff]  ;;  %v6503_v50 = vld [vmem:[%s11803_s8 + $0x20] sm:$0xff]  ;;  %v6505_v44 = vld [vmem:[%s11803_s8 + $0x30] sm:$0xff] }
 0x57b   : > { %7598 = vmatprep.subr.bf16.mxu0 %v7597_v8  ;;  %7504 = vmatpush3.bf16.msra.mxu1 %v7503_v7  ;;  %v7557_v14 = vpack.c.bf16 %v5950_v36, %v5949_v52  ;;  %v5933_v8 = vld [vmem:[%s11801_s6 + $0x430] sm:$0xff]  ;;  %v7571_v7 = vpack.c.bf16 %v5940_v58, %v5939_v61  ;;  %v5998_v37 = vld [vmem:[%s11801_s6 + $0x638] sm:$0xff]  ;;  %v6508_v38 = vld [vmem:[%s11803_s8 + $0x48] sm:$0xff] }
 0x57c   : > { %7506 = vmatprep.subr.bf16.mxu1 %v7505_v19  ;;  %v7559_v55 = vpack.c.bf16 %v5934_v33, %v5933_v8  ;;  %v5942_v19 = vld [vmem:[%s11801_s6 + $0x478] sm:$0xff]  ;;  %v6512_v52 = vld [vmem:[%s11803_s8 + $0x68] sm:$0xff]  ;;  %v6598_v8 = vld [vmem:[%s11805_s10 + $0x10] sm:$0xff] }
 0x57d   : > { %v7575_v0 = vpack.c.bf16 %v5942_v19, %v5941_v1  ;;  %v6506_v51 = vld [vmem:[%s11803_s8 + $0x38] sm:$0xff]  ;;  %v6608_v58 = vld [vmem:[%s11805_s10 + $0x60] sm:$0xff] }
 0x57e   : > { %7600 = vmatpush3.bf16.msra.mxu0 %v7599_v22  ;;  %v5953_v22 = vld [vmem:[%s11801_s6 + $0x4d0] sm:$0xff]  ;;  %v7631_v54 = vpack.c.bf16 %v6506_v51, %v6505_v44  ;;  %v6896_v19 = vld [vmem:[%s11802_s7] ss:$0 sm:$0xff]  ;;  %v6611_v44 = vld [vmem:[%s11805_s10 + $0x78] sm:$0xff] }
 0x57f   : > { %7602 = vmatprep.subr.bf16.mxu0 %v7601_v47  ;;  %7508 = vmatpush3.bf16.msra.mxu1 %v7507_v46  ;;  %v7565_v5 = vpack.c.bf16 %v5954_v45, %v5953_v22  ;;  %v5937_v47 = vld [vmem:[%s11801_s6 + $0x450] sm:$0xff]  ;;  %v5994_v46 = vld [vmem:[%s11801_s6 + $0x618] sm:$0xff] }
 0x580   : > { %7510 = vmatprep.subr.bf16.mxu1 %v7509_v9  ;;  %v7567_v27 = vpack.c.bf16 %v5938_v53, %v5937_v47  ;;  %v6603_v22 = vld [vmem:[%s11805_s10 + $0x38] sm:$0xff]  ;;  %v6604_v47 = vld [vmem:[%s11805_s10 + $0x40] sm:$0xff]  ;;  %v6605_v53 = vld [vmem:[%s11805_s10 + $0x48] sm:$0xff] }
 0x581   : > { %v7655_v31 = vpack.c.bf16 %v6605_v53, %v6604_v47 }
 0x582   : > { %7604 = vmatpush3.bf16.msra.mxu0 %v7603_v57  ;;  %v5957_v57 = vld [vmem:[%s11801_s6 + $0x4f0] sm:$0xff] }
 0x583   : > { %7606 = vmatprep.subr.bf16.mxu0 %v7605_v4  ;;  %7512 = vmatpush3.bf16.msra.mxu1 %v7511_v28  ;;  %v7573_v4 = vpack.c.bf16 %v5958_v29, %v5957_v57  ;;  %v6609_v57 = vld [vmem:[%s11805_s10 + $0x68] sm:$0xff] }
 0x584   : > { %7546 = vmatprep.subr.bf16.mxu1 %v7545_v62  ;;  %v6499_v62 = vld [vmem:[%s11803_s8] sm:$0xff]  ;;  %v7661_v29 = vpack.c.bf16 %v6609_v57, %v6608_v58 }
 0x585   : > { %v7622_v49 = vpack.c.bf16 %v6500_v10, %v6499_v62 }
 0x586   : > { %7608 = vmatpush3.bf16.msra.mxu0 %v7607_v25  ;;  %v5993_v25 = vld [vmem:[%s11801_s6 + $0x610] sm:$0xff] }
 0x587   : > { %7621 = vmatprep.subr.bf16.mxu0 %v11872_v30  ;;  %v7613_v9 = vpack.c.bf16 %v5994_v46, %v5993_v25 }
 0x589   : > { %6423 = vmatmul.mubr.f32.vlgmr.msra.gmra.mrb[78].mxu0 %v11168_v18  ;;  %v5290_v18 = vsel %vm5289_vm9, %v11243_v12, %v11259_v34  ;;  %v5931_v12 = vld [vmem:[%s11801_s6 + $0x420] sm:$0xff]  ;;  %v5932_v34 = vld [vmem:[%s11801_s6 + $0x428] sm:$0xff] }
 0x58a   : > { %7207 = vmatprep.mubr.msk.f32.mxu0 %vm7943_vm10, %v11873_v60  ;;  %6213 = vmatmul.mubr.f32.vlgmr.msra.gmra.mrb[60].mxu1 %v5290_v18  ;;  %v7555_v63 = vpack.c.bf16 %v5932_v34, %v5931_v12  ;;  %v6507_v18 = vld [vmem:[%s11803_s8 + $0x40] sm:$0xff] }
 0x58b   : > { %7548 = vmatpush3.bf16.msra.mxu1 %v7547_v21  ;;  %6352 = vmatprep.mubr.f32.mxu1 %v5625_v17  ;;  %v6504_v21 = vld [vmem:[%s11803_s8 + $0x28] sm:$0xff]  ;;  %v7634_v17 = vpack.c.bf16 %v6508_v38, %v6507_v18  ;;  %v6511_v34 = vld [vmem:[%s11803_s8 + $0x60] sm:$0xff] }
 0x58c   : > { %7550 = vmatprep.subr.bf16.mxu1 %v7549_v40  ;;  %7623 = vmatpush3.bf16.msra.mxu0 %v7622_v49  ;;  %v7628_v40 = vpack.c.bf16 %v6504_v21, %v6503_v50  ;;  %v7640_v36 = vpack.c.bf16 %v6512_v52, %v6511_v34  ;;  %v6898_v18 = vld [vmem:[%s11804_s9] ss:$0 sm:$0xff] }
 0x58d   : > { %7624 = vmatprep.subr.bf16.mxu0 %v11872_v30 }
 0x58f   : > { %7552 = vmatpush3.bf16.msra.mxu1 %v7551_v48  ;;  %v6509_v48 = vld [vmem:[%s11803_s8 + $0x50] sm:$0xff] }
 0x590   : > { %7554 = vmatprep.subr.bf16.mxu1 %v7553_v20  ;;  %v6510_v20 = vld [vmem:[%s11803_s8 + $0x58] sm:$0xff] }
 0x591   : > { %v7637_v12 = vpack.c.bf16 %v6510_v20, %v6509_v48  ;;  %v6900_v20 = vld [vmem:[%s11806_s11] ss:$0 sm:$0xff] }
 0x593   : > { %7556 = vmatpush3.bf16.msra.mxu1 %v7555_v63  ;;  %v6596_v63 = vld [vmem:[%s11805_s10] sm:$0xff] }
 0x594   : > { %7558 = vmatprep.subr.bf16.mxu1 %v7557_v14  ;;  %v6597_v14 = vld [vmem:[%s11805_s10 + $0x8] sm:$0xff] }
 0x595   : > { %v7643_v33 = vpack.c.bf16 %v6597_v14, %v6596_v63 }
 0x597   : > { %7560 = vmatpush3.bf16.msra.mxu1 %v7559_v55  ;;  %v7646_v55 = vpack.c.bf16 %v6599_v26, %v6598_v8 }
 0x598   : > { %7562 = vmatprep.subr.bf16.mxu1 %v7561_v56  ;;  %v6600_v56 = vld [vmem:[%s11805_s10 + $0x20] sm:$0xff] }
 0x599   : > { %v7649_v13 = vpack.c.bf16 %v6601_v2, %v6600_v56 }
 0x59b   : > { %7564 = vmatpush3.bf16.msra.mxu1 %v7563_v32 }
 0x59c   : > { %7566 = vmatprep.subr.bf16.mxu1 %v7565_v5 }
 0x59f   : > { %7568 = vmatpush3.bf16.msra.mxu1 %v7567_v27  ;;  %v6606_v27 = vld [vmem:[%s11805_s10 + $0x50] sm:$0xff] }
 0x5a0   : > { %7570 = vmatprep.subr.bf16.mxu1 %v7569_v15  ;;  %v6607_v15 = vld [vmem:[%s11805_s10 + $0x58] sm:$0xff] }
 0x5a1   : > { %v7658_v61 = vpack.c.bf16 %v6607_v15, %v6606_v27 }
 0x5a3   : > { %7572 = vmatpush3.bf16.msra.mxu1 %v7571_v7 }
 0x5a4   : > { %7574 = vmatprep.subr.bf16.mxu1 %v7573_v4 }
 0x5a7   : > { %7576 = vmatpush3.bf16.msra.mxu1 %v7575_v0 }
 0x5a8   : > { %7609 = vmatprep.subr.bf16.mxu1 %v11872_v30 }
 0x5aa   : > { %6353 = vmatmul.mubr.f32.vlgmr.msra.gmra.mrb[62].mxu1 %v11367_v24  ;;  %v5997_v24 = vld [vmem:[%s11801_s6 + $0x630] sm:$0xff] }
 0x5ab   : > { %7611 = vmatpush3.bf16.msra.mxu1 %v7610_v42  ;;  %7174 = vmatprep.mubr.msk.f32.mxu1 %vm7943_vm10, %v11873_v60  ;;  %v7619_v28 = vpack.c.bf16 %v5998_v37, %v5997_v24 }
 0x5ac   : > { %7612 = vmatprep.subr.bf16.mxu1 %v11872_v30 }
 0x5af   : > { %7614 = vmatpush3.bf16.msra.mxu1 %v7613_v9 }
 0x5b0   : > { %7615 = vmatprep.subr.bf16.mxu1 %v11872_v30 }
 0x5b3   : > { %7617 = vmatpush3.bf16.msra.mxu1 %v7616_v3 }
 0x5b4   : > { %7618 = vmatprep.subr.bf16.mxu1 %v11872_v30 }
 0x5b7   : > { %7620 = vmatpush3.bf16.msra.mxu1 %v7619_v28 }
 0x5b8   : > { %7642 = vmatprep.subr.bf16.mxu1 %v11872_v30 }
 0x5ba   : > { %7175 = vmatmul.mubr.msk.f32.vlgmr.msra.gmra.mrb[64].mxu1 %vm5203_vm8, %v11404_v39  ;;  %v6502_v39 = vld [vmem:[%s11803_s8 + $0x18] sm:$0xff] }
 0x5bb   : > { %7242 = vmatprep.mubr.msk.f32.mxu1 %vm7943_vm10, %v11873_v60  ;;  %v7625_v11 = vpack.c.bf16 %v6502_v39, %v6501_v23  ;;  %7644 = vmatpush3.bf16.msra.mxu1 %v7643_v33 }
 0x5bc   : > { %7645 = vmatprep.subr.bf16.mxu1 %v11872_v30 }
 0x5bd   : > { %7626 = vmatpush3.bf16.msra.mxu0 %v7625_v11 }
 0x5be   : > { %7627 = vmatprep.subr.bf16.mxu0 %v11872_v30 }
 0x5bf   : > { %7647 = vmatpush3.bf16.msra.mxu1 %v7646_v55 }
 0x5c0   : > { %7648 = vmatprep.subr.bf16.mxu1 %v11872_v30 }
 0x5c1   : > { %7629 = vmatpush3.bf16.msra.mxu0 %v7628_v40  ;;  %v6610_v40 = vld [vmem:[%s11805_s10 + $0x70] sm:$0xff] }
 0x5c2   : > { %7630 = vmatprep.subr.bf16.mxu0 %v11872_v30  ;;  %v7664_v51 = vpack.c.bf16 %v6611_v44, %v6610_v40 }
 0x5c3   : > { %7650 = vmatpush3.bf16.msra.mxu1 %v7649_v13 }
 0x5c4   : > { %7651 = vmatprep.subr.bf16.mxu1 %v11872_v30 }
 0x5c5   : > { %7632 = vmatpush3.bf16.msra.mxu0 %v7631_v54 }
 0x5c6   : > { %7633 = vmatprep.subr.bf16.mxu0 %v11872_v30 }
 0x5c9   : > { %7635 = vmatpush3.bf16.msra.mxu0 %v7634_v17 }
 0x5ca   : > { %7636 = vmatprep.subr.bf16.mxu0 %v11872_v30 }
 0x5cd   : > { %7638 = vmatpush3.bf16.msra.mxu0 %v7637_v12 }
 0x5ce   : > { %7639 = vmatprep.subr.bf16.mxu0 %v11872_v30 }
 0x5d1   : > { %7641 = vmatpush3.bf16.msra.mxu0 %v7640_v36 }
 0x5d2   : > { %7205 = vmatprep.subr.mxu0 %v11873_v60  ;;  %v6602_v60 = vld [vmem:[%s11805_s10 + $0x30] sm:$0xff] }
 0x5d3   : > { %v7652_v32 = vpack.c.bf16 %v6603_v22, %v6602_v60 }
 0x5d5   : > { %7206 = vmatpush3.msra.mxu0 %v6513_v16  ;;  %7653 = vmatpush3.bf16.msra.mxu1 %v7652_v32 }
 0x5d6   : > { %7654 = vmatprep.subr.bf16.mxu1 %v11872_v30 }
 0x5d9   : > { %7656 = vmatpush3.bf16.msra.mxu1 %v7655_v31 }
 0x5da   : > { %7657 = vmatprep.subr.bf16.mxu1 %v11872_v30 }
 0x5dd   : > { %7659 = vmatpush3.bf16.msra.mxu1 %v7658_v61 }
 0x5de   : > { %7660 = vmatprep.subr.bf16.mxu1 %v11872_v30 }
 0x5e1   : > { %7662 = vmatpush3.bf16.msra.mxu1 %v7661_v29 }
 0x5e2   : > { %7663 = vmatprep.subr.bf16.mxu1 %v11872_v30 }
 0x5e5   : > { %7665 = vmatpush3.bf16.msra.mxu1 %v7664_v51 }
 0x619   : > { %v6938_v45 = vpop.f32.mrb[56].mxu1 }
 0x61a   : > { %v6939_v5 = vpop.f32.mrb[57].mxu1 }
 0x61b   : > { %v6940_v43 = vadd.f32 %v6939_v5, %v6938_v45 }
 0x61d   : > { %v6075_v35 = vadd.f32 %v6940_v43, %v6896_v19 }
 0x639   : > { %v6973_v0 = vpop.f32.mrb[58].mxu1 }
 0x63a   : > { %v6974_v59 = vpop.f32.mrb[59].mxu1 }
 0x63b   : > { %v6975_v42 = vadd.f32 %v6974_v59, %v6973_v0 }
 0x63c   : > { %v7043_v7 = vpop.f32.mrb[76].mxu0 }
 0x63d   : > { %v7044_v4 = vpop.f32.mrb[77].mxu0  ;;  %v6145_v25 = vadd.f32 %v6975_v42, %v6075_v35 }
 0x63e   : > { %v7045_v1 = vadd.f32 %v7044_v4, %v7043_v7 }
 0x65c   : > { %v7113_v46 = vpop.f32.mrb[78].mxu0 }
 0x65d   : > { %v7114_v9 = vpop.f32.mrb[79].mxu0  ;;  %v7008_v41 = vpop.f32.mrb[60].mxu1 }
 0x65e   : > { %v7115_v6 = vadd.f32 %v7114_v9, %v7113_v46  ;;  %v7009_v3 = vpop.f32.mrb[61].mxu1 }
 0x65f   : > { %v7010_v24 = vadd.f32 %v7009_v3, %v7008_v41 }
 0x661   : > { %v6215_v37 = vadd.f32 %v7010_v24, %v6145_v25 }
 0x663   : > { %v6285_v30 = vadd.f32 %v7045_v1, %v6215_v37 }
 0x67d   : > { %v7078_v28 = vpop.f32.mrb[62].mxu1 }
 0x67e   : > { %v7079_v62 = vpop.f32.mrb[63].mxu1 }
 0x67f   : > { %v7080_v10 = vadd.f32 %v7079_v62, %v7078_v28 }
 0x681   : > { %v6355_v23 = vadd.f32 %v7080_v10, %v6285_v30 }
 0x683   : > { %v6425_v49 = vadd.f32 %v7115_v6, %v6355_v23 }
 0x68d   : > { %v6494_v39 = vpop.f32.mrb[64].mxu1 }
 0x68e   : > { %v6495_v11 = vadd.f32 %v6494_v39, %v6425_v49  ;;  %v7176_v50 = vpop.f32.mrb[65].mxu1 }
 0x690   : > { %v6498_v21 = vmax.f32 %v6495_v11, 0.0 }
 0x692   : > { %7208 = vmatmul.mubr.msk.f32.vlgmr.msra.gmra.mrb[80].mxu0 %vm6521_vm11, %v6498_v21 }
 0x765   : > { %v6591_v54 = vpop.f32.mrb[80].mxu0 }
 0x766   : > { %v6592_v38 = vadd.f32 %v6898_v18, %v6591_v54  ;;  %v7209_v17 = vpop.f32.mrb[81].mxu0 }
 0x768   : > { %v6595_v48 = vmax.f32 %v6592_v38, 0.0 }
 0x76a   : > { %7243 = vmatmul.mubr.f32.vlgmr.msra.gmra.mrb[66].mxu1 %v6595_v48 }
 0x83d   : > { %v6685_v12 = vpop.f32.mrb[66].mxu1 }
 0x83e   : > { %v6686_v34 = vadd.f32 %v6900_v20, %v6685_v12  ;;  %v7244_v52 = vpop.f32.mrb[67].mxu1 }
 0x840   : > { %6689 = vst [vmem:[%s406_s26] sm:$0xff] %v6686_v34 }
 0x841   : > { %7878 = shalt.err (!%p7875_p3)
}
 0x842   : > { %s7879_s16 = scalar_lea.hbm %s11753_s30, 128  ;;  %s7883_s15 = scalar_lea.hbm %s11807_s12, 256 }
 0x843   : > { %p7880_p4 = scmp.ne.s32.totalorder %s11753_s30, %s7879_s16  ;;  %p7884_p9 = scmp.lt.u32.totalorder %s11753_s30, %s11807_s12 }
 0x844   : > { %p7885_p10 = scmp.lt.u32.totalorder %s7883_s15, %s7879_s16  ;;  %p7887_p12 = scmp.lt.u32.totalorder %s7879_s16, %s11753_s30 }
 0x845   : > { %p7881_p7 = pnand %p7880_p4, %p8048_p5 }
 0x846   : > { %p7886_p11 = por %p7885_p10, %p7884_p9 }
 0x847   : > { %p7882_p8 = pneg %p7881_p7 }
 0x848   : > { %p7888_p13 = por %p7887_p12, %p7886_p11 }
 0x84a   : > { %p7889_p0 = pnand %p7888_p13, %p7882_p8 }
 0x84c   : > { %7892 = shalt.err (!%p7889_p0)
}
 0x84d   : > { %7706 = dma.vmem_to_hbm [thread:$0]  (%p8048_p5), %s11755_s27, 128, %s11753_s30, %s6691_s29  }
 0x84e PF: > { %p7712_p1 = scmp.ge.s32.totalorder %s7927_s24, 2  ;;  %s6716_s20 = sand.u32 1, %s7915_s21  }
 0x84f   : > { %s6717_s25 = scalar_lea.sflag [#allocation4], %s6716_s20 }
 0x850   : > { %p7709_p2 = pnand %p7712_p1, %p8052_p6 }
 0x852   : > { %7910 = dma.done.wait (!%p7709_p2), %s6717_s25, 128  }
 0x853   : > { %7912 = vsyncadd (!%p7709_p2), %s6717_s25, 4294967168  ;;  %s11875_s24 = sld [smem:[#allocation7_spill]]  ;;  %s11876_s23 = sld [smem:[#allocation6_spill]] }
 0x854   : > { %s11877_s18 = sld [smem:[#allocation8_spill]]  ;;  %s11878_s21 = smov %s7919_s22 }
 0x859   : > { %p22_p3 = scmp.ge.s32.totalorder %s11875_s24, 4   ;;  %s11879_s22 = smov %s11876_s23 }
 0x85a   : > { %s11880_s23 = smov %s11877_s18 }
 0x85b   :  { %24 = sbr.rel (!%p22_p3) target bundleno = 3 (0x3), region = 130 }
 0x862   :  { %6722 = vsyncpa [#allocation4], 1 }
 0x863   :  { %6724 = vsyncpa [#allocation4 + $0x1], 1 }

</bundles_post_ra>
